<compile_context>
chip_gen: v6e
topology: v6e:2x2x1
jax: 0.10.0
libtpu: 0.0.40
codegen_flags: <defaults>
</compile_context>

<pallas_src>
import math
import functools

import jax
import jax.numpy as jnp
from jax import lax
from jax.experimental import pallas as pl
from jax.experimental.pallas import tpu as pltpu

_EPS = 1e-5          # nn.LayerNorm default
_LEAKY_SLOPE = 0.01  # nn.LeakyReLU default


def _layernorm(x, gamma, beta):
    mu = jnp.mean(x, axis=-1, keepdims=True)
    var = jnp.mean(jnp.square(x - mu), axis=-1, keepdims=True)
    return (x - mu) * lax.rsqrt(var + _EPS) * gamma + beta


def _leaky_relu(x):
    return jnp.where(x >= 0, x, _LEAKY_SLOPE * x)


# -----------------------------------------------------------------------------
# Fused kernel: MLP -> 3-layer GRU -> self-attention (+residual + LayerNorm)
# -----------------------------------------------------------------------------
def fused_kernel(x_ref, w0_ref, sqw_ref, gruw_ref, grub_ref, vec_ref,
                 out_ref, seq_scr, *, num_heads, hidden, out_size, in_size):
    f32 = jnp.float32
    Bb, T, _ = x_ref.shape            # batch block, timesteps
    H = out_size

    def vec(i, n):                    # (1, n) row from the packed vector slab
        return vec_ref[i:i + 1, 0:n]

    # ---------------- MLP: 3 x (Linear -> LayerNorm -> LeakyReLU) ------------
    # Whole batch block flattened to (Bb*T, feat) so every matmul fills
    # Bb*T sublanes instead of T.
    x = x_ref[...].reshape(Bb * T, in_size)
    w0 = w0_ref[...]                                   # (in_size, hidden)
    if in_size == 1:
        h = x * w0 + vec(0, hidden)                    # K=1 matmul as broadcast
    else:
        h = jnp.dot(x, w0, preferred_element_type=f32) + vec(0, hidden)
    h = _leaky_relu(_layernorm(h, vec(1, hidden), vec(2, hidden)))
    for li in range(2):
        w = sqw_ref[li][0:hidden, 0:hidden]
        base = 3 * (li + 1)
        h = jnp.dot(h, w, preferred_element_type=f32) + vec(base, hidden)
        h = _leaky_relu(_layernorm(h, vec(base + 1, hidden), vec(base + 2, hidden)))

    # ---------------- 3-layer GRU (PyTorch gate equations) -------------------
    # Input projections for all Bb*T steps hoisted out of the recurrence as a
    # single (Bb*T, din) x (din, 3H) matmul per layer.  Per timestep: one
    # (Bb, H) x (H, 3H) matmul, one fused sigmoid on the r|z lanes, one tanh.
    seq = h                                            # (Bb*T, din)
    din = hidden
    for layer in range(3):
        wih = gruw_ref[2 * layer][0:din, :]            # (din, 3H)
        whh = gruw_ref[2 * layer + 1][0:H, :]          # (H, 3H)
        bih = grub_ref[2 * layer:2 * layer + 1, :]     # (1, 3H)
        bhh = grub_ref[2 * layer + 1:2 * layer + 2, :] # (1, 3H)

        gi = jnp.dot(seq, wih, preferred_element_type=f32) + bih   # (Bb*T, 3H)
        gi = gi.reshape(Bb, T, 3 * H)

        hs = jnp.zeros((Bb, H), f32)
        for t in range(T):                             # static unroll (serial path)
            gi_t = gi[:, t, :]                         # (Bb, 3H)
            if t == 0:                                 # h_prev == 0: matmul vanishes
                gh = bhh                               # (1, 3H) broadcasts
            else:
                gh = jnp.dot(hs, whh, preferred_element_type=f32) + bhh
            rz = jax.nn.sigmoid(gi_t[:, 0:2 * H] + gh[:, 0:2 * H])  # fused r|z
            r = rz[:, 0:H]
            z = rz[:, H:2 * H]
            n = jnp.tanh(gi_t[:, 2 * H:] + r * gh[:, 2 * H:])
            hs = (1.0 - z) * n + z * hs
            seq_scr[:, t, :] = hs                      # row store into VMEM scratch
        seq = seq_scr[...].reshape(Bb * T, H)
        din = H

    # ---------------- self-attention + residual + LayerNorm ------------------
    # TODO(synk): AttSubBlock source was not provided; implemented as
    # nn.MultiheadAttention(batch_first) followed by LayerNorm(att_out + q).
    E = H
    hd = E // num_heads
    y2 = seq                                           # (Bb*T, E)
    # 1/sqrt(hd) scale folded into wq/bq by the wrapper
    q = jnp.dot(y2, sqw_ref[2][0:E, 0:E], preferred_element_type=f32) + vec(9, E)
    k = jnp.dot(y2, sqw_ref[3][0:E, 0:E], preferred_element_type=f32) + vec(10, E)
    v = jnp.dot(y2, sqw_ref[4][0:E, 0:E], preferred_element_type=f32) + vec(11, E)

    def split_heads(m):
        # (Bb*T, E) -> (num_heads*Bb, T, hd): static lane slices + leading-dim
        # reshapes only; heads land on the batched-einsum axis.
        return jnp.concatenate(
            [m[:, i * hd:(i + 1) * hd].reshape(Bb, T, hd) for i in range(num_heads)],
            axis=0)

    qh, kh, vh = split_heads(q), split_heads(k), split_heads(v)
    s = jnp.einsum('gqd,gkd->gqk', qh, kh, preferred_element_type=f32)
    s = s - jnp.max(s, axis=-1, keepdims=True)
    p = jnp.exp(s)
    # exact reciprocal keeps the 1e-4 reference check tight;
    # approx=True (EUP slot) is a further, essentially free win if tolerance allows.
    p = p * pl.reciprocal(jnp.sum(p, axis=-1, keepdims=True), approx=False)
    o = jnp.einsum('gqk,gkd->gqd', p, vh, preferred_element_type=f32)
    o = jnp.concatenate(
        [o[i * Bb:(i + 1) * Bb].reshape(Bb * T, hd) for i in range(num_heads)],
        axis=-1)                                       # (Bb*T, E)
    attn = jnp.dot(o, sqw_ref[5][0:E, 0:E], preferred_element_type=f32) + vec(12, E)
    out = _layernorm(attn + y2, vec(13, E), vec(14, E))
    out_ref[...] = out.reshape(Bb, T, E)


# ------------------------------- wrapper --------------------------------------
def input_att_block_forward(x, params, *, hidden_size, out_size, num_heads,
                            batch_block=None):
    B, T, in_size = x.shape
    H = out_size
    hd = out_size // num_heads
    scale = 1.0 / math.sqrt(hd)
    D = max(hidden_size, out_size)     # lane/sublane-padded dim for packed slabs

    if batch_block is None:
        # keep 2 grid programs when possible (v7x has 2 TCs); on v5e/v6e pass
        # batch_block=B to collapse to a single program.
        batch_block = B // 2 if (B >= 2 and B % 2 == 0) else 1
    assert B % batch_block == 0, "batch must be divisible by batch_block"

    def pad2(a, rows, cols):
        r, c = a.shape
        return jnp.pad(a, ((0, rows - r), (0, cols - c)))

    def padv(v):
        return jnp.pad(v, (0, D - v.shape[0]))

    mlp = params['mlp']
    a = params['att']

    # slab 1: MLP layer-0 weight, pre-transposed to (in_size, hidden)
    w0 = mlp[0][0].T

    # slab 2: all square weights (6, D, D): mlp1, mlp2, wq*scale, wk, wv, wo
    sqw = jnp.stack([
        pad2(mlp[1][0].T, D, D), pad2(mlp[2][0].T, D, D),
        pad2(a['wq'].T * scale, D, D), pad2(a['wk'].T, D, D),
        pad2(a['wv'].T, D, D), pad2(a['wo'].T, D, D)], axis=0)

    # slab 3/4: GRU weights (6, D, 3H) and biases (6, 3H): [wih_l, whh_l] * 3
    gw, gb = [], []
    for (wih, whh, bih, bhh) in params['gru']:
        gw += [pad2(wih.T, D, 3 * H), pad2(whh.T, D, 3 * H)]
        gb += [bih, bhh]
    gruw = jnp.stack(gw, axis=0)
    grub = jnp.stack(gb, axis=0)

    # slab 5: all (hidden,)/(out,) vectors, zero-padded to D lanes (15, D)
    vec_rows = []
    for (_, b, g, be) in mlp:
        vec_rows += [padv(b), padv(g), padv(be)]          # rows 0..8
    vec_rows += [padv(a['bq'] * scale), padv(a['bk']), padv(a['bv']),
                 padv(a['bo']), padv(a['g']), padv(a['be'])]  # rows 9..14
    vecs = jnp.stack(vec_rows, axis=0)

    kern = functools.partial(fused_kernel, num_heads=num_heads,
                             hidden=hidden_size, out_size=out_size,
                             in_size=in_size)
    vmem = pl.BlockSpec(memory_space=pltpu.MemorySpace.VMEM)
    return pl.pallas_call(
        kern,
        out_shape=jax.ShapeDtypeStruct((B, T, out_size), jnp.float32),
        grid=(B // batch_block,),
        in_specs=[pl.BlockSpec((batch_block, T, in_size), lambda b: (b, 0, 0)),
                  vmem, vmem, vmem, vmem, vmem],
        out_specs=pl.BlockSpec((batch_block, T, out_size), lambda b: (b, 0, 0)),
        scratch_shapes=[pltpu.VMEM((batch_block, T, out_size), jnp.float32)],
        compiler_params=pltpu.CompilerParams(
            dimension_semantics=("parallel",)),        # v7x: blocks split across 2 TCs
    )(x, w0, sqw, gruw, grub, vecs)


# ------------------------- deterministic parameters ---------------------------
def init_params(key, in_size, hidden, out_size):
    keys = iter(jax.random.split(key, 32))

    def rnd(shape, scale=0.1):
        return jax.random.normal(next(keys), shape, jnp.float32) * scale

    mlp = []
    d_in = in_size
    for _ in range(3):
        mlp.append((rnd((hidden, d_in)), rnd((hidden,)),
                    jnp.ones((hidden,), jnp.float32), jnp.zeros((hidden,), jnp.float32)))
        d_in = hidden

    gru = []
    d_in = hidden
    for _ in range(3):
        gru.append((rnd((3 * out_size, d_in)), rnd((3 * out_size, out_size)),
                    rnd((3 * out_size,)), rnd((3 * out_size,))))
        d_in = out_size

    att = dict(
        wq=rnd((out_size, out_size)), wk=rnd((out_size, out_size)), wv=rnd((out_size, out_size)),
        bq=rnd((out_size,)), bk=rnd((out_size,)), bv=rnd((out_size,)),
        wo=rnd((out_size, out_size)), bo=rnd((out_size,)),
        g=jnp.ones((out_size,), jnp.float32), be=jnp.zeros((out_size,), jnp.float32),
    )
    return dict(mlp=mlp, gru=gru, att=att)


# --------------------------- pure-JAX reference --------------------------------
def ref_forward(x, params, *, out_size, num_heads):
    B, T, _ = x.shape
    h = x
    for (w, b, g, be) in params['mlp']:
        h = h @ w.T + b
        h = _layernorm(h, g, be)
        h = jnp.where(h >= 0, h, _LEAKY_SLOPE * h)

    seq = h
    for (wih, whh, bih, bhh) in params['gru']:
        H = out_size

        def step(h_prev, x_t):
            gi = x_t @ wih.T + bih
            gh = h_prev @ whh.T + bhh
            r = jax.nn.sigmoid(gi[:, :H] + gh[:, :H])
            z = jax.nn.sigmoid(gi[:, H:2 * H] + gh[:, H:2 * H])
            n = jnp.tanh(gi[:, 2 * H:] + r * gh[:, 2 * H:])
            h_new = (1.0 - z) * n + z * h_prev
            return h_new, h_new

        _, ys = lax.scan(step, jnp.zeros((B, H), jnp.float32), jnp.transpose(seq, (1, 0, 2)))
        seq = jnp.transpose(ys, (1, 0, 2))
    y = seq

    a = params['att']
    E = out_size
    hd = E // num_heads
    q = (y @ a['wq'].T + a['bq']).reshape(B, T, num_heads, hd).transpose(0, 2, 1, 3)
    k = (y @ a['wk'].T + a['bk']).reshape(B, T, num_heads, hd).transpose(0, 2, 1, 3)
    v = (y @ a['wv'].T + a['bv']).reshape(B, T, num_heads, hd).transpose(0, 2, 1, 3)
    s = jnp.einsum('bhqd,bhkd->bhqk', q, k) / math.sqrt(hd)
    p = jax.nn.softmax(s, axis=-1)
    o = jnp.einsum('bhqk,bhkd->bhqd', p, v).transpose(0, 2, 1, 3).reshape(B, T, E)
    o = o @ a['wo'].T + a['bo']
    return _layernorm(o + y, a['g'], a['be'])


if __name__ == "__main__":
    IN_SIZE, HIDDEN, OUT = 1, 32, 32           # hidden % 8 == 0 -> 8 heads (module logic)
    NUM_HEADS = 8 if HIDDEN % 8 == 0 else 1
    B, T = 4, 8

    key = jax.random.PRNGKey(0)
    kx, kp = jax.random.split(key)
    x = jax.random.normal(kx, (B, T, IN_SIZE), jnp.float32)
    params = init_params(kp, IN_SIZE, HIDDEN, OUT)

    # batch_block=2 -> 2 grid programs of 2 batch elements each:
    # exercises batch folding and keeps both v7x TensorCores busy.
    out = input_att_block_forward(x, params, hidden_size=HIDDEN, out_size=OUT,
                                  num_heads=NUM_HEADS, batch_block=2)
    out = jax.block_until_ready(out)

    ref = ref_forward(x, params, out_size=OUT, num_heads=NUM_HEADS)
    assert out.shape == (B, T, OUT)
    assert bool(jnp.all(jnp.isfinite(out)))
    assert bool(jnp.allclose(out, ref, atol=1e-4, rtol=1e-4)), \
        float(jnp.max(jnp.abs(out - ref)))
    print("KERNEL_OK")
</pallas_src>

<mosaic_0001>
module attributes {stable_mosaic.version = 11 : i64} {
  func.func @fused_kernel(%arg0: i32, %arg1: memref<2x8x1xf32, #tpu.memory_space<vmem>>, %arg2: memref<1x32xf32, #tpu.memory_space<vmem>>, %arg3: memref<6x32x32xf32, #tpu.memory_space<vmem>>, %arg4: memref<6x32x96xf32, #tpu.memory_space<vmem>>, %arg5: memref<6x96xf32, #tpu.memory_space<vmem>>, %arg6: memref<15x32xf32, #tpu.memory_space<vmem>>, %arg7: memref<2x8x32xf32, #tpu.memory_space<vmem>>, %arg8: memref<2x8x32xf32, #tpu.memory_space<vmem>>) attributes {dimension_semantics = [#tpu.dimension_semantics<parallel>], iteration_bounds = array<i64: 2>, scalar_prefetch = 0 : i64, scratch_operands = 1 : i64, tpu.core_type = #tpu.core_type<tc>, window_params = [{transform_indices = @transform_0, window_bounds = array<i64: 2, 8, 1>}, {pipeline_mode = #tpu.pipeline_mode<synchronous>, transform_indices = @transform_1, window_bounds = array<i64: 1, 32>}, {pipeline_mode = #tpu.pipeline_mode<synchronous>, transform_indices = @transform_2, window_bounds = array<i64: 6, 32, 32>}, {pipeline_mode = #tpu.pipeline_mode<synchronous>, transform_indices = @transform_3, window_bounds = array<i64: 6, 32, 96>}, {pipeline_mode = #tpu.pipeline_mode<synchronous>, transform_indices = @transform_4, window_bounds = array<i64: 6, 96>}, {pipeline_mode = #tpu.pipeline_mode<synchronous>, transform_indices = @transform_5, window_bounds = array<i64: 15, 32>}, {transform_indices = @transform_6, window_bounds = array<i64: 2, 8, 32>}]} {
    %c0 = arith.constant 0 : index
    %c0_0 = arith.constant 0 : index
    %c0_1 = arith.constant 0 : index
    %0 = vector.load %arg1[%c0, %c0_0, %c0_1] : memref<2x8x1xf32, #tpu.memory_space<vmem>>, vector<2x8x1xf32>
    %1 = vector.shape_cast %0 : vector<2x8x1xf32> to vector<16x1xf32>
    %c0_2 = arith.constant 0 : index
    %c0_3 = arith.constant 0 : index
    %2 = vector.load %arg2[%c0_2, %c0_3] : memref<1x32xf32, #tpu.memory_space<vmem>>, vector<1x32xf32>
    %3 = vector.broadcast %1 : vector<16x1xf32> to vector<16x32xf32>
    %4 = vector.broadcast %2 : vector<1x32xf32> to vector<16x32xf32>
    %5 = arith.mulf %3, %4 : vector<16x32xf32>
    %c0_4 = arith.constant 0 : index
    %c0_5 = arith.constant 0 : index
    %6 = vector.load %arg6[%c0_4, %c0_5] : memref<15x32xf32, #tpu.memory_space<vmem>>, vector<1x32xf32>
    %7 = vector.broadcast %6 : vector<1x32xf32> to vector<16x32xf32>
    %8 = arith.addf %5, %7 : vector<16x32xf32>
    %c1 = arith.constant 1 : index
    %c0_6 = arith.constant 0 : index
    %9 = vector.load %arg6[%c1, %c0_6] : memref<15x32xf32, #tpu.memory_space<vmem>>, vector<1x32xf32>
    %c2 = arith.constant 2 : index
    %c0_7 = arith.constant 0 : index
    %10 = vector.load %arg6[%c2, %c0_7] : memref<15x32xf32, #tpu.memory_space<vmem>>, vector<1x32xf32>
    %cst = arith.constant dense<0.000000e+00> : vector<16xf32>
    %11 = vector.multi_reduction <add>, %8, %cst [1] : vector<16x32xf32> to vector<16xf32>
    %12 = vector.shape_cast %11 : vector<16xf32> to vector<16x1xf32>
    %cst_8 = arith.constant 3.200000e+01 : f32
    %13 = vector.broadcast %cst_8 : f32 to vector<16x1xf32>
    %14 = arith.divf %12, %13 : vector<16x1xf32>
    %15 = vector.broadcast %14 : vector<16x1xf32> to vector<16x32xf32>
    %16 = arith.subf %8, %15 : vector<16x32xf32>
    %17 = arith.mulf %16, %16 : vector<16x32xf32>
    %cst_9 = arith.constant dense<0.000000e+00> : vector<16xf32>
    %18 = vector.multi_reduction <add>, %17, %cst_9 [1] : vector<16x32xf32> to vector<16xf32>
    %19 = vector.shape_cast %18 : vector<16xf32> to vector<16x1xf32>
    %cst_10 = arith.constant 3.200000e+01 : f32
    %20 = vector.broadcast %cst_10 : f32 to vector<16x1xf32>
    %21 = arith.divf %19, %20 : vector<16x1xf32>
    %22 = vector.broadcast %14 : vector<16x1xf32> to vector<16x32xf32>
    %23 = arith.subf %8, %22 : vector<16x32xf32>
    %cst_11 = arith.constant 9.99999974E-6 : f32
    %24 = vector.broadcast %cst_11 : f32 to vector<16x1xf32>
    %25 = arith.addf %21, %24 : vector<16x1xf32>
    %26 = math.rsqrt %25 : vector<16x1xf32>
    %27 = vector.broadcast %26 : vector<16x1xf32> to vector<16x32xf32>
    %28 = arith.mulf %23, %27 : vector<16x32xf32>
    %29 = vector.broadcast %9 : vector<1x32xf32> to vector<16x32xf32>
    %30 = arith.mulf %28, %29 : vector<16x32xf32>
    %31 = vector.broadcast %10 : vector<1x32xf32> to vector<16x32xf32>
    %32 = arith.addf %30, %31 : vector<16x32xf32>
    %cst_12 = arith.constant 0.000000e+00 : f32
    %33 = vector.broadcast %cst_12 : f32 to vector<16x32xf32>
    %34 = arith.cmpf oge, %32, %33 : vector<16x32xf32>
    %cst_13 = arith.constant 0.00999999977 : f32
    %35 = vector.broadcast %cst_13 : f32 to vector<16x32xf32>
    %36 = arith.mulf %35, %32 : vector<16x32xf32>
    %37 = arith.select %34, %32, %36 : vector<16x32xi1>, vector<16x32xf32>
    %c0_14 = arith.constant 0 : index
    %c0_15 = arith.constant 0 : index
    %c0_16 = arith.constant 0 : index
    %38 = vector.load %arg3[%c0_14, %c0_15, %c0_16] : memref<6x32x32xf32, #tpu.memory_space<vmem>>, vector<1x32x32xf32>
    %39 = vector.shape_cast %38 : vector<1x32x32xf32> to vector<32x32xf32>
    %cst_17 = arith.constant dense<0.000000e+00> : vector<16x32xf32>
    %40 = tpu.matmul %37, %39, %cst_17 {dimension_numbers = #tpu.dot_dimension_numbers<[1], [0], [0], [1], [0, 0, 1, 1], [], []>} : vector<16x32xf32>, vector<32x32xf32>, vector<16x32xf32> -> vector<16x32xf32>
    %c3 = arith.constant 3 : index
    %c0_18 = arith.constant 0 : index
    %41 = vector.load %arg6[%c3, %c0_18] : memref<15x32xf32, #tpu.memory_space<vmem>>, vector<1x32xf32>
    %42 = vector.broadcast %41 : vector<1x32xf32> to vector<16x32xf32>
    %43 = arith.addf %40, %42 : vector<16x32xf32>
    %c4 = arith.constant 4 : index
    %c0_19 = arith.constant 0 : index
    %44 = vector.load %arg6[%c4, %c0_19] : memref<15x32xf32, #tpu.memory_space<vmem>>, vector<1x32xf32>
    %c5 = arith.constant 5 : index
    %c0_20 = arith.constant 0 : index
    %45 = vector.load %arg6[%c5, %c0_20] : memref<15x32xf32, #tpu.memory_space<vmem>>, vector<1x32xf32>
    %cst_21 = arith.constant dense<0.000000e+00> : vector<16xf32>
    %46 = vector.multi_reduction <add>, %43, %cst_21 [1] : vector<16x32xf32> to vector<16xf32>
    %47 = vector.shape_cast %46 : vector<16xf32> to vector<16x1xf32>
    %cst_22 = arith.constant 3.200000e+01 : f32
    %48 = vector.broadcast %cst_22 : f32 to vector<16x1xf32>
    %49 = arith.divf %47, %48 : vector<16x1xf32>
    %50 = vector.broadcast %49 : vector<16x1xf32> to vector<16x32xf32>
    %51 = arith.subf %43, %50 : vector<16x32xf32>
    %52 = arith.mulf %51, %51 : vector<16x32xf32>
    %cst_23 = arith.constant dense<0.000000e+00> : vector<16xf32>
    %53 = vector.multi_reduction <add>, %52, %cst_23 [1] : vector<16x32xf32> to vector<16xf32>
    %54 = vector.shape_cast %53 : vector<16xf32> to vector<16x1xf32>
    %cst_24 = arith.constant 3.200000e+01 : f32
    %55 = vector.broadcast %cst_24 : f32 to vector<16x1xf32>
    %56 = arith.divf %54, %55 : vector<16x1xf32>
    %57 = vector.broadcast %49 : vector<16x1xf32> to vector<16x32xf32>
    %58 = arith.subf %43, %57 : vector<16x32xf32>
    %cst_25 = arith.constant 9.99999974E-6 : f32
    %59 = vector.broadcast %cst_25 : f32 to vector<16x1xf32>
    %60 = arith.addf %56, %59 : vector<16x1xf32>
    %61 = math.rsqrt %60 : vector<16x1xf32>
    %62 = vector.broadcast %61 : vector<16x1xf32> to vector<16x32xf32>
    %63 = arith.mulf %58, %62 : vector<16x32xf32>
    %64 = vector.broadcast %44 : vector<1x32xf32> to vector<16x32xf32>
    %65 = arith.mulf %63, %64 : vector<16x32xf32>
    %66 = vector.broadcast %45 : vector<1x32xf32> to vector<16x32xf32>
    %67 = arith.addf %65, %66 : vector<16x32xf32>
    %cst_26 = arith.constant 0.000000e+00 : f32
    %68 = vector.broadcast %cst_26 : f32 to vector<16x32xf32>
    %69 = arith.cmpf oge, %67, %68 : vector<16x32xf32>
    %cst_27 = arith.constant 0.00999999977 : f32
    %70 = vector.broadcast %cst_27 : f32 to vector<16x32xf32>
    %71 = arith.mulf %70, %67 : vector<16x32xf32>
    %72 = arith.select %69, %67, %71 : vector<16x32xi1>, vector<16x32xf32>
    %c1_28 = arith.constant 1 : index
    %c0_29 = arith.constant 0 : index
    %c0_30 = arith.constant 0 : index
    %73 = vector.load %arg3[%c1_28, %c0_29, %c0_30] : memref<6x32x32xf32, #tpu.memory_space<vmem>>, vector<1x32x32xf32>
    %74 = vector.shape_cast %73 : vector<1x32x32xf32> to vector<32x32xf32>
    %cst_31 = arith.constant dense<0.000000e+00> : vector<16x32xf32>
    %75 = tpu.matmul %72, %74, %cst_31 {dimension_numbers = #tpu.dot_dimension_numbers<[1], [0], [0], [1], [0, 0, 1, 1], [], []>} : vector<16x32xf32>, vector<32x32xf32>, vector<16x32xf32> -> vector<16x32xf32>
    %c6 = arith.constant 6 : index
    %c0_32 = arith.constant 0 : index
    %76 = vector.load %arg6[%c6, %c0_32] : memref<15x32xf32, #tpu.memory_space<vmem>>, vector<1x32xf32>
    %77 = vector.broadcast %76 : vector<1x32xf32> to vector<16x32xf32>
    %78 = arith.addf %75, %77 : vector<16x32xf32>
    %c7 = arith.constant 7 : index
    %c0_33 = arith.constant 0 : index
    %79 = vector.load %arg6[%c7, %c0_33] : memref<15x32xf32, #tpu.memory_space<vmem>>, vector<1x32xf32>
    %c8 = arith.constant 8 : index
    %c0_34 = arith.constant 0 : index
    %80 = vector.load %arg6[%c8, %c0_34] : memref<15x32xf32, #tpu.memory_space<vmem>>, vector<1x32xf32>
    %cst_35 = arith.constant dense<0.000000e+00> : vector<16xf32>
    %81 = vector.multi_reduction <add>, %78, %cst_35 [1] : vector<16x32xf32> to vector<16xf32>
    %82 = vector.shape_cast %81 : vector<16xf32> to vector<16x1xf32>
    %cst_36 = arith.constant 3.200000e+01 : f32
    %83 = vector.broadcast %cst_36 : f32 to vector<16x1xf32>
    %84 = arith.divf %82, %83 : vector<16x1xf32>
    %85 = vector.broadcast %84 : vector<16x1xf32> to vector<16x32xf32>
    %86 = arith.subf %78, %85 : vector<16x32xf32>
    %87 = arith.mulf %86, %86 : vector<16x32xf32>
    %cst_37 = arith.constant dense<0.000000e+00> : vector<16xf32>
    %88 = vector.multi_reduction <add>, %87, %cst_37 [1] : vector<16x32xf32> to vector<16xf32>
    %89 = vector.shape_cast %88 : vector<16xf32> to vector<16x1xf32>
    %cst_38 = arith.constant 3.200000e+01 : f32
    %90 = vector.broadcast %cst_38 : f32 to vector<16x1xf32>
    %91 = arith.divf %89, %90 : vector<16x1xf32>
    %92 = vector.broadcast %84 : vector<16x1xf32> to vector<16x32xf32>
    %93 = arith.subf %78, %92 : vector<16x32xf32>
    %cst_39 = arith.constant 9.99999974E-6 : f32
    %94 = vector.broadcast %cst_39 : f32 to vector<16x1xf32>
    %95 = arith.addf %91, %94 : vector<16x1xf32>
    %96 = math.rsqrt %95 : vector<16x1xf32>
    %97 = vector.broadcast %96 : vector<16x1xf32> to vector<16x32xf32>
    %98 = arith.mulf %93, %97 : vector<16x32xf32>
    %99 = vector.broadcast %79 : vector<1x32xf32> to vector<16x32xf32>
    %100 = arith.mulf %98, %99 : vector<16x32xf32>
    %101 = vector.broadcast %80 : vector<1x32xf32> to vector<16x32xf32>
    %102 = arith.addf %100, %101 : vector<16x32xf32>
    %cst_40 = arith.constant 0.000000e+00 : f32
    %103 = vector.broadcast %cst_40 : f32 to vector<16x32xf32>
    %104 = arith.cmpf oge, %102, %103 : vector<16x32xf32>
    %cst_41 = arith.constant 0.00999999977 : f32
    %105 = vector.broadcast %cst_41 : f32 to vector<16x32xf32>
    %106 = arith.mulf %105, %102 : vector<16x32xf32>
    %107 = arith.select %104, %102, %106 : vector<16x32xi1>, vector<16x32xf32>
    %c0_42 = arith.constant 0 : index
    %c0_43 = arith.constant 0 : index
    %c0_44 = arith.constant 0 : index
    %108 = vector.load %arg4[%c0_42, %c0_43, %c0_44] : memref<6x32x96xf32, #tpu.memory_space<vmem>>, vector<1x32x96xf32>
    %109 = vector.shape_cast %108 : vector<1x32x96xf32> to vector<32x96xf32>
    %c1_45 = arith.constant 1 : index
    %c0_46 = arith.constant 0 : index
    %c0_47 = arith.constant 0 : index
    %110 = vector.load %arg4[%c1_45, %c0_46, %c0_47] : memref<6x32x96xf32, #tpu.memory_space<vmem>>, vector<1x32x96xf32>
    %111 = vector.shape_cast %110 : vector<1x32x96xf32> to vector<32x96xf32>
    %c0_48 = arith.constant 0 : index
    %c0_49 = arith.constant 0 : index
    %112 = vector.load %arg5[%c0_48, %c0_49] : memref<6x96xf32, #tpu.memory_space<vmem>>, vector<1x96xf32>
    %c1_50 = arith.constant 1 : index
    %c0_51 = arith.constant 0 : index
    %113 = vector.load %arg5[%c1_50, %c0_51] : memref<6x96xf32, #tpu.memory_space<vmem>>, vector<1x96xf32>
    %cst_52 = arith.constant dense<0.000000e+00> : vector<16x96xf32>
    %114 = tpu.matmul %107, %109, %cst_52 {dimension_numbers = #tpu.dot_dimension_numbers<[1], [0], [0], [1], [0, 0, 1, 1], [], []>} : vector<16x32xf32>, vector<32x96xf32>, vector<16x96xf32> -> vector<16x96xf32>
    %115 = vector.broadcast %112 : vector<1x96xf32> to vector<16x96xf32>
    %116 = arith.addf %114, %115 : vector<16x96xf32>
    %117 = vector.shape_cast %116 : vector<16x96xf32> to vector<2x8x96xf32>
    %cst_53 = arith.constant 0.000000e+00 : f32
    %118 = vector.broadcast %cst_53 : f32 to vector<2x32xf32>
    %119 = vector.extract_strided_slice %117 {offsets = [0, 0, 0], sizes = [2, 1, 96], strides = [1, 1, 1]} : vector<2x8x96xf32> to vector<2x1x96xf32>
    %120 = vector.shape_cast %119 : vector<2x1x96xf32> to vector<2x96xf32>
    %121 = vector.extract_strided_slice %120 {offsets = [0, 0], sizes = [2, 64], strides = [1, 1]} : vector<2x96xf32> to vector<2x64xf32>
    %122 = vector.extract_strided_slice %113 {offsets = [0, 0], sizes = [1, 64], strides = [1, 1]} : vector<1x96xf32> to vector<1x64xf32>
    %123 = vector.broadcast %122 : vector<1x64xf32> to vector<2x64xf32>
    %124 = arith.addf %121, %123 : vector<2x64xf32>
    %125 = arith.negf %124 : vector<2x64xf32>
    %126 = math.exp %125 : vector<2x64xf32>
    %cst_54 = arith.constant 1.000000e+00 : f32
    %127 = vector.broadcast %cst_54 : f32 to vector<2x64xf32>
    %128 = arith.addf %127, %126 : vector<2x64xf32>
    %129 = arith.divf %127, %128 : vector<2x64xf32>
    %130 = vector.extract_strided_slice %129 {offsets = [0, 0], sizes = [2, 32], strides = [1, 1]} : vector<2x64xf32> to vector<2x32xf32>
    %131 = vector.extract_strided_slice %129 {offsets = [0, 32], sizes = [2, 32], strides = [1, 1]} : vector<2x64xf32> to vector<2x32xf32>
    %132 = vector.extract_strided_slice %120 {offsets = [0, 64], sizes = [2, 32], strides = [1, 1]} : vector<2x96xf32> to vector<2x32xf32>
    %133 = vector.extract_strided_slice %113 {offsets = [0, 64], sizes = [1, 32], strides = [1, 1]} : vector<1x96xf32> to vector<1x32xf32>
    %134 = vector.broadcast %133 : vector<1x32xf32> to vector<2x32xf32>
    %135 = arith.mulf %130, %134 : vector<2x32xf32>
    %136 = arith.addf %132, %135 : vector<2x32xf32>
    %137 = math.tanh %136 : vector<2x32xf32>
    %cst_55 = arith.constant 1.000000e+00 : f32
    %138 = vector.broadcast %cst_55 : f32 to vector<2x32xf32>
    %139 = arith.subf %138, %131 : vector<2x32xf32>
    %140 = arith.mulf %139, %137 : vector<2x32xf32>
    %141 = arith.mulf %131, %118 : vector<2x32xf32>
    %142 = arith.addf %140, %141 : vector<2x32xf32>
    %c0_56 = arith.constant 0 : index
    %c0_57 = arith.constant 0 : index
    %c0_58 = arith.constant 0 : index
    %143 = vector.load %arg8[%c0_56, %c0_57, %c0_58] : memref<2x8x32xf32, #tpu.memory_space<vmem>>, vector<2x1x32xf32>
    %144 = vector.shape_cast %143 : vector<2x1x32xf32> to vector<2x32xf32>
    %145 = vector.shape_cast %142 : vector<2x32xf32> to vector<2x1x32xf32>
    tpu.vector_store %arg8[%c0_56, %c0_57, %c0_58], %145 {strides = array<i32>} : memref<2x8x32xf32, #tpu.memory_space<vmem>>, vector<2x1x32xf32>,
    %146 = vector.extract_strided_slice %117 {offsets = [0, 1, 0], sizes = [2, 1, 96], strides = [1, 1, 1]} : vector<2x8x96xf32> to vector<2x1x96xf32>
    %147 = vector.shape_cast %146 : vector<2x1x96xf32> to vector<2x96xf32>
    %cst_59 = arith.constant dense<0.000000e+00> : vector<2x96xf32>
    %148 = tpu.matmul %142, %111, %cst_59 {dimension_numbers = #tpu.dot_dimension_numbers<[1], [0], [0], [1], [0, 0, 1, 1], [], []>} : vector<2x32xf32>, vector<32x96xf32>, vector<2x96xf32> -> vector<2x96xf32>
    %149 = vector.broadcast %113 : vector<1x96xf32> to vector<2x96xf32>
    %150 = arith.addf %148, %149 : vector<2x96xf32>
    %151 = vector.extract_strided_slice %147 {offsets = [0, 0], sizes = [2, 64], strides = [1, 1]} : vector<2x96xf32> to vector<2x64xf32>
    %152 = vector.extract_strided_slice %150 {offsets = [0, 0], sizes = [2, 64], strides = [1, 1]} : vector<2x96xf32> to vector<2x64xf32>
    %153 = arith.addf %151, %152 : vector<2x64xf32>
    %154 = arith.negf %153 : vector<2x64xf32>
    %155 = math.exp %154 : vector<2x64xf32>
    %cst_60 = arith.constant 1.000000e+00 : f32
    %156 = vector.broadcast %cst_60 : f32 to vector<2x64xf32>
    %157 = arith.addf %156, %155 : vector<2x64xf32>
    %158 = arith.divf %156, %157 : vector<2x64xf32>
    %159 = vector.extract_strided_slice %158 {offsets = [0, 0], sizes = [2, 32], strides = [1, 1]} : vector<2x64xf32> to vector<2x32xf32>
    %160 = vector.extract_strided_slice %158 {offsets = [0, 32], sizes = [2, 32], strides = [1, 1]} : vector<2x64xf32> to vector<2x32xf32>
    %161 = vector.extract_strided_slice %147 {offsets = [0, 64], sizes = [2, 32], strides = [1, 1]} : vector<2x96xf32> to vector<2x32xf32>
    %162 = vector.extract_strided_slice %150 {offsets = [0, 64], sizes = [2, 32], strides = [1, 1]} : vector<2x96xf32> to vector<2x32xf32>
    %163 = arith.mulf %159, %162 : vector<2x32xf32>
    %164 = arith.addf %161, %163 : vector<2x32xf32>
    %165 = math.tanh %164 : vector<2x32xf32>
    %cst_61 = arith.constant 1.000000e+00 : f32
    %166 = vector.broadcast %cst_61 : f32 to vector<2x32xf32>
    %167 = arith.subf %166, %160 : vector<2x32xf32>
    %168 = arith.mulf %167, %165 : vector<2x32xf32>
    %169 = arith.mulf %160, %142 : vector<2x32xf32>
    %170 = arith.addf %168, %169 : vector<2x32xf32>
    %c0_62 = arith.constant 0 : index
    %c1_63 = arith.constant 1 : index
    %c0_64 = arith.constant 0 : index
    %171 = vector.load %arg8[%c0_62, %c1_63, %c0_64] : memref<2x8x32xf32, #tpu.memory_space<vmem>>, vector<2x1x32xf32>
    %172 = vector.shape_cast %171 : vector<2x1x32xf32> to vector<2x32xf32>
    %173 = vector.shape_cast %170 : vector<2x32xf32> to vector<2x1x32xf32>
    tpu.vector_store %arg8[%c0_62, %c1_63, %c0_64], %173 {strides = array<i32>} : memref<2x8x32xf32, #tpu.memory_space<vmem>>, vector<2x1x32xf32>,
    %174 = vector.extract_strided_slice %117 {offsets = [0, 2, 0], sizes = [2, 1, 96], strides = [1, 1, 1]} : vector<2x8x96xf32> to vector<2x1x96xf32>
    %175 = vector.shape_cast %174 : vector<2x1x96xf32> to vector<2x96xf32>
    %cst_65 = arith.constant dense<0.000000e+00> : vector<2x96xf32>
    %176 = tpu.matmul %170, %111, %cst_65 {dimension_numbers = #tpu.dot_dimension_numbers<[1], [0], [0], [1], [0, 0, 1, 1], [], []>} : vector<2x32xf32>, vector<32x96xf32>, vector<2x96xf32> -> vector<2x96xf32>
    %177 = vector.broadcast %113 : vector<1x96xf32> to vector<2x96xf32>
    %178 = arith.addf %176, %177 : vector<2x96xf32>
    %179 = vector.extract_strided_slice %175 {offsets = [0, 0], sizes = [2, 64], strides = [1, 1]} : vector<2x96xf32> to vector<2x64xf32>
    %180 = vector.extract_strided_slice %178 {offsets = [0, 0], sizes = [2, 64], strides = [1, 1]} : vector<2x96xf32> to vector<2x64xf32>
    %181 = arith.addf %179, %180 : vector<2x64xf32>
    %182 = arith.negf %181 : vector<2x64xf32>
    %183 = math.exp %182 : vector<2x64xf32>
    %cst_66 = arith.constant 1.000000e+00 : f32
    %184 = vector.broadcast %cst_66 : f32 to vector<2x64xf32>
    %185 = arith.addf %184, %183 : vector<2x64xf32>
    %186 = arith.divf %184, %185 : vector<2x64xf32>
    %187 = vector.extract_strided_slice %186 {offsets = [0, 0], sizes = [2, 32], strides = [1, 1]} : vector<2x64xf32> to vector<2x32xf32>
    %188 = vector.extract_strided_slice %186 {offsets = [0, 32], sizes = [2, 32], strides = [1, 1]} : vector<2x64xf32> to vector<2x32xf32>
    %189 = vector.extract_strided_slice %175 {offsets = [0, 64], sizes = [2, 32], strides = [1, 1]} : vector<2x96xf32> to vector<2x32xf32>
    %190 = vector.extract_strided_slice %178 {offsets = [0, 64], sizes = [2, 32], strides = [1, 1]} : vector<2x96xf32> to vector<2x32xf32>
    %191 = arith.mulf %187, %190 : vector<2x32xf32>
    %192 = arith.addf %189, %191 : vector<2x32xf32>
    %193 = math.tanh %192 : vector<2x32xf32>
    %cst_67 = arith.constant 1.000000e+00 : f32
    %194 = vector.broadcast %cst_67 : f32 to vector<2x32xf32>
    %195 = arith.subf %194, %188 : vector<2x32xf32>
    %196 = arith.mulf %195, %193 : vector<2x32xf32>
    %197 = arith.mulf %188, %170 : vector<2x32xf32>
    %198 = arith.addf %196, %197 : vector<2x32xf32>
    %c0_68 = arith.constant 0 : index
    %c2_69 = arith.constant 2 : index
    %c0_70 = arith.constant 0 : index
    %199 = vector.load %arg8[%c0_68, %c2_69, %c0_70] : memref<2x8x32xf32, #tpu.memory_space<vmem>>, vector<2x1x32xf32>
    %200 = vector.shape_cast %199 : vector<2x1x32xf32> to vector<2x32xf32>
    %201 = vector.shape_cast %198 : vector<2x32xf32> to vector<2x1x32xf32>
    tpu.vector_store %arg8[%c0_68, %c2_69, %c0_70], %201 {strides = array<i32>} : memref<2x8x32xf32, #tpu.memory_space<vmem>>, vector<2x1x32xf32>,
    %202 = vector.extract_strided_slice %117 {offsets = [0, 3, 0], sizes = [2, 1, 96], strides = [1, 1, 1]} : vector<2x8x96xf32> to vector<2x1x96xf32>
    %203 = vector.shape_cast %202 : vector<2x1x96xf32> to vector<2x96xf32>
    %cst_71 = arith.constant dense<0.000000e+00> : vector<2x96xf32>
    %204 = tpu.matmul %198, %111, %cst_71 {dimension_numbers = #tpu.dot_dimension_numbers<[1], [0], [0], [1], [0, 0, 1, 1], [], []>} : vector<2x32xf32>, vector<32x96xf32>, vector<2x96xf32> -> vector<2x96xf32>
    %205 = vector.broadcast %113 : vector<1x96xf32> to vector<2x96xf32>
    %206 = arith.addf %204, %205 : vector<2x96xf32>
    %207 = vector.extract_strided_slice %203 {offsets = [0, 0], sizes = [2, 64], strides = [1, 1]} : vector<2x96xf32> to vector<2x64xf32>
    %208 = vector.extract_strided_slice %206 {offsets = [0, 0], sizes = [2, 64], strides = [1, 1]} : vector<2x96xf32> to vector<2x64xf32>
    %209 = arith.addf %207, %208 : vector<2x64xf32>
    %210 = arith.negf %209 : vector<2x64xf32>
    %211 = math.exp %210 : vector<2x64xf32>
    %cst_72 = arith.constant 1.000000e+00 : f32
    %212 = vector.broadcast %cst_72 : f32 to vector<2x64xf32>
    %213 = arith.addf %212, %211 : vector<2x64xf32>
    %214 = arith.divf %212, %213 : vector<2x64xf32>
    %215 = vector.extract_strided_slice %214 {offsets = [0, 0], sizes = [2, 32], strides = [1, 1]} : vector<2x64xf32> to vector<2x32xf32>
    %216 = vector.extract_strided_slice %214 {offsets = [0, 32], sizes = [2, 32], strides = [1, 1]} : vector<2x64xf32> to vector<2x32xf32>
    %217 = vector.extract_strided_slice %203 {offsets = [0, 64], sizes = [2, 32], strides = [1, 1]} : vector<2x96xf32> to vector<2x32xf32>
    %218 = vector.extract_strided_slice %206 {offsets = [0, 64], sizes = [2, 32], strides = [1, 1]} : vector<2x96xf32> to vector<2x32xf32>
    %219 = arith.mulf %215, %218 : vector<2x32xf32>
    %220 = arith.addf %217, %219 : vector<2x32xf32>
    %221 = math.tanh %220 : vector<2x32xf32>
    %cst_73 = arith.constant 1.000000e+00 : f32
    %222 = vector.broadcast %cst_73 : f32 to vector<2x32xf32>
    %223 = arith.subf %222, %216 : vector<2x32xf32>
    %224 = arith.mulf %223, %221 : vector<2x32xf32>
    %225 = arith.mulf %216, %198 : vector<2x32xf32>
    %226 = arith.addf %224, %225 : vector<2x32xf32>
    %c0_74 = arith.constant 0 : index
    %c3_75 = arith.constant 3 : index
    %c0_76 = arith.constant 0 : index
    %227 = vector.load %arg8[%c0_74, %c3_75, %c0_76] : memref<2x8x32xf32, #tpu.memory_space<vmem>>, vector<2x1x32xf32>
    %228 = vector.shape_cast %227 : vector<2x1x32xf32> to vector<2x32xf32>
    %229 = vector.shape_cast %226 : vector<2x32xf32> to vector<2x1x32xf32>
    tpu.vector_store %arg8[%c0_74, %c3_75, %c0_76], %229 {strides = array<i32>} : memref<2x8x32xf32, #tpu.memory_space<vmem>>, vector<2x1x32xf32>,
    %230 = vector.extract_strided_slice %117 {offsets = [0, 4, 0], sizes = [2, 1, 96], strides = [1, 1, 1]} : vector<2x8x96xf32> to vector<2x1x96xf32>
    %231 = vector.shape_cast %230 : vector<2x1x96xf32> to vector<2x96xf32>
    %cst_77 = arith.constant dense<0.000000e+00> : vector<2x96xf32>
    %232 = tpu.matmul %226, %111, %cst_77 {dimension_numbers = #tpu.dot_dimension_numbers<[1], [0], [0], [1], [0, 0, 1, 1], [], []>} : vector<2x32xf32>, vector<32x96xf32>, vector<2x96xf32> -> vector<2x96xf32>
    %233 = vector.broadcast %113 : vector<1x96xf32> to vector<2x96xf32>
    %234 = arith.addf %232, %233 : vector<2x96xf32>
    %235 = vector.extract_strided_slice %231 {offsets = [0, 0], sizes = [2, 64], strides = [1, 1]} : vector<2x96xf32> to vector<2x64xf32>
    %236 = vector.extract_strided_slice %234 {offsets = [0, 0], sizes = [2, 64], strides = [1, 1]} : vector<2x96xf32> to vector<2x64xf32>
    %237 = arith.addf %235, %236 : vector<2x64xf32>
    %238 = arith.negf %237 : vector<2x64xf32>
    %239 = math.exp %238 : vector<2x64xf32>
    %cst_78 = arith.constant 1.000000e+00 : f32
    %240 = vector.broadcast %cst_78 : f32 to vector<2x64xf32>
    %241 = arith.addf %240, %239 : vector<2x64xf32>
    %242 = arith.divf %240, %241 : vector<2x64xf32>
    %243 = vector.extract_strided_slice %242 {offsets = [0, 0], sizes = [2, 32], strides = [1, 1]} : vector<2x64xf32> to vector<2x32xf32>
    %244 = vector.extract_strided_slice %242 {offsets = [0, 32], sizes = [2, 32], strides = [1, 1]} : vector<2x64xf32> to vector<2x32xf32>
    %245 = vector.extract_strided_slice %231 {offsets = [0, 64], sizes = [2, 32], strides = [1, 1]} : vector<2x96xf32> to vector<2x32xf32>
    %246 = vector.extract_strided_slice %234 {offsets = [0, 64], sizes = [2, 32], strides = [1, 1]} : vector<2x96xf32> to vector<2x32xf32>
    %247 = arith.mulf %243, %246 : vector<2x32xf32>
    %248 = arith.addf %245, %247 : vector<2x32xf32>
    %249 = math.tanh %248 : vector<2x32xf32>
    %cst_79 = arith.constant 1.000000e+00 : f32
    %250 = vector.broadcast %cst_79 : f32 to vector<2x32xf32>
    %251 = arith.subf %250, %244 : vector<2x32xf32>
    %252 = arith.mulf %251, %249 : vector<2x32xf32>
    %253 = arith.mulf %244, %226 : vector<2x32xf32>
    %254 = arith.addf %252, %253 : vector<2x32xf32>
    %c0_80 = arith.constant 0 : index
    %c4_81 = arith.constant 4 : index
    %c0_82 = arith.constant 0 : index
    %255 = vector.load %arg8[%c0_80, %c4_81, %c0_82] : memref<2x8x32xf32, #tpu.memory_space<vmem>>, vector<2x1x32xf32>
    %256 = vector.shape_cast %255 : vector<2x1x32xf32> to vector<2x32xf32>
    %257 = vector.shape_cast %254 : vector<2x32xf32> to vector<2x1x32xf32>
    tpu.vector_store %arg8[%c0_80, %c4_81, %c0_82], %257 {strides = array<i32>} : memref<2x8x32xf32, #tpu.memory_space<vmem>>, vector<2x1x32xf32>,
    %258 = vector.extract_strided_slice %117 {offsets = [0, 5, 0], sizes = [2, 1, 96], strides = [1, 1, 1]} : vector<2x8x96xf32> to vector<2x1x96xf32>
    %259 = vector.shape_cast %258 : vector<2x1x96xf32> to vector<2x96xf32>
    %cst_83 = arith.constant dense<0.000000e+00> : vector<2x96xf32>
    %260 = tpu.matmul %254, %111, %cst_83 {dimension_numbers = #tpu.dot_dimension_numbers<[1], [0], [0], [1], [0, 0, 1, 1], [], []>} : vector<2x32xf32>, vector<32x96xf32>, vector<2x96xf32> -> vector<2x96xf32>
    %261 = vector.broadcast %113 : vector<1x96xf32> to vector<2x96xf32>
    %262 = arith.addf %260, %261 : vector<2x96xf32>
    %263 = vector.extract_strided_slice %259 {offsets = [0, 0], sizes = [2, 64], strides = [1, 1]} : vector<2x96xf32> to vector<2x64xf32>
    %264 = vector.extract_strided_slice %262 {offsets = [0, 0], sizes = [2, 64], strides = [1, 1]} : vector<2x96xf32> to vector<2x64xf32>
    %265 = arith.addf %263, %264 : vector<2x64xf32>
    %266 = arith.negf %265 : vector<2x64xf32>
    %267 = math.exp %266 : vector<2x64xf32>
    %cst_84 = arith.constant 1.000000e+00 : f32
    %268 = vector.broadcast %cst_84 : f32 to vector<2x64xf32>
    %269 = arith.addf %268, %267 : vector<2x64xf32>
    %270 = arith.divf %268, %269 : vector<2x64xf32>
    %271 = vector.extract_strided_slice %270 {offsets = [0, 0], sizes = [2, 32], strides = [1, 1]} : vector<2x64xf32> to vector<2x32xf32>
    %272 = vector.extract_strided_slice %270 {offsets = [0, 32], sizes = [2, 32], strides = [1, 1]} : vector<2x64xf32> to vector<2x32xf32>
    %273 = vector.extract_strided_slice %259 {offsets = [0, 64], sizes = [2, 32], strides = [1, 1]} : vector<2x96xf32> to vector<2x32xf32>
    %274 = vector.extract_strided_slice %262 {offsets = [0, 64], sizes = [2, 32], strides = [1, 1]} : vector<2x96xf32> to vector<2x32xf32>
    %275 = arith.mulf %271, %274 : vector<2x32xf32>
    %276 = arith.addf %273, %275 : vector<2x32xf32>
    %277 = math.tanh %276 : vector<2x32xf32>
    %cst_85 = arith.constant 1.000000e+00 : f32
    %278 = vector.broadcast %cst_85 : f32 to vector<2x32xf32>
    %279 = arith.subf %278, %272 : vector<2x32xf32>
    %280 = arith.mulf %279, %277 : vector<2x32xf32>
    %281 = arith.mulf %272, %254 : vector<2x32xf32>
    %282 = arith.addf %280, %281 : vector<2x32xf32>
    %c0_86 = arith.constant 0 : index
    %c5_87 = arith.constant 5 : index
    %c0_88 = arith.constant 0 : index
    %283 = vector.load %arg8[%c0_86, %c5_87, %c0_88] : memref<2x8x32xf32, #tpu.memory_space<vmem>>, vector<2x1x32xf32>
    %284 = vector.shape_cast %283 : vector<2x1x32xf32> to vector<2x32xf32>
    %285 = vector.shape_cast %282 : vector<2x32xf32> to vector<2x1x32xf32>
    tpu.vector_store %arg8[%c0_86, %c5_87, %c0_88], %285 {strides = array<i32>} : memref<2x8x32xf32, #tpu.memory_space<vmem>>, vector<2x1x32xf32>,
    %286 = vector.extract_strided_slice %117 {offsets = [0, 6, 0], sizes = [2, 1, 96], strides = [1, 1, 1]} : vector<2x8x96xf32> to vector<2x1x96xf32>
    %287 = vector.shape_cast %286 : vector<2x1x96xf32> to vector<2x96xf32>
    %cst_89 = arith.constant dense<0.000000e+00> : vector<2x96xf32>
    %288 = tpu.matmul %282, %111, %cst_89 {dimension_numbers = #tpu.dot_dimension_numbers<[1], [0], [0], [1], [0, 0, 1, 1], [], []>} : vector<2x32xf32>, vector<32x96xf32>, vector<2x96xf32> -> vector<2x96xf32>
    %289 = vector.broadcast %113 : vector<1x96xf32> to vector<2x96xf32>
    %290 = arith.addf %288, %289 : vector<2x96xf32>
    %291 = vector.extract_strided_slice %287 {offsets = [0, 0], sizes = [2, 64], strides = [1, 1]} : vector<2x96xf32> to vector<2x64xf32>
    %292 = vector.extract_strided_slice %290 {offsets = [0, 0], sizes = [2, 64], strides = [1, 1]} : vector<2x96xf32> to vector<2x64xf32>
    %293 = arith.addf %291, %292 : vector<2x64xf32>
    %294 = arith.negf %293 : vector<2x64xf32>
    %295 = math.exp %294 : vector<2x64xf32>
    %cst_90 = arith.constant 1.000000e+00 : f32
    %296 = vector.broadcast %cst_90 : f32 to vector<2x64xf32>
    %297 = arith.addf %296, %295 : vector<2x64xf32>
    %298 = arith.divf %296, %297 : vector<2x64xf32>
    %299 = vector.extract_strided_slice %298 {offsets = [0, 0], sizes = [2, 32], strides = [1, 1]} : vector<2x64xf32> to vector<2x32xf32>
    %300 = vector.extract_strided_slice %298 {offsets = [0, 32], sizes = [2, 32], strides = [1, 1]} : vector<2x64xf32> to vector<2x32xf32>
    %301 = vector.extract_strided_slice %287 {offsets = [0, 64], sizes = [2, 32], strides = [1, 1]} : vector<2x96xf32> to vector<2x32xf32>
    %302 = vector.extract_strided_slice %290 {offsets = [0, 64], sizes = [2, 32], strides = [1, 1]} : vector<2x96xf32> to vector<2x32xf32>
    %303 = arith.mulf %299, %302 : vector<2x32xf32>
    %304 = arith.addf %301, %303 : vector<2x32xf32>
    %305 = math.tanh %304 : vector<2x32xf32>
    %cst_91 = arith.constant 1.000000e+00 : f32
    %306 = vector.broadcast %cst_91 : f32 to vector<2x32xf32>
    %307 = arith.subf %306, %300 : vector<2x32xf32>
    %308 = arith.mulf %307, %305 : vector<2x32xf32>
    %309 = arith.mulf %300, %282 : vector<2x32xf32>
    %310 = arith.addf %308, %309 : vector<2x32xf32>
    %c0_92 = arith.constant 0 : index
    %c6_93 = arith.constant 6 : index
    %c0_94 = arith.constant 0 : index
    %311 = vector.load %arg8[%c0_92, %c6_93, %c0_94] : memref<2x8x32xf32, #tpu.memory_space<vmem>>, vector<2x1x32xf32>
    %312 = vector.shape_cast %311 : vector<2x1x32xf32> to vector<2x32xf32>
    %313 = vector.shape_cast %310 : vector<2x32xf32> to vector<2x1x32xf32>
    tpu.vector_store %arg8[%c0_92, %c6_93, %c0_94], %313 {strides = array<i32>} : memref<2x8x32xf32, #tpu.memory_space<vmem>>, vector<2x1x32xf32>,
    %314 = vector.extract_strided_slice %117 {offsets = [0, 7, 0], sizes = [2, 1, 96], strides = [1, 1, 1]} : vector<2x8x96xf32> to vector<2x1x96xf32>
    %315 = vector.shape_cast %314 : vector<2x1x96xf32> to vector<2x96xf32>
    %cst_95 = arith.constant dense<0.000000e+00> : vector<2x96xf32>
    %316 = tpu.matmul %310, %111, %cst_95 {dimension_numbers = #tpu.dot_dimension_numbers<[1], [0], [0], [1], [0, 0, 1, 1], [], []>} : vector<2x32xf32>, vector<32x96xf32>, vector<2x96xf32> -> vector<2x96xf32>
    %317 = vector.broadcast %113 : vector<1x96xf32> to vector<2x96xf32>
    %318 = arith.addf %316, %317 : vector<2x96xf32>
    %319 = vector.extract_strided_slice %315 {offsets = [0, 0], sizes = [2, 64], strides = [1, 1]} : vector<2x96xf32> to vector<2x64xf32>
    %320 = vector.extract_strided_slice %318 {offsets = [0, 0], sizes = [2, 64], strides = [1, 1]} : vector<2x96xf32> to vector<2x64xf32>
    %321 = arith.addf %319, %320 : vector<2x64xf32>
    %322 = arith.negf %321 : vector<2x64xf32>
    %323 = math.exp %322 : vector<2x64xf32>
    %cst_96 = arith.constant 1.000000e+00 : f32
    %324 = vector.broadcast %cst_96 : f32 to vector<2x64xf32>
    %325 = arith.addf %324, %323 : vector<2x64xf32>
    %326 = arith.divf %324, %325 : vector<2x64xf32>
    %327 = vector.extract_strided_slice %326 {offsets = [0, 0], sizes = [2, 32], strides = [1, 1]} : vector<2x64xf32> to vector<2x32xf32>
    %328 = vector.extract_strided_slice %326 {offsets = [0, 32], sizes = [2, 32], strides = [1, 1]} : vector<2x64xf32> to vector<2x32xf32>
    %329 = vector.extract_strided_slice %315 {offsets = [0, 64], sizes = [2, 32], strides = [1, 1]} : vector<2x96xf32> to vector<2x32xf32>
    %330 = vector.extract_strided_slice %318 {offsets = [0, 64], sizes = [2, 32], strides = [1, 1]} : vector<2x96xf32> to vector<2x32xf32>
    %331 = arith.mulf %327, %330 : vector<2x32xf32>
    %332 = arith.addf %329, %331 : vector<2x32xf32>
    %333 = math.tanh %332 : vector<2x32xf32>
    %cst_97 = arith.constant 1.000000e+00 : f32
    %334 = vector.broadcast %cst_97 : f32 to vector<2x32xf32>
    %335 = arith.subf %334, %328 : vector<2x32xf32>
    %336 = arith.mulf %335, %333 : vector<2x32xf32>
    %337 = arith.mulf %328, %310 : vector<2x32xf32>
    %338 = arith.addf %336, %337 : vector<2x32xf32>
    %c0_98 = arith.constant 0 : index
    %c7_99 = arith.constant 7 : index
    %c0_100 = arith.constant 0 : index
    %339 = vector.load %arg8[%c0_98, %c7_99, %c0_100] : memref<2x8x32xf32, #tpu.memory_space<vmem>>, vector<2x1x32xf32>
    %340 = vector.shape_cast %339 : vector<2x1x32xf32> to vector<2x32xf32>
    %341 = vector.shape_cast %338 : vector<2x32xf32> to vector<2x1x32xf32>
    tpu.vector_store %arg8[%c0_98, %c7_99, %c0_100], %341 {strides = array<i32>} : memref<2x8x32xf32, #tpu.memory_space<vmem>>, vector<2x1x32xf32>,
    %c0_101 = arith.constant 0 : index
    %c0_102 = arith.constant 0 : index
    %c0_103 = arith.constant 0 : index
    %342 = vector.load %arg8[%c0_101, %c0_102, %c0_103] : memref<2x8x32xf32, #tpu.memory_space<vmem>>, vector<2x8x32xf32>
    %343 = vector.shape_cast %342 : vector<2x8x32xf32> to vector<16x32xf32>
    %c2_104 = arith.constant 2 : index
    %c0_105 = arith.constant 0 : index
    %c0_106 = arith.constant 0 : index
    %344 = vector.load %arg4[%c2_104, %c0_105, %c0_106] : memref<6x32x96xf32, #tpu.memory_space<vmem>>, vector<1x32x96xf32>
    %345 = vector.shape_cast %344 : vector<1x32x96xf32> to vector<32x96xf32>
    %c3_107 = arith.constant 3 : index
    %c0_108 = arith.constant 0 : index
    %c0_109 = arith.constant 0 : index
    %346 = vector.load %arg4[%c3_107, %c0_108, %c0_109] : memref<6x32x96xf32, #tpu.memory_space<vmem>>, vector<1x32x96xf32>
    %347 = vector.shape_cast %346 : vector<1x32x96xf32> to vector<32x96xf32>
    %c2_110 = arith.constant 2 : index
    %c0_111 = arith.constant 0 : index
    %348 = vector.load %arg5[%c2_110, %c0_111] : memref<6x96xf32, #tpu.memory_space<vmem>>, vector<1x96xf32>
    %c3_112 = arith.constant 3 : index
    %c0_113 = arith.constant 0 : index
    %349 = vector.load %arg5[%c3_112, %c0_113] : memref<6x96xf32, #tpu.memory_space<vmem>>, vector<1x96xf32>
    %cst_114 = arith.constant dense<0.000000e+00> : vector<16x96xf32>
    %350 = tpu.matmul %343, %345, %cst_114 {dimension_numbers = #tpu.dot_dimension_numbers<[1], [0], [0], [1], [0, 0, 1, 1], [], []>} : vector<16x32xf32>, vector<32x96xf32>, vector<16x96xf32> -> vector<16x96xf32>
    %351 = vector.broadcast %348 : vector<1x96xf32> to vector<16x96xf32>
    %352 = arith.addf %350, %351 : vector<16x96xf32>
    %353 = vector.shape_cast %352 : vector<16x96xf32> to vector<2x8x96xf32>
    %cst_115 = arith.constant 0.000000e+00 : f32
    %354 = vector.broadcast %cst_115 : f32 to vector<2x32xf32>
    %355 = vector.extract_strided_slice %353 {offsets = [0, 0, 0], sizes = [2, 1, 96], strides = [1, 1, 1]} : vector<2x8x96xf32> to vector<2x1x96xf32>
    %356 = vector.shape_cast %355 : vector<2x1x96xf32> to vector<2x96xf32>
    %357 = vector.extract_strided_slice %356 {offsets = [0, 0], sizes = [2, 64], strides = [1, 1]} : vector<2x96xf32> to vector<2x64xf32>
    %358 = vector.extract_strided_slice %349 {offsets = [0, 0], sizes = [1, 64], strides = [1, 1]} : vector<1x96xf32> to vector<1x64xf32>
    %359 = vector.broadcast %358 : vector<1x64xf32> to vector<2x64xf32>
    %360 = arith.addf %357, %359 : vector<2x64xf32>
    %361 = arith.negf %360 : vector<2x64xf32>
    %362 = math.exp %361 : vector<2x64xf32>
    %cst_116 = arith.constant 1.000000e+00 : f32
    %363 = vector.broadcast %cst_116 : f32 to vector<2x64xf32>
    %364 = arith.addf %363, %362 : vector<2x64xf32>
    %365 = arith.divf %363, %364 : vector<2x64xf32>
    %366 = vector.extract_strided_slice %365 {offsets = [0, 0], sizes = [2, 32], strides = [1, 1]} : vector<2x64xf32> to vector<2x32xf32>
    %367 = vector.extract_strided_slice %365 {offsets = [0, 32], sizes = [2, 32], strides = [1, 1]} : vector<2x64xf32> to vector<2x32xf32>
    %368 = vector.extract_strided_slice %356 {offsets = [0, 64], sizes = [2, 32], strides = [1, 1]} : vector<2x96xf32> to vector<2x32xf32>
    %369 = vector.extract_strided_slice %349 {offsets = [0, 64], sizes = [1, 32], strides = [1, 1]} : vector<1x96xf32> to vector<1x32xf32>
    %370 = vector.broadcast %369 : vector<1x32xf32> to vector<2x32xf32>
    %371 = arith.mulf %366, %370 : vector<2x32xf32>
    %372 = arith.addf %368, %371 : vector<2x32xf32>
    %373 = math.tanh %372 : vector<2x32xf32>
    %cst_117 = arith.constant 1.000000e+00 : f32
    %374 = vector.broadcast %cst_117 : f32 to vector<2x32xf32>
    %375 = arith.subf %374, %367 : vector<2x32xf32>
    %376 = arith.mulf %375, %373 : vector<2x32xf32>
    %377 = arith.mulf %367, %354 : vector<2x32xf32>
    %378 = arith.addf %376, %377 : vector<2x32xf32>
    %c0_118 = arith.constant 0 : index
    %c0_119 = arith.constant 0 : index
    %c0_120 = arith.constant 0 : index
    %379 = vector.load %arg8[%c0_118, %c0_119, %c0_120] : memref<2x8x32xf32, #tpu.memory_space<vmem>>, vector<2x1x32xf32>
    %380 = vector.shape_cast %379 : vector<2x1x32xf32> to vector<2x32xf32>
    %381 = vector.shape_cast %378 : vector<2x32xf32> to vector<2x1x32xf32>
    tpu.vector_store %arg8[%c0_118, %c0_119, %c0_120], %381 {strides = array<i32>} : memref<2x8x32xf32, #tpu.memory_space<vmem>>, vector<2x1x32xf32>,
    %382 = vector.extract_strided_slice %353 {offsets = [0, 1, 0], sizes = [2, 1, 96], strides = [1, 1, 1]} : vector<2x8x96xf32> to vector<2x1x96xf32>
    %383 = vector.shape_cast %382 : vector<2x1x96xf32> to vector<2x96xf32>
    %cst_121 = arith.constant dense<0.000000e+00> : vector<2x96xf32>
    %384 = tpu.matmul %378, %347, %cst_121 {dimension_numbers = #tpu.dot_dimension_numbers<[1], [0], [0], [1], [0, 0, 1, 1], [], []>} : vector<2x32xf32>, vector<32x96xf32>, vector<2x96xf32> -> vector<2x96xf32>
    %385 = vector.broadcast %349 : vector<1x96xf32> to vector<2x96xf32>
    %386 = arith.addf %384, %385 : vector<2x96xf32>
    %387 = vector.extract_strided_slice %383 {offsets = [0, 0], sizes = [2, 64], strides = [1, 1]} : vector<2x96xf32> to vector<2x64xf32>
    %388 = vector.extract_strided_slice %386 {offsets = [0, 0], sizes = [2, 64], strides = [1, 1]} : vector<2x96xf32> to vector<2x64xf32>
    %389 = arith.addf %387, %388 : vector<2x64xf32>
    %390 = arith.negf %389 : vector<2x64xf32>
    %391 = math.exp %390 : vector<2x64xf32>
    %cst_122 = arith.constant 1.000000e+00 : f32
    %392 = vector.broadcast %cst_122 : f32 to vector<2x64xf32>
    %393 = arith.addf %392, %391 : vector<2x64xf32>
    %394 = arith.divf %392, %393 : vector<2x64xf32>
    %395 = vector.extract_strided_slice %394 {offsets = [0, 0], sizes = [2, 32], strides = [1, 1]} : vector<2x64xf32> to vector<2x32xf32>
    %396 = vector.extract_strided_slice %394 {offsets = [0, 32], sizes = [2, 32], strides = [1, 1]} : vector<2x64xf32> to vector<2x32xf32>
    %397 = vector.extract_strided_slice %383 {offsets = [0, 64], sizes = [2, 32], strides = [1, 1]} : vector<2x96xf32> to vector<2x32xf32>
    %398 = vector.extract_strided_slice %386 {offsets = [0, 64], sizes = [2, 32], strides = [1, 1]} : vector<2x96xf32> to vector<2x32xf32>
    %399 = arith.mulf %395, %398 : vector<2x32xf32>
    %400 = arith.addf %397, %399 : vector<2x32xf32>
    %401 = math.tanh %400 : vector<2x32xf32>
    %cst_123 = arith.constant 1.000000e+00 : f32
    %402 = vector.broadcast %cst_123 : f32 to vector<2x32xf32>
    %403 = arith.subf %402, %396 : vector<2x32xf32>
    %404 = arith.mulf %403, %401 : vector<2x32xf32>
    %405 = arith.mulf %396, %378 : vector<2x32xf32>
    %406 = arith.addf %404, %405 : vector<2x32xf32>
    %c0_124 = arith.constant 0 : index
    %c1_125 = arith.constant 1 : index
    %c0_126 = arith.constant 0 : index
    %407 = vector.load %arg8[%c0_124, %c1_125, %c0_126] : memref<2x8x32xf32, #tpu.memory_space<vmem>>, vector<2x1x32xf32>
    %408 = vector.shape_cast %407 : vector<2x1x32xf32> to vector<2x32xf32>
    %409 = vector.shape_cast %406 : vector<2x32xf32> to vector<2x1x32xf32>
    tpu.vector_store %arg8[%c0_124, %c1_125, %c0_126], %409 {strides = array<i32>} : memref<2x8x32xf32, #tpu.memory_space<vmem>>, vector<2x1x32xf32>,
    %410 = vector.extract_strided_slice %353 {offsets = [0, 2, 0], sizes = [2, 1, 96], strides = [1, 1, 1]} : vector<2x8x96xf32> to vector<2x1x96xf32>
    %411 = vector.shape_cast %410 : vector<2x1x96xf32> to vector<2x96xf32>
    %cst_127 = arith.constant dense<0.000000e+00> : vector<2x96xf32>
    %412 = tpu.matmul %406, %347, %cst_127 {dimension_numbers = #tpu.dot_dimension_numbers<[1], [0], [0], [1], [0, 0, 1, 1], [], []>} : vector<2x32xf32>, vector<32x96xf32>, vector<2x96xf32> -> vector<2x96xf32>
    %413 = vector.broadcast %349 : vector<1x96xf32> to vector<2x96xf32>
    %414 = arith.addf %412, %413 : vector<2x96xf32>
    %415 = vector.extract_strided_slice %411 {offsets = [0, 0], sizes = [2, 64], strides = [1, 1]} : vector<2x96xf32> to vector<2x64xf32>
    %416 = vector.extract_strided_slice %414 {offsets = [0, 0], sizes = [2, 64], strides = [1, 1]} : vector<2x96xf32> to vector<2x64xf32>
    %417 = arith.addf %415, %416 : vector<2x64xf32>
    %418 = arith.negf %417 : vector<2x64xf32>
    %419 = math.exp %418 : vector<2x64xf32>
    %cst_128 = arith.constant 1.000000e+00 : f32
    %420 = vector.broadcast %cst_128 : f32 to vector<2x64xf32>
    %421 = arith.addf %420, %419 : vector<2x64xf32>
    %422 = arith.divf %420, %421 : vector<2x64xf32>
    %423 = vector.extract_strided_slice %422 {offsets = [0, 0], sizes = [2, 32], strides = [1, 1]} : vector<2x64xf32> to vector<2x32xf32>
    %424 = vector.extract_strided_slice %422 {offsets = [0, 32], sizes = [2, 32], strides = [1, 1]} : vector<2x64xf32> to vector<2x32xf32>
    %425 = vector.extract_strided_slice %411 {offsets = [0, 64], sizes = [2, 32], strides = [1, 1]} : vector<2x96xf32> to vector<2x32xf32>
    %426 = vector.extract_strided_slice %414 {offsets = [0, 64], sizes = [2, 32], strides = [1, 1]} : vector<2x96xf32> to vector<2x32xf32>
    %427 = arith.mulf %423, %426 : vector<2x32xf32>
    %428 = arith.addf %425, %427 : vector<2x32xf32>
    %429 = math.tanh %428 : vector<2x32xf32>
    %cst_129 = arith.constant 1.000000e+00 : f32
    %430 = vector.broadcast %cst_129 : f32 to vector<2x32xf32>
    %431 = arith.subf %430, %424 : vector<2x32xf32>
    %432 = arith.mulf %431, %429 : vector<2x32xf32>
    %433 = arith.mulf %424, %406 : vector<2x32xf32>
    %434 = arith.addf %432, %433 : vector<2x32xf32>
    %c0_130 = arith.constant 0 : index
    %c2_131 = arith.constant 2 : index
    %c0_132 = arith.constant 0 : index
    %435 = vector.load %arg8[%c0_130, %c2_131, %c0_132] : memref<2x8x32xf32, #tpu.memory_space<vmem>>, vector<2x1x32xf32>
    %436 = vector.shape_cast %435 : vector<2x1x32xf32> to vector<2x32xf32>
    %437 = vector.shape_cast %434 : vector<2x32xf32> to vector<2x1x32xf32>
    tpu.vector_store %arg8[%c0_130, %c2_131, %c0_132], %437 {strides = array<i32>} : memref<2x8x32xf32, #tpu.memory_space<vmem>>, vector<2x1x32xf32>,
    %438 = vector.extract_strided_slice %353 {offsets = [0, 3, 0], sizes = [2, 1, 96], strides = [1, 1, 1]} : vector<2x8x96xf32> to vector<2x1x96xf32>
    %439 = vector.shape_cast %438 : vector<2x1x96xf32> to vector<2x96xf32>
    %cst_133 = arith.constant dense<0.000000e+00> : vector<2x96xf32>
    %440 = tpu.matmul %434, %347, %cst_133 {dimension_numbers = #tpu.dot_dimension_numbers<[1], [0], [0], [1], [0, 0, 1, 1], [], []>} : vector<2x32xf32>, vector<32x96xf32>, vector<2x96xf32> -> vector<2x96xf32>
    %441 = vector.broadcast %349 : vector<1x96xf32> to vector<2x96xf32>
    %442 = arith.addf %440, %441 : vector<2x96xf32>
    %443 = vector.extract_strided_slice %439 {offsets = [0, 0], sizes = [2, 64], strides = [1, 1]} : vector<2x96xf32> to vector<2x64xf32>
    %444 = vector.extract_strided_slice %442 {offsets = [0, 0], sizes = [2, 64], strides = [1, 1]} : vector<2x96xf32> to vector<2x64xf32>
    %445 = arith.addf %443, %444 : vector<2x64xf32>
    %446 = arith.negf %445 : vector<2x64xf32>
    %447 = math.exp %446 : vector<2x64xf32>
    %cst_134 = arith.constant 1.000000e+00 : f32
    %448 = vector.broadcast %cst_134 : f32 to vector<2x64xf32>
    %449 = arith.addf %448, %447 : vector<2x64xf32>
    %450 = arith.divf %448, %449 : vector<2x64xf32>
    %451 = vector.extract_strided_slice %450 {offsets = [0, 0], sizes = [2, 32], strides = [1, 1]} : vector<2x64xf32> to vector<2x32xf32>
    %452 = vector.extract_strided_slice %450 {offsets = [0, 32], sizes = [2, 32], strides = [1, 1]} : vector<2x64xf32> to vector<2x32xf32>
    %453 = vector.extract_strided_slice %439 {offsets = [0, 64], sizes = [2, 32], strides = [1, 1]} : vector<2x96xf32> to vector<2x32xf32>
    %454 = vector.extract_strided_slice %442 {offsets = [0, 64], sizes = [2, 32], strides = [1, 1]} : vector<2x96xf32> to vector<2x32xf32>
    %455 = arith.mulf %451, %454 : vector<2x32xf32>
    %456 = arith.addf %453, %455 : vector<2x32xf32>
    %457 = math.tanh %456 : vector<2x32xf32>
    %cst_135 = arith.constant 1.000000e+00 : f32
    %458 = vector.broadcast %cst_135 : f32 to vector<2x32xf32>
    %459 = arith.subf %458, %452 : vector<2x32xf32>
    %460 = arith.mulf %459, %457 : vector<2x32xf32>
    %461 = arith.mulf %452, %434 : vector<2x32xf32>
    %462 = arith.addf %460, %461 : vector<2x32xf32>
    %c0_136 = arith.constant 0 : index
    %c3_137 = arith.constant 3 : index
    %c0_138 = arith.constant 0 : index
    %463 = vector.load %arg8[%c0_136, %c3_137, %c0_138] : memref<2x8x32xf32, #tpu.memory_space<vmem>>, vector<2x1x32xf32>
    %464 = vector.shape_cast %463 : vector<2x1x32xf32> to vector<2x32xf32>
    %465 = vector.shape_cast %462 : vector<2x32xf32> to vector<2x1x32xf32>
    tpu.vector_store %arg8[%c0_136, %c3_137, %c0_138], %465 {strides = array<i32>} : memref<2x8x32xf32, #tpu.memory_space<vmem>>, vector<2x1x32xf32>,
    %466 = vector.extract_strided_slice %353 {offsets = [0, 4, 0], sizes = [2, 1, 96], strides = [1, 1, 1]} : vector<2x8x96xf32> to vector<2x1x96xf32>
    %467 = vector.shape_cast %466 : vector<2x1x96xf32> to vector<2x96xf32>
    %cst_139 = arith.constant dense<0.000000e+00> : vector<2x96xf32>
    %468 = tpu.matmul %462, %347, %cst_139 {dimension_numbers = #tpu.dot_dimension_numbers<[1], [0], [0], [1], [0, 0, 1, 1], [], []>} : vector<2x32xf32>, vector<32x96xf32>, vector<2x96xf32> -> vector<2x96xf32>
    %469 = vector.broadcast %349 : vector<1x96xf32> to vector<2x96xf32>
    %470 = arith.addf %468, %469 : vector<2x96xf32>
    %471 = vector.extract_strided_slice %467 {offsets = [0, 0], sizes = [2, 64], strides = [1, 1]} : vector<2x96xf32> to vector<2x64xf32>
    %472 = vector.extract_strided_slice %470 {offsets = [0, 0], sizes = [2, 64], strides = [1, 1]} : vector<2x96xf32> to vector<2x64xf32>
    %473 = arith.addf %471, %472 : vector<2x64xf32>
    %474 = arith.negf %473 : vector<2x64xf32>
    %475 = math.exp %474 : vector<2x64xf32>
    %cst_140 = arith.constant 1.000000e+00 : f32
    %476 = vector.broadcast %cst_140 : f32 to vector<2x64xf32>
    %477 = arith.addf %476, %475 : vector<2x64xf32>
    %478 = arith.divf %476, %477 : vector<2x64xf32>
    %479 = vector.extract_strided_slice %478 {offsets = [0, 0], sizes = [2, 32], strides = [1, 1]} : vector<2x64xf32> to vector<2x32xf32>
    %480 = vector.extract_strided_slice %478 {offsets = [0, 32], sizes = [2, 32], strides = [1, 1]} : vector<2x64xf32> to vector<2x32xf32>
    %481 = vector.extract_strided_slice %467 {offsets = [0, 64], sizes = [2, 32], strides = [1, 1]} : vector<2x96xf32> to vector<2x32xf32>
    %482 = vector.extract_strided_slice %470 {offsets = [0, 64], sizes = [2, 32], strides = [1, 1]} : vector<2x96xf32> to vector<2x32xf32>
    %483 = arith.mulf %479, %482 : vector<2x32xf32>
    %484 = arith.addf %481, %483 : vector<2x32xf32>
    %485 = math.tanh %484 : vector<2x32xf32>
    %cst_141 = arith.constant 1.000000e+00 : f32
    %486 = vector.broadcast %cst_141 : f32 to vector<2x32xf32>
    %487 = arith.subf %486, %480 : vector<2x32xf32>
    %488 = arith.mulf %487, %485 : vector<2x32xf32>
    %489 = arith.mulf %480, %462 : vector<2x32xf32>
    %490 = arith.addf %488, %489 : vector<2x32xf32>
    %c0_142 = arith.constant 0 : index
    %c4_143 = arith.constant 4 : index
    %c0_144 = arith.constant 0 : index
    %491 = vector.load %arg8[%c0_142, %c4_143, %c0_144] : memref<2x8x32xf32, #tpu.memory_space<vmem>>, vector<2x1x32xf32>
    %492 = vector.shape_cast %491 : vector<2x1x32xf32> to vector<2x32xf32>
    %493 = vector.shape_cast %490 : vector<2x32xf32> to vector<2x1x32xf32>
    tpu.vector_store %arg8[%c0_142, %c4_143, %c0_144], %493 {strides = array<i32>} : memref<2x8x32xf32, #tpu.memory_space<vmem>>, vector<2x1x32xf32>,
    %494 = vector.extract_strided_slice %353 {offsets = [0, 5, 0], sizes = [2, 1, 96], strides = [1, 1, 1]} : vector<2x8x96xf32> to vector<2x1x96xf32>
    %495 = vector.shape_cast %494 : vector<2x1x96xf32> to vector<2x96xf32>
    %cst_145 = arith.constant dense<0.000000e+00> : vector<2x96xf32>
    %496 = tpu.matmul %490, %347, %cst_145 {dimension_numbers = #tpu.dot_dimension_numbers<[1], [0], [0], [1], [0, 0, 1, 1], [], []>} : vector<2x32xf32>, vector<32x96xf32>, vector<2x96xf32> -> vector<2x96xf32>
    %497 = vector.broadcast %349 : vector<1x96xf32> to vector<2x96xf32>
    %498 = arith.addf %496, %497 : vector<2x96xf32>
    %499 = vector.extract_strided_slice %495 {offsets = [0, 0], sizes = [2, 64], strides = [1, 1]} : vector<2x96xf32> to vector<2x64xf32>
    %500 = vector.extract_strided_slice %498 {offsets = [0, 0], sizes = [2, 64], strides = [1, 1]} : vector<2x96xf32> to vector<2x64xf32>
    %501 = arith.addf %499, %500 : vector<2x64xf32>
    %502 = arith.negf %501 : vector<2x64xf32>
    %503 = math.exp %502 : vector<2x64xf32>
    %cst_146 = arith.constant 1.000000e+00 : f32
    %504 = vector.broadcast %cst_146 : f32 to vector<2x64xf32>
    %505 = arith.addf %504, %503 : vector<2x64xf32>
    %506 = arith.divf %504, %505 : vector<2x64xf32>
    %507 = vector.extract_strided_slice %506 {offsets = [0, 0], sizes = [2, 32], strides = [1, 1]} : vector<2x64xf32> to vector<2x32xf32>
    %508 = vector.extract_strided_slice %506 {offsets = [0, 32], sizes = [2, 32], strides = [1, 1]} : vector<2x64xf32> to vector<2x32xf32>
    %509 = vector.extract_strided_slice %495 {offsets = [0, 64], sizes = [2, 32], strides = [1, 1]} : vector<2x96xf32> to vector<2x32xf32>
    %510 = vector.extract_strided_slice %498 {offsets = [0, 64], sizes = [2, 32], strides = [1, 1]} : vector<2x96xf32> to vector<2x32xf32>
    %511 = arith.mulf %507, %510 : vector<2x32xf32>
    %512 = arith.addf %509, %511 : vector<2x32xf32>
    %513 = math.tanh %512 : vector<2x32xf32>
    %cst_147 = arith.constant 1.000000e+00 : f32
    %514 = vector.broadcast %cst_147 : f32 to vector<2x32xf32>
    %515 = arith.subf %514, %508 : vector<2x32xf32>
    %516 = arith.mulf %515, %513 : vector<2x32xf32>
    %517 = arith.mulf %508, %490 : vector<2x32xf32>
    %518 = arith.addf %516, %517 : vector<2x32xf32>
    %c0_148 = arith.constant 0 : index
    %c5_149 = arith.constant 5 : index
    %c0_150 = arith.constant 0 : index
    %519 = vector.load %arg8[%c0_148, %c5_149, %c0_150] : memref<2x8x32xf32, #tpu.memory_space<vmem>>, vector<2x1x32xf32>
    %520 = vector.shape_cast %519 : vector<2x1x32xf32> to vector<2x32xf32>
    %521 = vector.shape_cast %518 : vector<2x32xf32> to vector<2x1x32xf32>
    tpu.vector_store %arg8[%c0_148, %c5_149, %c0_150], %521 {strides = array<i32>} : memref<2x8x32xf32, #tpu.memory_space<vmem>>, vector<2x1x32xf32>,
    %522 = vector.extract_strided_slice %353 {offsets = [0, 6, 0], sizes = [2, 1, 96], strides = [1, 1, 1]} : vector<2x8x96xf32> to vector<2x1x96xf32>
    %523 = vector.shape_cast %522 : vector<2x1x96xf32> to vector<2x96xf32>
    %cst_151 = arith.constant dense<0.000000e+00> : vector<2x96xf32>
    %524 = tpu.matmul %518, %347, %cst_151 {dimension_numbers = #tpu.dot_dimension_numbers<[1], [0], [0], [1], [0, 0, 1, 1], [], []>} : vector<2x32xf32>, vector<32x96xf32>, vector<2x96xf32> -> vector<2x96xf32>
    %525 = vector.broadcast %349 : vector<1x96xf32> to vector<2x96xf32>
    %526 = arith.addf %524, %525 : vector<2x96xf32>
    %527 = vector.extract_strided_slice %523 {offsets = [0, 0], sizes = [2, 64], strides = [1, 1]} : vector<2x96xf32> to vector<2x64xf32>
    %528 = vector.extract_strided_slice %526 {offsets = [0, 0], sizes = [2, 64], strides = [1, 1]} : vector<2x96xf32> to vector<2x64xf32>
    %529 = arith.addf %527, %528 : vector<2x64xf32>
    %530 = arith.negf %529 : vector<2x64xf32>
    %531 = math.exp %530 : vector<2x64xf32>
    %cst_152 = arith.constant 1.000000e+00 : f32
    %532 = vector.broadcast %cst_152 : f32 to vector<2x64xf32>
    %533 = arith.addf %532, %531 : vector<2x64xf32>
    %534 = arith.divf %532, %533 : vector<2x64xf32>
    %535 = vector.extract_strided_slice %534 {offsets = [0, 0], sizes = [2, 32], strides = [1, 1]} : vector<2x64xf32> to vector<2x32xf32>
    %536 = vector.extract_strided_slice %534 {offsets = [0, 32], sizes = [2, 32], strides = [1, 1]} : vector<2x64xf32> to vector<2x32xf32>
    %537 = vector.extract_strided_slice %523 {offsets = [0, 64], sizes = [2, 32], strides = [1, 1]} : vector<2x96xf32> to vector<2x32xf32>
    %538 = vector.extract_strided_slice %526 {offsets = [0, 64], sizes = [2, 32], strides = [1, 1]} : vector<2x96xf32> to vector<2x32xf32>
    %539 = arith.mulf %535, %538 : vector<2x32xf32>
    %540 = arith.addf %537, %539 : vector<2x32xf32>
    %541 = math.tanh %540 : vector<2x32xf32>
    %cst_153 = arith.constant 1.000000e+00 : f32
    %542 = vector.broadcast %cst_153 : f32 to vector<2x32xf32>
    %543 = arith.subf %542, %536 : vector<2x32xf32>
    %544 = arith.mulf %543, %541 : vector<2x32xf32>
    %545 = arith.mulf %536, %518 : vector<2x32xf32>
    %546 = arith.addf %544, %545 : vector<2x32xf32>
    %c0_154 = arith.constant 0 : index
    %c6_155 = arith.constant 6 : index
    %c0_156 = arith.constant 0 : index
    %547 = vector.load %arg8[%c0_154, %c6_155, %c0_156] : memref<2x8x32xf32, #tpu.memory_space<vmem>>, vector<2x1x32xf32>
    %548 = vector.shape_cast %547 : vector<2x1x32xf32> to vector<2x32xf32>
    %549 = vector.shape_cast %546 : vector<2x32xf32> to vector<2x1x32xf32>
    tpu.vector_store %arg8[%c0_154, %c6_155, %c0_156], %549 {strides = array<i32>} : memref<2x8x32xf32, #tpu.memory_space<vmem>>, vector<2x1x32xf32>,
    %550 = vector.extract_strided_slice %353 {offsets = [0, 7, 0], sizes = [2, 1, 96], strides = [1, 1, 1]} : vector<2x8x96xf32> to vector<2x1x96xf32>
    %551 = vector.shape_cast %550 : vector<2x1x96xf32> to vector<2x96xf32>
    %cst_157 = arith.constant dense<0.000000e+00> : vector<2x96xf32>
    %552 = tpu.matmul %546, %347, %cst_157 {dimension_numbers = #tpu.dot_dimension_numbers<[1], [0], [0], [1], [0, 0, 1, 1], [], []>} : vector<2x32xf32>, vector<32x96xf32>, vector<2x96xf32> -> vector<2x96xf32>
    %553 = vector.broadcast %349 : vector<1x96xf32> to vector<2x96xf32>
    %554 = arith.addf %552, %553 : vector<2x96xf32>
    %555 = vector.extract_strided_slice %551 {offsets = [0, 0], sizes = [2, 64], strides = [1, 1]} : vector<2x96xf32> to vector<2x64xf32>
    %556 = vector.extract_strided_slice %554 {offsets = [0, 0], sizes = [2, 64], strides = [1, 1]} : vector<2x96xf32> to vector<2x64xf32>
    %557 = arith.addf %555, %556 : vector<2x64xf32>
    %558 = arith.negf %557 : vector<2x64xf32>
    %559 = math.exp %558 : vector<2x64xf32>
    %cst_158 = arith.constant 1.000000e+00 : f32
    %560 = vector.broadcast %cst_158 : f32 to vector<2x64xf32>
    %561 = arith.addf %560, %559 : vector<2x64xf32>
    %562 = arith.divf %560, %561 : vector<2x64xf32>
    %563 = vector.extract_strided_slice %562 {offsets = [0, 0], sizes = [2, 32], strides = [1, 1]} : vector<2x64xf32> to vector<2x32xf32>
    %564 = vector.extract_strided_slice %562 {offsets = [0, 32], sizes = [2, 32], strides = [1, 1]} : vector<2x64xf32> to vector<2x32xf32>
    %565 = vector.extract_strided_slice %551 {offsets = [0, 64], sizes = [2, 32], strides = [1, 1]} : vector<2x96xf32> to vector<2x32xf32>
    %566 = vector.extract_strided_slice %554 {offsets = [0, 64], sizes = [2, 32], strides = [1, 1]} : vector<2x96xf32> to vector<2x32xf32>
    %567 = arith.mulf %563, %566 : vector<2x32xf32>
    %568 = arith.addf %565, %567 : vector<2x32xf32>
    %569 = math.tanh %568 : vector<2x32xf32>
    %cst_159 = arith.constant 1.000000e+00 : f32
    %570 = vector.broadcast %cst_159 : f32 to vector<2x32xf32>
    %571 = arith.subf %570, %564 : vector<2x32xf32>
    %572 = arith.mulf %571, %569 : vector<2x32xf32>
    %573 = arith.mulf %564, %546 : vector<2x32xf32>
    %574 = arith.addf %572, %573 : vector<2x32xf32>
    %c0_160 = arith.constant 0 : index
    %c7_161 = arith.constant 7 : index
    %c0_162 = arith.constant 0 : index
    %575 = vector.load %arg8[%c0_160, %c7_161, %c0_162] : memref<2x8x32xf32, #tpu.memory_space<vmem>>, vector<2x1x32xf32>
    %576 = vector.shape_cast %575 : vector<2x1x32xf32> to vector<2x32xf32>
    %577 = vector.shape_cast %574 : vector<2x32xf32> to vector<2x1x32xf32>
    tpu.vector_store %arg8[%c0_160, %c7_161, %c0_162], %577 {strides = array<i32>} : memref<2x8x32xf32, #tpu.memory_space<vmem>>, vector<2x1x32xf32>,
    %c0_163 = arith.constant 0 : index
    %c0_164 = arith.constant 0 : index
    %c0_165 = arith.constant 0 : index
    %578 = vector.load %arg8[%c0_163, %c0_164, %c0_165] : memref<2x8x32xf32, #tpu.memory_space<vmem>>, vector<2x8x32xf32>
    %579 = vector.shape_cast %578 : vector<2x8x32xf32> to vector<16x32xf32>
    %c4_166 = arith.constant 4 : index
    %c0_167 = arith.constant 0 : index
    %c0_168 = arith.constant 0 : index
    %580 = vector.load %arg4[%c4_166, %c0_167, %c0_168] : memref<6x32x96xf32, #tpu.memory_space<vmem>>, vector<1x32x96xf32>
    %581 = vector.shape_cast %580 : vector<1x32x96xf32> to vector<32x96xf32>
    %c5_169 = arith.constant 5 : index
    %c0_170 = arith.constant 0 : index
    %c0_171 = arith.constant 0 : index
    %582 = vector.load %arg4[%c5_169, %c0_170, %c0_171] : memref<6x32x96xf32, #tpu.memory_space<vmem>>, vector<1x32x96xf32>
    %583 = vector.shape_cast %582 : vector<1x32x96xf32> to vector<32x96xf32>
    %c4_172 = arith.constant 4 : index
    %c0_173 = arith.constant 0 : index
    %584 = vector.load %arg5[%c4_172, %c0_173] : memref<6x96xf32, #tpu.memory_space<vmem>>, vector<1x96xf32>
    %c5_174 = arith.constant 5 : index
    %c0_175 = arith.constant 0 : index
    %585 = vector.load %arg5[%c5_174, %c0_175] : memref<6x96xf32, #tpu.memory_space<vmem>>, vector<1x96xf32>
    %cst_176 = arith.constant dense<0.000000e+00> : vector<16x96xf32>
    %586 = tpu.matmul %579, %581, %cst_176 {dimension_numbers = #tpu.dot_dimension_numbers<[1], [0], [0], [1], [0, 0, 1, 1], [], []>} : vector<16x32xf32>, vector<32x96xf32>, vector<16x96xf32> -> vector<16x96xf32>
    %587 = vector.broadcast %584 : vector<1x96xf32> to vector<16x96xf32>
    %588 = arith.addf %586, %587 : vector<16x96xf32>
    %589 = vector.shape_cast %588 : vector<16x96xf32> to vector<2x8x96xf32>
    %cst_177 = arith.constant 0.000000e+00 : f32
    %590 = vector.broadcast %cst_177 : f32 to vector<2x32xf32>
    %591 = vector.extract_strided_slice %589 {offsets = [0, 0, 0], sizes = [2, 1, 96], strides = [1, 1, 1]} : vector<2x8x96xf32> to vector<2x1x96xf32>
    %592 = vector.shape_cast %591 : vector<2x1x96xf32> to vector<2x96xf32>
    %593 = vector.extract_strided_slice %592 {offsets = [0, 0], sizes = [2, 64], strides = [1, 1]} : vector<2x96xf32> to vector<2x64xf32>
    %594 = vector.extract_strided_slice %585 {offsets = [0, 0], sizes = [1, 64], strides = [1, 1]} : vector<1x96xf32> to vector<1x64xf32>
    %595 = vector.broadcast %594 : vector<1x64xf32> to vector<2x64xf32>
    %596 = arith.addf %593, %595 : vector<2x64xf32>
    %597 = arith.negf %596 : vector<2x64xf32>
    %598 = math.exp %597 : vector<2x64xf32>
    %cst_178 = arith.constant 1.000000e+00 : f32
    %599 = vector.broadcast %cst_178 : f32 to vector<2x64xf32>
    %600 = arith.addf %599, %598 : vector<2x64xf32>
    %601 = arith.divf %599, %600 : vector<2x64xf32>
    %602 = vector.extract_strided_slice %601 {offsets = [0, 0], sizes = [2, 32], strides = [1, 1]} : vector<2x64xf32> to vector<2x32xf32>
    %603 = vector.extract_strided_slice %601 {offsets = [0, 32], sizes = [2, 32], strides = [1, 1]} : vector<2x64xf32> to vector<2x32xf32>
    %604 = vector.extract_strided_slice %592 {offsets = [0, 64], sizes = [2, 32], strides = [1, 1]} : vector<2x96xf32> to vector<2x32xf32>
    %605 = vector.extract_strided_slice %585 {offsets = [0, 64], sizes = [1, 32], strides = [1, 1]} : vector<1x96xf32> to vector<1x32xf32>
    %606 = vector.broadcast %605 : vector<1x32xf32> to vector<2x32xf32>
    %607 = arith.mulf %602, %606 : vector<2x32xf32>
    %608 = arith.addf %604, %607 : vector<2x32xf32>
    %609 = math.tanh %608 : vector<2x32xf32>
    %cst_179 = arith.constant 1.000000e+00 : f32
    %610 = vector.broadcast %cst_179 : f32 to vector<2x32xf32>
    %611 = arith.subf %610, %603 : vector<2x32xf32>
    %612 = arith.mulf %611, %609 : vector<2x32xf32>
    %613 = arith.mulf %603, %590 : vector<2x32xf32>
    %614 = arith.addf %612, %613 : vector<2x32xf32>
    %c0_180 = arith.constant 0 : index
    %c0_181 = arith.constant 0 : index
    %c0_182 = arith.constant 0 : index
    %615 = vector.load %arg8[%c0_180, %c0_181, %c0_182] : memref<2x8x32xf32, #tpu.memory_space<vmem>>, vector<2x1x32xf32>
    %616 = vector.shape_cast %615 : vector<2x1x32xf32> to vector<2x32xf32>
    %617 = vector.shape_cast %614 : vector<2x32xf32> to vector<2x1x32xf32>
    tpu.vector_store %arg8[%c0_180, %c0_181, %c0_182], %617 {strides = array<i32>} : memref<2x8x32xf32, #tpu.memory_space<vmem>>, vector<2x1x32xf32>,
    %618 = vector.extract_strided_slice %589 {offsets = [0, 1, 0], sizes = [2, 1, 96], strides = [1, 1, 1]} : vector<2x8x96xf32> to vector<2x1x96xf32>
    %619 = vector.shape_cast %618 : vector<2x1x96xf32> to vector<2x96xf32>
    %cst_183 = arith.constant dense<0.000000e+00> : vector<2x96xf32>
    %620 = tpu.matmul %614, %583, %cst_183 {dimension_numbers = #tpu.dot_dimension_numbers<[1], [0], [0], [1], [0, 0, 1, 1], [], []>} : vector<2x32xf32>, vector<32x96xf32>, vector<2x96xf32> -> vector<2x96xf32>
    %621 = vector.broadcast %585 : vector<1x96xf32> to vector<2x96xf32>
    %622 = arith.addf %620, %621 : vector<2x96xf32>
    %623 = vector.extract_strided_slice %619 {offsets = [0, 0], sizes = [2, 64], strides = [1, 1]} : vector<2x96xf32> to vector<2x64xf32>
    %624 = vector.extract_strided_slice %622 {offsets = [0, 0], sizes = [2, 64], strides = [1, 1]} : vector<2x96xf32> to vector<2x64xf32>
    %625 = arith.addf %623, %624 : vector<2x64xf32>
    %626 = arith.negf %625 : vector<2x64xf32>
    %627 = math.exp %626 : vector<2x64xf32>
    %cst_184 = arith.constant 1.000000e+00 : f32
    %628 = vector.broadcast %cst_184 : f32 to vector<2x64xf32>
    %629 = arith.addf %628, %627 : vector<2x64xf32>
    %630 = arith.divf %628, %629 : vector<2x64xf32>
    %631 = vector.extract_strided_slice %630 {offsets = [0, 0], sizes = [2, 32], strides = [1, 1]} : vector<2x64xf32> to vector<2x32xf32>
    %632 = vector.extract_strided_slice %630 {offsets = [0, 32], sizes = [2, 32], strides = [1, 1]} : vector<2x64xf32> to vector<2x32xf32>
    %633 = vector.extract_strided_slice %619 {offsets = [0, 64], sizes = [2, 32], strides = [1, 1]} : vector<2x96xf32> to vector<2x32xf32>
    %634 = vector.extract_strided_slice %622 {offsets = [0, 64], sizes = [2, 32], strides = [1, 1]} : vector<2x96xf32> to vector<2x32xf32>
    %635 = arith.mulf %631, %634 : vector<2x32xf32>
    %636 = arith.addf %633, %635 : vector<2x32xf32>
    %637 = math.tanh %636 : vector<2x32xf32>
    %cst_185 = arith.constant 1.000000e+00 : f32
    %638 = vector.broadcast %cst_185 : f32 to vector<2x32xf32>
    %639 = arith.subf %638, %632 : vector<2x32xf32>
    %640 = arith.mulf %639, %637 : vector<2x32xf32>
    %641 = arith.mulf %632, %614 : vector<2x32xf32>
    %642 = arith.addf %640, %641 : vector<2x32xf32>
    %c0_186 = arith.constant 0 : index
    %c1_187 = arith.constant 1 : index
    %c0_188 = arith.constant 0 : index
    %643 = vector.load %arg8[%c0_186, %c1_187, %c0_188] : memref<2x8x32xf32, #tpu.memory_space<vmem>>, vector<2x1x32xf32>
    %644 = vector.shape_cast %643 : vector<2x1x32xf32> to vector<2x32xf32>
    %645 = vector.shape_cast %642 : vector<2x32xf32> to vector<2x1x32xf32>
    tpu.vector_store %arg8[%c0_186, %c1_187, %c0_188], %645 {strides = array<i32>} : memref<2x8x32xf32, #tpu.memory_space<vmem>>, vector<2x1x32xf32>,
    %646 = vector.extract_strided_slice %589 {offsets = [0, 2, 0], sizes = [2, 1, 96], strides = [1, 1, 1]} : vector<2x8x96xf32> to vector<2x1x96xf32>
    %647 = vector.shape_cast %646 : vector<2x1x96xf32> to vector<2x96xf32>
    %cst_189 = arith.constant dense<0.000000e+00> : vector<2x96xf32>
    %648 = tpu.matmul %642, %583, %cst_189 {dimension_numbers = #tpu.dot_dimension_numbers<[1], [0], [0], [1], [0, 0, 1, 1], [], []>} : vector<2x32xf32>, vector<32x96xf32>, vector<2x96xf32> -> vector<2x96xf32>
    %649 = vector.broadcast %585 : vector<1x96xf32> to vector<2x96xf32>
    %650 = arith.addf %648, %649 : vector<2x96xf32>
    %651 = vector.extract_strided_slice %647 {offsets = [0, 0], sizes = [2, 64], strides = [1, 1]} : vector<2x96xf32> to vector<2x64xf32>
    %652 = vector.extract_strided_slice %650 {offsets = [0, 0], sizes = [2, 64], strides = [1, 1]} : vector<2x96xf32> to vector<2x64xf32>
    %653 = arith.addf %651, %652 : vector<2x64xf32>
    %654 = arith.negf %653 : vector<2x64xf32>
    %655 = math.exp %654 : vector<2x64xf32>
    %cst_190 = arith.constant 1.000000e+00 : f32
    %656 = vector.broadcast %cst_190 : f32 to vector<2x64xf32>
    %657 = arith.addf %656, %655 : vector<2x64xf32>
    %658 = arith.divf %656, %657 : vector<2x64xf32>
    %659 = vector.extract_strided_slice %658 {offsets = [0, 0], sizes = [2, 32], strides = [1, 1]} : vector<2x64xf32> to vector<2x32xf32>
    %660 = vector.extract_strided_slice %658 {offsets = [0, 32], sizes = [2, 32], strides = [1, 1]} : vector<2x64xf32> to vector<2x32xf32>
    %661 = vector.extract_strided_slice %647 {offsets = [0, 64], sizes = [2, 32], strides = [1, 1]} : vector<2x96xf32> to vector<2x32xf32>
    %662 = vector.extract_strided_slice %650 {offsets = [0, 64], sizes = [2, 32], strides = [1, 1]} : vector<2x96xf32> to vector<2x32xf32>
    %663 = arith.mulf %659, %662 : vector<2x32xf32>
    %664 = arith.addf %661, %663 : vector<2x32xf32>
    %665 = math.tanh %664 : vector<2x32xf32>
    %cst_191 = arith.constant 1.000000e+00 : f32
    %666 = vector.broadcast %cst_191 : f32 to vector<2x32xf32>
    %667 = arith.subf %666, %660 : vector<2x32xf32>
    %668 = arith.mulf %667, %665 : vector<2x32xf32>
    %669 = arith.mulf %660, %642 : vector<2x32xf32>
    %670 = arith.addf %668, %669 : vector<2x32xf32>
    %c0_192 = arith.constant 0 : index
    %c2_193 = arith.constant 2 : index
    %c0_194 = arith.constant 0 : index
    %671 = vector.load %arg8[%c0_192, %c2_193, %c0_194] : memref<2x8x32xf32, #tpu.memory_space<vmem>>, vector<2x1x32xf32>
    %672 = vector.shape_cast %671 : vector<2x1x32xf32> to vector<2x32xf32>
    %673 = vector.shape_cast %670 : vector<2x32xf32> to vector<2x1x32xf32>
    tpu.vector_store %arg8[%c0_192, %c2_193, %c0_194], %673 {strides = array<i32>} : memref<2x8x32xf32, #tpu.memory_space<vmem>>, vector<2x1x32xf32>,
    %674 = vector.extract_strided_slice %589 {offsets = [0, 3, 0], sizes = [2, 1, 96], strides = [1, 1, 1]} : vector<2x8x96xf32> to vector<2x1x96xf32>
    %675 = vector.shape_cast %674 : vector<2x1x96xf32> to vector<2x96xf32>
    %cst_195 = arith.constant dense<0.000000e+00> : vector<2x96xf32>
    %676 = tpu.matmul %670, %583, %cst_195 {dimension_numbers = #tpu.dot_dimension_numbers<[1], [0], [0], [1], [0, 0, 1, 1], [], []>} : vector<2x32xf32>, vector<32x96xf32>, vector<2x96xf32> -> vector<2x96xf32>
    %677 = vector.broadcast %585 : vector<1x96xf32> to vector<2x96xf32>
    %678 = arith.addf %676, %677 : vector<2x96xf32>
    %679 = vector.extract_strided_slice %675 {offsets = [0, 0], sizes = [2, 64], strides = [1, 1]} : vector<2x96xf32> to vector<2x64xf32>
    %680 = vector.extract_strided_slice %678 {offsets = [0, 0], sizes = [2, 64], strides = [1, 1]} : vector<2x96xf32> to vector<2x64xf32>
    %681 = arith.addf %679, %680 : vector<2x64xf32>
    %682 = arith.negf %681 : vector<2x64xf32>
    %683 = math.exp %682 : vector<2x64xf32>
    %cst_196 = arith.constant 1.000000e+00 : f32
    %684 = vector.broadcast %cst_196 : f32 to vector<2x64xf32>
    %685 = arith.addf %684, %683 : vector<2x64xf32>
    %686 = arith.divf %684, %685 : vector<2x64xf32>
    %687 = vector.extract_strided_slice %686 {offsets = [0, 0], sizes = [2, 32], strides = [1, 1]} : vector<2x64xf32> to vector<2x32xf32>
    %688 = vector.extract_strided_slice %686 {offsets = [0, 32], sizes = [2, 32], strides = [1, 1]} : vector<2x64xf32> to vector<2x32xf32>
    %689 = vector.extract_strided_slice %675 {offsets = [0, 64], sizes = [2, 32], strides = [1, 1]} : vector<2x96xf32> to vector<2x32xf32>
    %690 = vector.extract_strided_slice %678 {offsets = [0, 64], sizes = [2, 32], strides = [1, 1]} : vector<2x96xf32> to vector<2x32xf32>
    %691 = arith.mulf %687, %690 : vector<2x32xf32>
    %692 = arith.addf %689, %691 : vector<2x32xf32>
    %693 = math.tanh %692 : vector<2x32xf32>
    %cst_197 = arith.constant 1.000000e+00 : f32
    %694 = vector.broadcast %cst_197 : f32 to vector<2x32xf32>
    %695 = arith.subf %694, %688 : vector<2x32xf32>
    %696 = arith.mulf %695, %693 : vector<2x32xf32>
    %697 = arith.mulf %688, %670 : vector<2x32xf32>
    %698 = arith.addf %696, %697 : vector<2x32xf32>
    %c0_198 = arith.constant 0 : index
    %c3_199 = arith.constant 3 : index
    %c0_200 = arith.constant 0 : index
    %699 = vector.load %arg8[%c0_198, %c3_199, %c0_200] : memref<2x8x32xf32, #tpu.memory_space<vmem>>, vector<2x1x32xf32>
    %700 = vector.shape_cast %699 : vector<2x1x32xf32> to vector<2x32xf32>
    %701 = vector.shape_cast %698 : vector<2x32xf32> to vector<2x1x32xf32>
    tpu.vector_store %arg8[%c0_198, %c3_199, %c0_200], %701 {strides = array<i32>} : memref<2x8x32xf32, #tpu.memory_space<vmem>>, vector<2x1x32xf32>,
    %702 = vector.extract_strided_slice %589 {offsets = [0, 4, 0], sizes = [2, 1, 96], strides = [1, 1, 1]} : vector<2x8x96xf32> to vector<2x1x96xf32>
    %703 = vector.shape_cast %702 : vector<2x1x96xf32> to vector<2x96xf32>
    %cst_201 = arith.constant dense<0.000000e+00> : vector<2x96xf32>
    %704 = tpu.matmul %698, %583, %cst_201 {dimension_numbers = #tpu.dot_dimension_numbers<[1], [0], [0], [1], [0, 0, 1, 1], [], []>} : vector<2x32xf32>, vector<32x96xf32>, vector<2x96xf32> -> vector<2x96xf32>
    %705 = vector.broadcast %585 : vector<1x96xf32> to vector<2x96xf32>
    %706 = arith.addf %704, %705 : vector<2x96xf32>
    %707 = vector.extract_strided_slice %703 {offsets = [0, 0], sizes = [2, 64], strides = [1, 1]} : vector<2x96xf32> to vector<2x64xf32>
    %708 = vector.extract_strided_slice %706 {offsets = [0, 0], sizes = [2, 64], strides = [1, 1]} : vector<2x96xf32> to vector<2x64xf32>
    %709 = arith.addf %707, %708 : vector<2x64xf32>
    %710 = arith.negf %709 : vector<2x64xf32>
    %711 = math.exp %710 : vector<2x64xf32>
    %cst_202 = arith.constant 1.000000e+00 : f32
    %712 = vector.broadcast %cst_202 : f32 to vector<2x64xf32>
    %713 = arith.addf %712, %711 : vector<2x64xf32>
    %714 = arith.divf %712, %713 : vector<2x64xf32>
    %715 = vector.extract_strided_slice %714 {offsets = [0, 0], sizes = [2, 32], strides = [1, 1]} : vector<2x64xf32> to vector<2x32xf32>
    %716 = vector.extract_strided_slice %714 {offsets = [0, 32], sizes = [2, 32], strides = [1, 1]} : vector<2x64xf32> to vector<2x32xf32>
    %717 = vector.extract_strided_slice %703 {offsets = [0, 64], sizes = [2, 32], strides = [1, 1]} : vector<2x96xf32> to vector<2x32xf32>
    %718 = vector.extract_strided_slice %706 {offsets = [0, 64], sizes = [2, 32], strides = [1, 1]} : vector<2x96xf32> to vector<2x32xf32>
    %719 = arith.mulf %715, %718 : vector<2x32xf32>
    %720 = arith.addf %717, %719 : vector<2x32xf32>
    %721 = math.tanh %720 : vector<2x32xf32>
    %cst_203 = arith.constant 1.000000e+00 : f32
    %722 = vector.broadcast %cst_203 : f32 to vector<2x32xf32>
    %723 = arith.subf %722, %716 : vector<2x32xf32>
    %724 = arith.mulf %723, %721 : vector<2x32xf32>
    %725 = arith.mulf %716, %698 : vector<2x32xf32>
    %726 = arith.addf %724, %725 : vector<2x32xf32>
    %c0_204 = arith.constant 0 : index
    %c4_205 = arith.constant 4 : index
    %c0_206 = arith.constant 0 : index
    %727 = vector.load %arg8[%c0_204, %c4_205, %c0_206] : memref<2x8x32xf32, #tpu.memory_space<vmem>>, vector<2x1x32xf32>
    %728 = vector.shape_cast %727 : vector<2x1x32xf32> to vector<2x32xf32>
    %729 = vector.shape_cast %726 : vector<2x32xf32> to vector<2x1x32xf32>
    tpu.vector_store %arg8[%c0_204, %c4_205, %c0_206], %729 {strides = array<i32>} : memref<2x8x32xf32, #tpu.memory_space<vmem>>, vector<2x1x32xf32>,
    %730 = vector.extract_strided_slice %589 {offsets = [0, 5, 0], sizes = [2, 1, 96], strides = [1, 1, 1]} : vector<2x8x96xf32> to vector<2x1x96xf32>
    %731 = vector.shape_cast %730 : vector<2x1x96xf32> to vector<2x96xf32>
    %cst_207 = arith.constant dense<0.000000e+00> : vector<2x96xf32>
    %732 = tpu.matmul %726, %583, %cst_207 {dimension_numbers = #tpu.dot_dimension_numbers<[1], [0], [0], [1], [0, 0, 1, 1], [], []>} : vector<2x32xf32>, vector<32x96xf32>, vector<2x96xf32> -> vector<2x96xf32>
    %733 = vector.broadcast %585 : vector<1x96xf32> to vector<2x96xf32>
    %734 = arith.addf %732, %733 : vector<2x96xf32>
    %735 = vector.extract_strided_slice %731 {offsets = [0, 0], sizes = [2, 64], strides = [1, 1]} : vector<2x96xf32> to vector<2x64xf32>
    %736 = vector.extract_strided_slice %734 {offsets = [0, 0], sizes = [2, 64], strides = [1, 1]} : vector<2x96xf32> to vector<2x64xf32>
    %737 = arith.addf %735, %736 : vector<2x64xf32>
    %738 = arith.negf %737 : vector<2x64xf32>
    %739 = math.exp %738 : vector<2x64xf32>
    %cst_208 = arith.constant 1.000000e+00 : f32
    %740 = vector.broadcast %cst_208 : f32 to vector<2x64xf32>
    %741 = arith.addf %740, %739 : vector<2x64xf32>
    %742 = arith.divf %740, %741 : vector<2x64xf32>
    %743 = vector.extract_strided_slice %742 {offsets = [0, 0], sizes = [2, 32], strides = [1, 1]} : vector<2x64xf32> to vector<2x32xf32>
    %744 = vector.extract_strided_slice %742 {offsets = [0, 32], sizes = [2, 32], strides = [1, 1]} : vector<2x64xf32> to vector<2x32xf32>
    %745 = vector.extract_strided_slice %731 {offsets = [0, 64], sizes = [2, 32], strides = [1, 1]} : vector<2x96xf32> to vector<2x32xf32>
    %746 = vector.extract_strided_slice %734 {offsets = [0, 64], sizes = [2, 32], strides = [1, 1]} : vector<2x96xf32> to vector<2x32xf32>
    %747 = arith.mulf %743, %746 : vector<2x32xf32>
    %748 = arith.addf %745, %747 : vector<2x32xf32>
    %749 = math.tanh %748 : vector<2x32xf32>
    %cst_209 = arith.constant 1.000000e+00 : f32
    %750 = vector.broadcast %cst_209 : f32 to vector<2x32xf32>
    %751 = arith.subf %750, %744 : vector<2x32xf32>
    %752 = arith.mulf %751, %749 : vector<2x32xf32>
    %753 = arith.mulf %744, %726 : vector<2x32xf32>
    %754 = arith.addf %752, %753 : vector<2x32xf32>
    %c0_210 = arith.constant 0 : index
    %c5_211 = arith.constant 5 : index
    %c0_212 = arith.constant 0 : index
    %755 = vector.load %arg8[%c0_210, %c5_211, %c0_212] : memref<2x8x32xf32, #tpu.memory_space<vmem>>, vector<2x1x32xf32>
    %756 = vector.shape_cast %755 : vector<2x1x32xf32> to vector<2x32xf32>
    %757 = vector.shape_cast %754 : vector<2x32xf32> to vector<2x1x32xf32>
    tpu.vector_store %arg8[%c0_210, %c5_211, %c0_212], %757 {strides = array<i32>} : memref<2x8x32xf32, #tpu.memory_space<vmem>>, vector<2x1x32xf32>,
    %758 = vector.extract_strided_slice %589 {offsets = [0, 6, 0], sizes = [2, 1, 96], strides = [1, 1, 1]} : vector<2x8x96xf32> to vector<2x1x96xf32>
    %759 = vector.shape_cast %758 : vector<2x1x96xf32> to vector<2x96xf32>
    %cst_213 = arith.constant dense<0.000000e+00> : vector<2x96xf32>
    %760 = tpu.matmul %754, %583, %cst_213 {dimension_numbers = #tpu.dot_dimension_numbers<[1], [0], [0], [1], [0, 0, 1, 1], [], []>} : vector<2x32xf32>, vector<32x96xf32>, vector<2x96xf32> -> vector<2x96xf32>
    %761 = vector.broadcast %585 : vector<1x96xf32> to vector<2x96xf32>
    %762 = arith.addf %760, %761 : vector<2x96xf32>
    %763 = vector.extract_strided_slice %759 {offsets = [0, 0], sizes = [2, 64], strides = [1, 1]} : vector<2x96xf32> to vector<2x64xf32>
    %764 = vector.extract_strided_slice %762 {offsets = [0, 0], sizes = [2, 64], strides = [1, 1]} : vector<2x96xf32> to vector<2x64xf32>
    %765 = arith.addf %763, %764 : vector<2x64xf32>
    %766 = arith.negf %765 : vector<2x64xf32>
    %767 = math.exp %766 : vector<2x64xf32>
    %cst_214 = arith.constant 1.000000e+00 : f32
    %768 = vector.broadcast %cst_214 : f32 to vector<2x64xf32>
    %769 = arith.addf %768, %767 : vector<2x64xf32>
    %770 = arith.divf %768, %769 : vector<2x64xf32>
    %771 = vector.extract_strided_slice %770 {offsets = [0, 0], sizes = [2, 32], strides = [1, 1]} : vector<2x64xf32> to vector<2x32xf32>
    %772 = vector.extract_strided_slice %770 {offsets = [0, 32], sizes = [2, 32], strides = [1, 1]} : vector<2x64xf32> to vector<2x32xf32>
    %773 = vector.extract_strided_slice %759 {offsets = [0, 64], sizes = [2, 32], strides = [1, 1]} : vector<2x96xf32> to vector<2x32xf32>
    %774 = vector.extract_strided_slice %762 {offsets = [0, 64], sizes = [2, 32], strides = [1, 1]} : vector<2x96xf32> to vector<2x32xf32>
    %775 = arith.mulf %771, %774 : vector<2x32xf32>
    %776 = arith.addf %773, %775 : vector<2x32xf32>
    %777 = math.tanh %776 : vector<2x32xf32>
    %cst_215 = arith.constant 1.000000e+00 : f32
    %778 = vector.broadcast %cst_215 : f32 to vector<2x32xf32>
    %779 = arith.subf %778, %772 : vector<2x32xf32>
    %780 = arith.mulf %779, %777 : vector<2x32xf32>
    %781 = arith.mulf %772, %754 : vector<2x32xf32>
    %782 = arith.addf %780, %781 : vector<2x32xf32>
    %c0_216 = arith.constant 0 : index
    %c6_217 = arith.constant 6 : index
    %c0_218 = arith.constant 0 : index
    %783 = vector.load %arg8[%c0_216, %c6_217, %c0_218] : memref<2x8x32xf32, #tpu.memory_space<vmem>>, vector<2x1x32xf32>
    %784 = vector.shape_cast %783 : vector<2x1x32xf32> to vector<2x32xf32>
    %785 = vector.shape_cast %782 : vector<2x32xf32> to vector<2x1x32xf32>
    tpu.vector_store %arg8[%c0_216, %c6_217, %c0_218], %785 {strides = array<i32>} : memref<2x8x32xf32, #tpu.memory_space<vmem>>, vector<2x1x32xf32>,
    %786 = vector.extract_strided_slice %589 {offsets = [0, 7, 0], sizes = [2, 1, 96], strides = [1, 1, 1]} : vector<2x8x96xf32> to vector<2x1x96xf32>
    %787 = vector.shape_cast %786 : vector<2x1x96xf32> to vector<2x96xf32>
    %cst_219 = arith.constant dense<0.000000e+00> : vector<2x96xf32>
    %788 = tpu.matmul %782, %583, %cst_219 {dimension_numbers = #tpu.dot_dimension_numbers<[1], [0], [0], [1], [0, 0, 1, 1], [], []>} : vector<2x32xf32>, vector<32x96xf32>, vector<2x96xf32> -> vector<2x96xf32>
    %789 = vector.broadcast %585 : vector<1x96xf32> to vector<2x96xf32>
    %790 = arith.addf %788, %789 : vector<2x96xf32>
    %791 = vector.extract_strided_slice %787 {offsets = [0, 0], sizes = [2, 64], strides = [1, 1]} : vector<2x96xf32> to vector<2x64xf32>
    %792 = vector.extract_strided_slice %790 {offsets = [0, 0], sizes = [2, 64], strides = [1, 1]} : vector<2x96xf32> to vector<2x64xf32>
    %793 = arith.addf %791, %792 : vector<2x64xf32>
    %794 = arith.negf %793 : vector<2x64xf32>
    %795 = math.exp %794 : vector<2x64xf32>
    %cst_220 = arith.constant 1.000000e+00 : f32
    %796 = vector.broadcast %cst_220 : f32 to vector<2x64xf32>
    %797 = arith.addf %796, %795 : vector<2x64xf32>
    %798 = arith.divf %796, %797 : vector<2x64xf32>
    %799 = vector.extract_strided_slice %798 {offsets = [0, 0], sizes = [2, 32], strides = [1, 1]} : vector<2x64xf32> to vector<2x32xf32>
    %800 = vector.extract_strided_slice %798 {offsets = [0, 32], sizes = [2, 32], strides = [1, 1]} : vector<2x64xf32> to vector<2x32xf32>
    %801 = vector.extract_strided_slice %787 {offsets = [0, 64], sizes = [2, 32], strides = [1, 1]} : vector<2x96xf32> to vector<2x32xf32>
    %802 = vector.extract_strided_slice %790 {offsets = [0, 64], sizes = [2, 32], strides = [1, 1]} : vector<2x96xf32> to vector<2x32xf32>
    %803 = arith.mulf %799, %802 : vector<2x32xf32>
    %804 = arith.addf %801, %803 : vector<2x32xf32>
    %805 = math.tanh %804 : vector<2x32xf32>
    %cst_221 = arith.constant 1.000000e+00 : f32
    %806 = vector.broadcast %cst_221 : f32 to vector<2x32xf32>
    %807 = arith.subf %806, %800 : vector<2x32xf32>
    %808 = arith.mulf %807, %805 : vector<2x32xf32>
    %809 = arith.mulf %800, %782 : vector<2x32xf32>
    %810 = arith.addf %808, %809 : vector<2x32xf32>
    %c0_222 = arith.constant 0 : index
    %c7_223 = arith.constant 7 : index
    %c0_224 = arith.constant 0 : index
    %811 = vector.load %arg8[%c0_222, %c7_223, %c0_224] : memref<2x8x32xf32, #tpu.memory_space<vmem>>, vector<2x1x32xf32>
    %812 = vector.shape_cast %811 : vector<2x1x32xf32> to vector<2x32xf32>
    %813 = vector.shape_cast %810 : vector<2x32xf32> to vector<2x1x32xf32>
    tpu.vector_store %arg8[%c0_222, %c7_223, %c0_224], %813 {strides = array<i32>} : memref<2x8x32xf32, #tpu.memory_space<vmem>>, vector<2x1x32xf32>,
    %c0_225 = arith.constant 0 : index
    %c0_226 = arith.constant 0 : index
    %c0_227 = arith.constant 0 : index
    %814 = vector.load %arg8[%c0_225, %c0_226, %c0_227] : memref<2x8x32xf32, #tpu.memory_space<vmem>>, vector<2x8x32xf32>
    %815 = vector.shape_cast %814 : vector<2x8x32xf32> to vector<16x32xf32>
    %c2_228 = arith.constant 2 : index
    %c0_229 = arith.constant 0 : index
    %c0_230 = arith.constant 0 : index
    %816 = vector.load %arg3[%c2_228, %c0_229, %c0_230] : memref<6x32x32xf32, #tpu.memory_space<vmem>>, vector<1x32x32xf32>
    %817 = vector.shape_cast %816 : vector<1x32x32xf32> to vector<32x32xf32>
    %cst_231 = arith.constant dense<0.000000e+00> : vector<16x32xf32>
    %818 = tpu.matmul %815, %817, %cst_231 {dimension_numbers = #tpu.dot_dimension_numbers<[1], [0], [0], [1], [0, 0, 1, 1], [], []>} : vector<16x32xf32>, vector<32x32xf32>, vector<16x32xf32> -> vector<16x32xf32>
    %c9 = arith.constant 9 : index
    %c0_232 = arith.constant 0 : index
    %819 = vector.load %arg6[%c9, %c0_232] : memref<15x32xf32, #tpu.memory_space<vmem>>, vector<1x32xf32>
    %820 = vector.broadcast %819 : vector<1x32xf32> to vector<16x32xf32>
    %821 = arith.addf %818, %820 : vector<16x32xf32>
    %c3_233 = arith.constant 3 : index
    %c0_234 = arith.constant 0 : index
    %c0_235 = arith.constant 0 : index
    %822 = vector.load %arg3[%c3_233, %c0_234, %c0_235] : memref<6x32x32xf32, #tpu.memory_space<vmem>>, vector<1x32x32xf32>
    %823 = vector.shape_cast %822 : vector<1x32x32xf32> to vector<32x32xf32>
    %cst_236 = arith.constant dense<0.000000e+00> : vector<16x32xf32>
    %824 = tpu.matmul %815, %823, %cst_236 {dimension_numbers = #tpu.dot_dimension_numbers<[1], [0], [0], [1], [0, 0, 1, 1], [], []>} : vector<16x32xf32>, vector<32x32xf32>, vector<16x32xf32> -> vector<16x32xf32>
    %c10 = arith.constant 10 : index
    %c0_237 = arith.constant 0 : index
    %825 = vector.load %arg6[%c10, %c0_237] : memref<15x32xf32, #tpu.memory_space<vmem>>, vector<1x32xf32>
    %826 = vector.broadcast %825 : vector<1x32xf32> to vector<16x32xf32>
    %827 = arith.addf %824, %826 : vector<16x32xf32>
    %c4_238 = arith.constant 4 : index
    %c0_239 = arith.constant 0 : index
    %c0_240 = arith.constant 0 : index
    %828 = vector.load %arg3[%c4_238, %c0_239, %c0_240] : memref<6x32x32xf32, #tpu.memory_space<vmem>>, vector<1x32x32xf32>
    %829 = vector.shape_cast %828 : vector<1x32x32xf32> to vector<32x32xf32>
    %cst_241 = arith.constant dense<0.000000e+00> : vector<16x32xf32>
    %830 = tpu.matmul %815, %829, %cst_241 {dimension_numbers = #tpu.dot_dimension_numbers<[1], [0], [0], [1], [0, 0, 1, 1], [], []>} : vector<16x32xf32>, vector<32x32xf32>, vector<16x32xf32> -> vector<16x32xf32>
    %c11 = arith.constant 11 : index
    %c0_242 = arith.constant 0 : index
    %831 = vector.load %arg6[%c11, %c0_242] : memref<15x32xf32, #tpu.memory_space<vmem>>, vector<1x32xf32>
    %832 = vector.broadcast %831 : vector<1x32xf32> to vector<16x32xf32>
    %833 = arith.addf %830, %832 : vector<16x32xf32>
    %834 = vector.extract_strided_slice %821 {offsets = [0, 0], sizes = [16, 4], strides = [1, 1]} : vector<16x32xf32> to vector<16x4xf32>
    %835 = vector.shape_cast %834 : vector<16x4xf32> to vector<2x8x4xf32>
    %836 = vector.extract_strided_slice %821 {offsets = [0, 4], sizes = [16, 4], strides = [1, 1]} : vector<16x32xf32> to vector<16x4xf32>
    %837 = vector.shape_cast %836 : vector<16x4xf32> to vector<2x8x4xf32>
    %838 = vector.extract_strided_slice %821 {offsets = [0, 8], sizes = [16, 4], strides = [1, 1]} : vector<16x32xf32> to vector<16x4xf32>
    %839 = vector.shape_cast %838 : vector<16x4xf32> to vector<2x8x4xf32>
    %840 = vector.extract_strided_slice %821 {offsets = [0, 12], sizes = [16, 4], strides = [1, 1]} : vector<16x32xf32> to vector<16x4xf32>
    %841 = vector.shape_cast %840 : vector<16x4xf32> to vector<2x8x4xf32>
    %842 = vector.extract_strided_slice %821 {offsets = [0, 16], sizes = [16, 4], strides = [1, 1]} : vector<16x32xf32> to vector<16x4xf32>
    %843 = vector.shape_cast %842 : vector<16x4xf32> to vector<2x8x4xf32>
    %844 = vector.extract_strided_slice %821 {offsets = [0, 20], sizes = [16, 4], strides = [1, 1]} : vector<16x32xf32> to vector<16x4xf32>
    %845 = vector.shape_cast %844 : vector<16x4xf32> to vector<2x8x4xf32>
    %846 = vector.extract_strided_slice %821 {offsets = [0, 24], sizes = [16, 4], strides = [1, 1]} : vector<16x32xf32> to vector<16x4xf32>
    %847 = vector.shape_cast %846 : vector<16x4xf32> to vector<2x8x4xf32>
    %848 = vector.extract_strided_slice %821 {offsets = [0, 28], sizes = [16, 4], strides = [1, 1]} : vector<16x32xf32> to vector<16x4xf32>
    %849 = vector.shape_cast %848 : vector<16x4xf32> to vector<2x8x4xf32>
    %850 = tpu.concatenate %835, %837, %839, %841, %843, %845, %847, %849 in 0 : vector<2x8x4xf32>, vector<2x8x4xf32>, vector<2x8x4xf32>, vector<2x8x4xf32>, vector<2x8x4xf32>, vector<2x8x4xf32>, vector<2x8x4xf32>, vector<2x8x4xf32> -> vector<16x8x4xf32>
    %851 = vector.extract_strided_slice %827 {offsets = [0, 0], sizes = [16, 4], strides = [1, 1]} : vector<16x32xf32> to vector<16x4xf32>
    %852 = vector.shape_cast %851 : vector<16x4xf32> to vector<2x8x4xf32>
    %853 = vector.extract_strided_slice %827 {offsets = [0, 4], sizes = [16, 4], strides = [1, 1]} : vector<16x32xf32> to vector<16x4xf32>
    %854 = vector.shape_cast %853 : vector<16x4xf32> to vector<2x8x4xf32>
    %855 = vector.extract_strided_slice %827 {offsets = [0, 8], sizes = [16, 4], strides = [1, 1]} : vector<16x32xf32> to vector<16x4xf32>
    %856 = vector.shape_cast %855 : vector<16x4xf32> to vector<2x8x4xf32>
    %857 = vector.extract_strided_slice %827 {offsets = [0, 12], sizes = [16, 4], strides = [1, 1]} : vector<16x32xf32> to vector<16x4xf32>
    %858 = vector.shape_cast %857 : vector<16x4xf32> to vector<2x8x4xf32>
    %859 = vector.extract_strided_slice %827 {offsets = [0, 16], sizes = [16, 4], strides = [1, 1]} : vector<16x32xf32> to vector<16x4xf32>
    %860 = vector.shape_cast %859 : vector<16x4xf32> to vector<2x8x4xf32>
    %861 = vector.extract_strided_slice %827 {offsets = [0, 20], sizes = [16, 4], strides = [1, 1]} : vector<16x32xf32> to vector<16x4xf32>
    %862 = vector.shape_cast %861 : vector<16x4xf32> to vector<2x8x4xf32>
    %863 = vector.extract_strided_slice %827 {offsets = [0, 24], sizes = [16, 4], strides = [1, 1]} : vector<16x32xf32> to vector<16x4xf32>
    %864 = vector.shape_cast %863 : vector<16x4xf32> to vector<2x8x4xf32>
    %865 = vector.extract_strided_slice %827 {offsets = [0, 28], sizes = [16, 4], strides = [1, 1]} : vector<16x32xf32> to vector<16x4xf32>
    %866 = vector.shape_cast %865 : vector<16x4xf32> to vector<2x8x4xf32>
    %867 = tpu.concatenate %852, %854, %856, %858, %860, %862, %864, %866 in 0 : vector<2x8x4xf32>, vector<2x8x4xf32>, vector<2x8x4xf32>, vector<2x8x4xf32>, vector<2x8x4xf32>, vector<2x8x4xf32>, vector<2x8x4xf32>, vector<2x8x4xf32> -> vector<16x8x4xf32>
    %868 = vector.extract_strided_slice %833 {offsets = [0, 0], sizes = [16, 4], strides = [1, 1]} : vector<16x32xf32> to vector<16x4xf32>
    %869 = vector.shape_cast %868 : vector<16x4xf32> to vector<2x8x4xf32>
    %870 = vector.extract_strided_slice %833 {offsets = [0, 4], sizes = [16, 4], strides = [1, 1]} : vector<16x32xf32> to vector<16x4xf32>
    %871 = vector.shape_cast %870 : vector<16x4xf32> to vector<2x8x4xf32>
    %872 = vector.extract_strided_slice %833 {offsets = [0, 8], sizes = [16, 4], strides = [1, 1]} : vector<16x32xf32> to vector<16x4xf32>
    %873 = vector.shape_cast %872 : vector<16x4xf32> to vector<2x8x4xf32>
    %874 = vector.extract_strided_slice %833 {offsets = [0, 12], sizes = [16, 4], strides = [1, 1]} : vector<16x32xf32> to vector<16x4xf32>
    %875 = vector.shape_cast %874 : vector<16x4xf32> to vector<2x8x4xf32>
    %876 = vector.extract_strided_slice %833 {offsets = [0, 16], sizes = [16, 4], strides = [1, 1]} : vector<16x32xf32> to vector<16x4xf32>
    %877 = vector.shape_cast %876 : vector<16x4xf32> to vector<2x8x4xf32>
    %878 = vector.extract_strided_slice %833 {offsets = [0, 20], sizes = [16, 4], strides = [1, 1]} : vector<16x32xf32> to vector<16x4xf32>
    %879 = vector.shape_cast %878 : vector<16x4xf32> to vector<2x8x4xf32>
    %880 = vector.extract_strided_slice %833 {offsets = [0, 24], sizes = [16, 4], strides = [1, 1]} : vector<16x32xf32> to vector<16x4xf32>
    %881 = vector.shape_cast %880 : vector<16x4xf32> to vector<2x8x4xf32>
    %882 = vector.extract_strided_slice %833 {offsets = [0, 28], sizes = [16, 4], strides = [1, 1]} : vector<16x32xf32> to vector<16x4xf32>
    %883 = vector.shape_cast %882 : vector<16x4xf32> to vector<2x8x4xf32>
    %884 = tpu.concatenate %869, %871, %873, %875, %877, %879, %881, %883 in 0 : vector<2x8x4xf32>, vector<2x8x4xf32>, vector<2x8x4xf32>, vector<2x8x4xf32>, vector<2x8x4xf32>, vector<2x8x4xf32>, vector<2x8x4xf32>, vector<2x8x4xf32> -> vector<16x8x4xf32>
    "tpu.trace_start"() <{level = 10 : i32, message = "gqd,gkd->gqk"}> : () -> ()
    %cst_243 = arith.constant dense<0.000000e+00> : vector<16x8x8xf32>
    %885 = tpu.matmul %850, %867, %cst_243 {dimension_numbers = #tpu.dot_dimension_numbers<[2], [2], [1], [1], [0, 0, 0, 1, 1, 1], [0], [0]>} : vector<16x8x4xf32>, vector<16x8x4xf32>, vector<16x8x8xf32> -> vector<16x8x8xf32>
    "tpu.trace_stop"() : () -> ()
    %cst_244 = arith.constant dense<0xFF800000> : vector<16x8xf32>
    %886 = vector.multi_reduction <maximumf>, %885, %cst_244 [2] : vector<16x8x8xf32> to vector<16x8xf32>
    %887 = vector.shape_cast %886 : vector<16x8xf32> to vector<16x8x1xf32>
    %888 = vector.broadcast %887 : vector<16x8x1xf32> to vector<16x8x8xf32>
    %889 = arith.subf %885, %888 : vector<16x8x8xf32>
    %890 = math.exp %889 : vector<16x8x8xf32>
    %cst_245 = arith.constant dense<0.000000e+00> : vector<16x8xf32>
    %891 = vector.multi_reduction <add>, %890, %cst_245 [2] : vector<16x8x8xf32> to vector<16x8xf32>
    %892 = vector.shape_cast %891 : vector<16x8xf32> to vector<16x8x1xf32>
    %893 = tpu.reciprocal %892 : vector<16x8x1xf32> -> vector<16x8x1xf32>
    %894 = vector.broadcast %893 : vector<16x8x1xf32> to vector<16x8x8xf32>
    %895 = arith.mulf %890, %894 : vector<16x8x8xf32>
    "tpu.trace_start"() <{level = 10 : i32, message = "gqk,gkd->gqd"}> : () -> ()
    %cst_246 = arith.constant dense<0.000000e+00> : vector<16x8x4xf32>
    %896 = tpu.matmul %895, %884, %cst_246 {dimension_numbers = #tpu.dot_dimension_numbers<[2], [1], [1], [2], [0, 0, 0, 1, 1, 2], [0], [0]>} : vector<16x8x8xf32>, vector<16x8x4xf32>, vector<16x8x4xf32> -> vector<16x8x4xf32>
    "tpu.trace_stop"() : () -> ()
    %897 = vector.extract_strided_slice %896 {offsets = [0, 0, 0], sizes = [2, 8, 4], strides = [1, 1, 1]} : vector<16x8x4xf32> to vector<2x8x4xf32>
    %898 = vector.shape_cast %897 : vector<2x8x4xf32> to vector<16x4xf32>
    %899 = vector.extract_strided_slice %896 {offsets = [2, 0, 0], sizes = [2, 8, 4], strides = [1, 1, 1]} : vector<16x8x4xf32> to vector<2x8x4xf32>
    %900 = vector.shape_cast %899 : vector<2x8x4xf32> to vector<16x4xf32>
    %901 = vector.extract_strided_slice %896 {offsets = [4, 0, 0], sizes = [2, 8, 4], strides = [1, 1, 1]} : vector<16x8x4xf32> to vector<2x8x4xf32>
    %902 = vector.shape_cast %901 : vector<2x8x4xf32> to vector<16x4xf32>
    %903 = vector.extract_strided_slice %896 {offsets = [6, 0, 0], sizes = [2, 8, 4], strides = [1, 1, 1]} : vector<16x8x4xf32> to vector<2x8x4xf32>
    %904 = vector.shape_cast %903 : vector<2x8x4xf32> to vector<16x4xf32>
    %905 = vector.extract_strided_slice %896 {offsets = [8, 0, 0], sizes = [2, 8, 4], strides = [1, 1, 1]} : vector<16x8x4xf32> to vector<2x8x4xf32>
    %906 = vector.shape_cast %905 : vector<2x8x4xf32> to vector<16x4xf32>
    %907 = vector.extract_strided_slice %896 {offsets = [10, 0, 0], sizes = [2, 8, 4], strides = [1, 1, 1]} : vector<16x8x4xf32> to vector<2x8x4xf32>
    %908 = vector.shape_cast %907 : vector<2x8x4xf32> to vector<16x4xf32>
    %909 = vector.extract_strided_slice %896 {offsets = [12, 0, 0], sizes = [2, 8, 4], strides = [1, 1, 1]} : vector<16x8x4xf32> to vector<2x8x4xf32>
    %910 = vector.shape_cast %909 : vector<2x8x4xf32> to vector<16x4xf32>
    %911 = vector.extract_strided_slice %896 {offsets = [14, 0, 0], sizes = [2, 8, 4], strides = [1, 1, 1]} : vector<16x8x4xf32> to vector<2x8x4xf32>
    %912 = vector.shape_cast %911 : vector<2x8x4xf32> to vector<16x4xf32>
    %913 = tpu.concatenate %898, %900, %902, %904, %906, %908, %910, %912 in 1 : vector<16x4xf32>, vector<16x4xf32>, vector<16x4xf32>, vector<16x4xf32>, vector<16x4xf32>, vector<16x4xf32>, vector<16x4xf32>, vector<16x4xf32> -> vector<16x32xf32>
    %c5_247 = arith.constant 5 : index
    %c0_248 = arith.constant 0 : index
    %c0_249 = arith.constant 0 : index
    %914 = vector.load %arg3[%c5_247, %c0_248, %c0_249] : memref<6x32x32xf32, #tpu.memory_space<vmem>>, vector<1x32x32xf32>
    %915 = vector.shape_cast %914 : vector<1x32x32xf32> to vector<32x32xf32>
    %cst_250 = arith.constant dense<0.000000e+00> : vector<16x32xf32>
    %916 = tpu.matmul %913, %915, %cst_250 {dimension_numbers = #tpu.dot_dimension_numbers<[1], [0], [0], [1], [0, 0, 1, 1], [], []>} : vector<16x32xf32>, vector<32x32xf32>, vector<16x32xf32> -> vector<16x32xf32>
    %c12 = arith.constant 12 : index
    %c0_251 = arith.constant 0 : index
    %917 = vector.load %arg6[%c12, %c0_251] : memref<15x32xf32, #tpu.memory_space<vmem>>, vector<1x32xf32>
    %918 = vector.broadcast %917 : vector<1x32xf32> to vector<16x32xf32>
    %919 = arith.addf %916, %918 : vector<16x32xf32>
    %920 = arith.addf %919, %815 : vector<16x32xf32>
    %c13 = arith.constant 13 : index
    %c0_252 = arith.constant 0 : index
    %921 = vector.load %arg6[%c13, %c0_252] : memref<15x32xf32, #tpu.memory_space<vmem>>, vector<1x32xf32>
    %c14 = arith.constant 14 : index
    %c0_253 = arith.constant 0 : index
    %922 = vector.load %arg6[%c14, %c0_253] : memref<15x32xf32, #tpu.memory_space<vmem>>, vector<1x32xf32>
    %cst_254 = arith.constant dense<0.000000e+00> : vector<16xf32>
    %923 = vector.multi_reduction <add>, %920, %cst_254 [1] : vector<16x32xf32> to vector<16xf32>
    %924 = vector.shape_cast %923 : vector<16xf32> to vector<16x1xf32>
    %cst_255 = arith.constant 3.200000e+01 : f32
    %925 = vector.broadcast %cst_255 : f32 to vector<16x1xf32>
    %926 = arith.divf %924, %925 : vector<16x1xf32>
    %927 = vector.broadcast %926 : vector<16x1xf32> to vector<16x32xf32>
    %928 = arith.subf %920, %927 : vector<16x32xf32>
    %929 = arith.mulf %928, %928 : vector<16x32xf32>
    %cst_256 = arith.constant dense<0.000000e+00> : vector<16xf32>
    %930 = vector.multi_reduction <add>, %929, %cst_256 [1] : vector<16x32xf32> to vector<16xf32>
    %931 = vector.shape_cast %930 : vector<16xf32> to vector<16x1xf32>
    %cst_257 = arith.constant 3.200000e+01 : f32
    %932 = vector.broadcast %cst_257 : f32 to vector<16x1xf32>
    %933 = arith.divf %931, %932 : vector<16x1xf32>
    %934 = vector.broadcast %926 : vector<16x1xf32> to vector<16x32xf32>
    %935 = arith.subf %920, %934 : vector<16x32xf32>
    %cst_258 = arith.constant 9.99999974E-6 : f32
    %936 = vector.broadcast %cst_258 : f32 to vector<16x1xf32>
    %937 = arith.addf %933, %936 : vector<16x1xf32>
    %938 = math.rsqrt %937 : vector<16x1xf32>
    %939 = vector.broadcast %938 : vector<16x1xf32> to vector<16x32xf32>
    %940 = arith.mulf %935, %939 : vector<16x32xf32>
    %941 = vector.broadcast %921 : vector<1x32xf32> to vector<16x32xf32>
    %942 = arith.mulf %940, %941 : vector<16x32xf32>
    %943 = vector.broadcast %922 : vector<1x32xf32> to vector<16x32xf32>
    %944 = arith.addf %942, %943 : vector<16x32xf32>
    %945 = vector.shape_cast %944 : vector<16x32xf32> to vector<2x8x32xf32>
    %c0_259 = arith.constant 0 : index
    %c0_260 = arith.constant 0 : index
    %c0_261 = arith.constant 0 : index
    %946 = vector.load %arg7[%c0_259, %c0_260, %c0_261] : memref<2x8x32xf32, #tpu.memory_space<vmem>>, vector<2x8x32xf32>
    tpu.vector_store %arg7[%c0_259, %c0_260, %c0_261], %945 {strides = array<i32>} : memref<2x8x32xf32, #tpu.memory_space<vmem>>, vector<2x8x32xf32>,
    return
  }
  func.func @transform_0(%arg0: i32) -> (i32, i32, i32) {
    %c0_i32 = arith.constant 0 : i32
    %c0_i32_0 = arith.constant 0 : i32
    %c0_i32_1 = arith.constant 0 : i32
    return %arg0, %c0_i32, %c0_i32_0 : i32, i32, i32
  }
  func.func @transform_1(%arg0: i32) -> (i32, i32) {
    %c0_i32 = arith.constant 0 : i32
    %c0_i32_0 = arith.constant 0 : i32
    %c0_i32_1 = arith.constant 0 : i32
    return %c0_i32, %c0_i32_0 : i32, i32
  }
  func.func @transform_2(%arg0: i32) -> (i32, i32, i32) {
    %c0_i32 = arith.constant 0 : i32
    %c0_i32_0 = arith.constant 0 : i32
    %c0_i32_1 = arith.constant 0 : i32
    %c0_i32_2 = arith.constant 0 : i32
    return %c0_i32, %c0_i32_0, %c0_i32_1 : i32, i32, i32
  }
  func.func @transform_3(%arg0: i32) -> (i32, i32, i32) {
    %c0_i32 = arith.constant 0 : i32
    %c0_i32_0 = arith.constant 0 : i32
    %c0_i32_1 = arith.constant 0 : i32
    %c0_i32_2 = arith.constant 0 : i32
    return %c0_i32, %c0_i32_0, %c0_i32_1 : i32, i32, i32
  }
  func.func @transform_4(%arg0: i32) -> (i32, i32) {
    %c0_i32 = arith.constant 0 : i32
    %c0_i32_0 = arith.constant 0 : i32
    %c0_i32_1 = arith.constant 0 : i32
    return %c0_i32, %c0_i32_0 : i32, i32
  }
  func.func @transform_5(%arg0: i32) -> (i32, i32) {
    %c0_i32 = arith.constant 0 : i32
    %c0_i32_0 = arith.constant 0 : i32
    %c0_i32_1 = arith.constant 0 : i32
    return %c0_i32, %c0_i32_0 : i32, i32
  }
  func.func @transform_6(%arg0: i32) -> (i32, i32, i32) {
    %c0_i32 = arith.constant 0 : i32
    %c0_i32_0 = arith.constant 0 : i32
    %c0_i32_1 = arith.constant 0 : i32
    return %arg0, %c0_i32, %c0_i32_0 : i32, i32, i32
  }
}

</mosaic_0001>

<bundles_post_ra>
// kernel: tpu_custom_call.1
= control target key start
LH: loop header
LB: loop body
LE: loop exit
PB: predicated region body
PF: predicated region fallthrough
CT: control target
= control target key end

     0   :  { %11 = vsyncpa [#allocation4], 0  ;;  %s10451_s0 = inlined_call_operand.vmem [shape: f32[4,8,1], index: 0, kind: input, shape index: {}]   ;;  %s10452_s1 = inlined_call_operand.vmem [shape: f32[1,32], index: 1, kind: input, shape index: {}]   ;;  %s10453_s2 = inlined_call_operand.hbm [shape: f32[6,32,32], index: 2, kind: input, shape index: {}]   ;;  %s10454_s3 = inlined_call_operand.hbm [shape: f32[6,32,96], index: 3, kind: input, shape index: {}]   ;;  %s10455_s4 = inlined_call_operand.vmem [shape: f32[6,96], index: 4, kind: input, shape index: {}]   ;;  %s10456_s5 = inlined_call_operand.vmem [shape: f32[15,32], index: 5, kind: input, shape index: {}]   ;;  %s10457_s6 = inlined_call_operand.hbm [shape: f32[4,8,32], index: 6, kind: output, shape index: {}]  }
   0x1   :  { %12 = vsyncpa [#allocation7], 0 }
   0x2   :  { %13 = vsyncpa [#allocation5], 0 }
   0x3   :  { %15 = vsyncpa [#allocation5 + $0x1], 0  ;;  %s8902_s21 = smov 0   ;;  %s8904_s22 = smov 0  }
   0x4   :  { %s8906_s23 = smov 0   ;;  %s8908_s24 = smov 0  }
   0x5 LB: > { %s8923_s25 = sadd.s32 4294967295, %s8840_s24   ;;  %s7380_s26 = sadd.s32 4294967294, %s8840_s24   ;;  %s8840_s24 = sphi %s8908_s24, %s10471_s24   ;;  %s8836_s23 = sphi %s8906_s23, %s10470_s23   ;;  %s8832_s22 = sphi %s8904_s22, %s10469_s22   ;;  %s8828_s21 = sphi %s8902_s21, %s10468_s21  }
   0x6   : > { %s8927_s27 = sadd.s32 1, %s8840_s24   ;;  %s159_s28 = sadd.s32 1, %s8836_s23 }
   0x7   : > { %s156_s29 = ssub.s32 %s8840_s24, %s8927_s27  ;;  %p169_p0 = scmp.ne.s32.totalorder %s8836_s23, %s8832_s22 }
   0x8   : > { %p157_p1 = scmp.eq.s32.totalorder %s156_s29, 0  ;;  %p170_p2 = scmp.eq.s32.totalorder %s8923_s25, 1 }
   0x9   : > { %p175_p3 = scmp.ne.s32.totalorder %s8832_s22, %s8828_s21  ;;  %p176_p4 = scmp.eq.s32.totalorder %s7380_s26, 1 }
   0xa   : > { %s8938_s30 = scalar_select %p157_p1, %s8836_s23, %s159_s28  }
   0xb   : > { %p8940_p5 = por %p170_p2, %p169_p0  ;;  %p8944_p6 = por %p176_p4, %p175_p3 }
   0xc   : > { %p7381_p7 = scmp.ge.s32.totalorder %s8840_s24, 1  ;;  %p183_p8 = scmp.lt.s32.totalorder %s8840_s24, 3 }
   0xd   : > { %s10460_s8 = scalar_select %p8944_p6, 1, 0 }
   0xe   : > { %p10458_p9 = scmp.eq.s32.totalorder %s8923_s25, 0  ;;  %p8951_p10 = pnand %p7381_p7, %p183_p8 }
   0xf   : > { %s8842_s10 = smov [#allocation3]   ;;  %s8843_s13 = smov [#allocation6]  }
  0x10   : > { %s198_s11 = sshll.u32 %s8842_s10, 4  ;;  %p8277_p11 = pneg %p8951_p10  ;;  %s199_s11 = int_to_ptr.vmem [resolvable:$true] %s198_s11 }
  0x11   : > { %s211_s14 = sshll.u32 %s8843_s13, 4  ;;  %s8731_s15 = scalar_lea.vmem %s199_s11, 3072  ;;  %s212_s14 = int_to_ptr.vmem [resolvable:$true] %s211_s14 }
  0x12   : > { %p8959_p12 = pnand %p10458_p9, %p8277_p11  ;;  %p8732_p0 = scmp.ne.s32.totalorder %s199_s11, %s8731_s15 }
  0x13   : > { %p8739_p3 = scmp.lt.s32.totalorder %s199_s11, %s199_s11  ;;  %p8740_p4 = scmp.lt.s32.totalorder %s8731_s15, %s8731_s15 }
  0x14   : > { %p8722_p13 = pneg %p8959_p12 }
  0x15   : > { %p8741_p7 = por %p8740_p4, %p8739_p3 }
  0x16   : > { %p8734_p1 = pnand %p8732_p0, %p8722_p13 }
  0x18   : > { %p8735_p2 = pneg %p8734_p1 }
  0x1a   : > { %p8742_p8 = pnand %p8741_p7, %p8735_p2 }
  0x1c   : > { %8745 = shalt.err (!%p8742_p8)
}
  0x1d   : > { %s8844_s16 = smov 128   ;;  %s8845_s17 = smov 8  }
  0x1e   : > { %8280 = dma.hbm_to_vmem [thread:$0]  (!%p8959_p12), %s10453_s2, 3072, %s199_s11, [#allocation4], %s8844_s16, %s8844_s16, %s8845_s17  }
  0x1f   : > { %s8757_s20 = scalar_lea.vmem %s212_s14, 3072  ;;  %p8765_p9 = scmp.lt.s32.totalorder %s212_s14, %s212_s14 }
  0x20   : > { %p8758_p11 = scmp.ne.s32.totalorder %s212_s14, %s8757_s20  ;;  %p8766_p6 = scmp.lt.s32.totalorder %s8757_s20, %s8757_s20 }
  0x22   : > { %p8760_p0 = pnand %p8758_p11, %p8722_p13  ;;  %p8767_p3 = por %p8766_p6, %p8765_p9 }
  0x24   : > { %p8761_p1 = pneg %p8760_p0 }
  0x26   : > { %p8768_p2 = pnand %p8767_p3, %p8761_p1 }
  0x28   : > { %8771 = shalt.err (!%p8768_p2)
}
  0x29   : > { %8283 = dma.hbm_to_vmem [thread:$0]  (!%p8959_p12), %s10454_s3, 3072, %s212_s14, [#allocation7], %s8844_s16, %s8844_s16, %s8845_s17  }
  0x2a   : > { %242 = sbr.rel (%p8951_p10) target bundleno = 19391 (0x4bbf), region = 44  ;;  %p10463_p4 = scmp.eq.s32.totalorder (!%p8951_p10), %s8923_s25, 0 }
  0x2f   : > { %8815 = dma.done.wait (%p10463_p4), [#allocation4], 3072   ;;  %p10464_p13 = pmov %p10463_p4 }
  0x30   : > { %p10465_p7 = pmov %p10463_p4 }
  0x31   : > { %8817 = vsyncadd (%p10464_p13), [#allocation4], 4294964224 }
  0x32   : > { %8819 = dma.done.wait (%p10465_p7), [#allocation7], 3072   ;;  %p10466_p6 = pmov %p10463_p4 }
  0x33   : > { %s7389_s29 = sshll.u32 %s8923_s25, 1  ;;  %v8846_v0 = vmov 0   ;;  %v7391_v3 = vld [vmem:[%s10452_s1] ss:$0 sm:$0xff]  ;;  %vm313_vm0 = vcmask 261120   ;;  %v362_v23 = vld [vmem:[#allocation3 + $0x18] sm:$0xff] }
  0x34   : > { %8821 = vsyncadd (%p10466_p6), [#allocation7], 4294964224  ;;  %8349 = vset.pattern.permute.xlu0 %v8846_v0  ;;  %p277_p9 = scmp.lt.s32.totalorder %s7389_s29, 3  ;;  %v7392_v5 = vld [vmem:[%s10456_s5] ss:$0 sm:$0xff]  ;;  %7777 = vmatprep.subr.mxu0 %v362_v23  ;;  %v360_v25 = vld [vmem:[#allocation3 + $0x8] sm:$0xff] }
  0x35   : > { %v361_v24 = vld [vmem:[#allocation3 + $0x10] sm:$0xff]  ;;  %7778 = vmatpush3.msra.mxu0 %v362_v23  ;;  %v359_v26 = vld [vmem:[#allocation3] sm:$0xff]  ;;  %v499_v0 = vld [vmem:[#allocation3 + $0x38] sm:$0xff]  ;;  %s8847_s16 = smov 64   ;;  %vm8849_vm7 = vmmov 0   ;;  %vm792_vm8 = vcmask 1041409  }
  0x36   : > { %s10473_s29 = smov (!%p277_p9, %s7389_s29), 3  ;;  %7779 = vmatprep.subr.mxu0 %v361_v24  ;;  %v7393_v34 = vld [vmem:[%s10456_s5 + $0x1] ss:$0 sm:$0xff]  ;;  %v7394_v36 = vld [vmem:[%s10456_s5 + $0x2] ss:$0 sm:$0xff]  ;;  %7788 = vmatprep.subr.mxu1 %v499_v0  ;;  %vm933_vm9 = vcmask 254977  }
  0x37   : > { %s7390_s9 = sshll.u32 %s10473_s29, 3  ;;  %7780 = vmatpush3.msra.mxu0 %v361_v24  ;;  %v7395_v48 = vld [vmem:[%s10456_s5 + $0x3] ss:$0 sm:$0xff]  ;;  %7789 = vmatpush3.msra.mxu1 %v499_v0  ;;  %s8850_s29 = smov 96   ;;  %vm788_vm10 = vcmask 253952   ;;  %vm1226_vm11 = vcmask 257027  }
  0x38   : > { %s280_s12 = scalar_lea.vmem %s10451_s0, %s7390_s9  ;;  %7781 = vmatprep.subr.mxu0 %v360_v25  ;;  %vm1079_vm12 = vcmask 256002   ;;  %vm1520_vm13 = vcmask 259077   ;;  %vm1373_vm14 = vcmask 258052   ;;  %vm1667_vm15 = vcmask 260102   ;;  %s8851_s26 = smov 124  }
  0x39   : > { %v283_v1 = vld [vmem:[%s280_s12] sm:$0xff]  ;;  %v284_v2 = vld [vmem:[%s280_s12 + $0x8] sm:$0xff]  ;;  %7782 = vmatpush3.msra.mxu0 %v360_v25  ;;  %s8852_s28 = smov 120   ;;  %s8854_s9 = smov 112  }
  0x3a   : > { %288 = vperm.xlu0 %8349, %v283_v1   ;;  %7783 = vmatprep.subr.mxu0 %v359_v26  ;;  %v498_v1 = vld [vmem:[#allocation3 + $0x30] sm:$0xff]  ;;  %s8855_s10 = smov 108   ;;  %s8856_s11 = smov 104  }
  0x3b   : > { %7784 = vmatpush3.msra.mxu0 %v359_v26  ;;  %7790 = vmatprep.subr.mxu1 %v498_v1  ;;  %v7400_v25 = vld [vmem:[%s10456_s5 + $0x6] ss:$0 sm:$0xff]  ;;  %s8857_s12 = smov 100   ;;  %s8858_s15 = smov 4  }
  0x3c   : > { %7791 = vmatpush3.msra.mxu1 %v498_v1  ;;  %s8859_s17 = smov 8   ;;  %s8861_s18 = smov 16  }
  0x3d   : > { %s8862_s19 = smov 20   ;;  %s8863_s20 = smov 24  }
  0x3e   : > { %293 = vperm.xlu0 %8349, %v284_v2   ;;  %v497_v2 = vld [vmem:[#allocation3 + $0x28] sm:$0xff] }
  0x3f   : > { %7792 = vmatprep.subr.mxu1 %v497_v2 }
  0x40   : > { %7793 = vmatpush3.msra.mxu1 %v497_v2  ;;  %v7405_v2 = vld [vmem:[%s10455_s4] ss:$0 sm:$0xff] }
  0xb5   : > { %v289_v4 = vpop.permute.xlu0 %288 }
  0xb6   : > { %v302_v6 = vmul.f32 %v7391_v3, %v289_v4 }
  0xb8   : > { %v309_v7 = vadd.f32 %v7392_v5, %v302_v6 }
  0xb9   : > { %v294_v8 = vpop.permute.xlu0 %293 }
  0xba   : > { %v303_v9 = vmul.f32 %v7391_v3, %v294_v8  ;;  %v314_v10 = vsel %vm313_vm0, %v309_v7, 0.0  ;;  %v496_v3 = vld [vmem:[#allocation3 + $0x20] sm:$0xff] }
  0xbb   : > { %315 = vadd.xlane.f32.xlu1 %v314_v10  ;;  %7794 = vmatprep.subr.mxu1 %v496_v3 }
  0xbc   : > { %v310_v11 = vadd.f32 %v7392_v5, %v303_v9  ;;  %7795 = vmatpush3.msra.mxu1 %v496_v3 }
  0xbe   : > { %v317_v12 = vsel %vm313_vm0, %v310_v11, 0.0 }
  0xbf   : > { %318 = vadd.xlane.f32.xlu1 %v317_v12 }
 0x144   : > { %v316_v13 = vpop.xlane.xlu1 %315 }
 0x145   : > { %v321_v14 = vmul.f32 0.03125, %v316_v13  ;;  %v7399_v13 = vld [vmem:[%s10456_s5 + $0x5] ss:$0 sm:$0xff] }
 0x147   : > { %v323_v15 = vsub.f32 %v309_v7, %v321_v14 }
 0x148   : > { %v319_v16 = vpop.xlane.xlu1 %318 }
 0x149   : > { %v322_v17 = vmul.f32 0.03125, %v319_v16  ;;  %v325_v18 = vmul.f32 %v323_v15, %v323_v15 }
 0x14b   : > { %v324_v19 = vsub.f32 %v310_v11, %v322_v17  ;;  %v327_v20 = vsel %vm313_vm0, %v325_v18, 0.0  ;;  %v7398_v11 = vld [vmem:[%s10456_s5 + $0x4] ss:$0 sm:$0xff] }
 0x14c   : > { %328 = vadd.xlane.f32.xlu0 %v327_v20 }
 0x14d   : > { %v326_v21 = vmul.f32 %v324_v19, %v324_v19 }
 0x14f   : > { %v330_v22 = vsel %vm313_vm0, %v326_v21, 0.0 }
 0x150   : > { %331 = vadd.xlane.f32.xlu1 %v330_v22 }
 0x1d5   : > { %v329_v27 = vpop.xlane.xlu0 %328 }
 0x1d6   : > { %v333_v28 = vmul.f32 0.03125, %v329_v27 }
 0x1d8   : > { %v335_v29 = vadd.f32 1e-05, %v333_v28 }
 0x1d9   : > { %v332_v30 = vpop.xlane.xlu1 %331 }
 0x1da   : > { %8350 = vrsqrt.f32 %v335_v29  ;;  %v334_v31 = vmul.f32 0.03125, %v332_v30 }
 0x1dc   : > { %v336_v32 = vadd.f32 1e-05, %v334_v31 }
 0x1de   : > { %8352 = vrsqrt.f32 %v336_v32 }
 0x1e7   : > { %v8351_v33 = vpop.eup %8350 }
 0x1e8   : > { %v339_v35 = vmul.f32 %v8351_v33, %v323_v15 }
 0x1ea   : > { %v345_v37 = vmul.f32 %v7393_v34, %v339_v35 }
 0x1eb   : > { %v8353_v38 = vpop.eup %8352 }
 0x1ec   : > { %v340_v39 = vmul.f32 %v8353_v38, %v324_v19  ;;  %v351_v40 = vadd.f32 %v7394_v36, %v345_v37 }
 0x1ee   : > { %v346_v41 = vmul.f32 %v7393_v34, %v340_v39  ;;  %vm353_vm1 = vcmp.ge.f32.partialorder %v351_v40, 0.0  ;;  %v355_v42 = vmul.f32 0.01, %v351_v40 }
 0x1f0   : > { %v352_v43 = vadd.f32 %v7394_v36, %v346_v41  ;;  %v357_v44 = vsel %vm353_vm1, %v351_v40, %v355_v42  ;;  %v635_v41 = vld [vmem:[#allocation6 + $0x18] sm:$0xff]  ;;  %v634_v42 = vld [vmem:[#allocation6 + $0x10] sm:$0xff]  ;;  %vm1814_vm1 = vcmask 261127  }
 0x1f1   : > { %7785 = vmatprep.mubr.msk.f32.mxu0 %vm313_vm0, %v357_v44  ;;  %7799 = vmatprep.subr.mxu0 %v635_v41  ;;  %v632_v44 = vld [vmem:[#allocation6] sm:$0xff] }
 0x1f2   : > { %vm354_vm2 = vcmp.ge.f32.partialorder %v352_v43, 0.0  ;;  %v356_v45 = vmul.f32 0.01, %v352_v43 }
 0x1f4   : > { %v358_v46 = vsel %vm354_vm2, %v352_v43, %v356_v45  ;;  %v633_v43 = vld [vmem:[#allocation6 + $0x8] sm:$0xff]  ;;  %v9038_v45 = vld [vmem:[%s10455_s4 + $0x1] ss:$0 sm:$0xff]  ;;  %vm4542_vm2 = vcmask 31744  }
 0x1f5   : > { %7786 = vmatmul.mubr.msk.f32.vlgmr.msra.gmra.mxu0 %vm313_vm0, %v358_v46 }
 0x1f6   : > { %7800 = vmatpush3.msra.mxu0 %v635_v41 }
 0x1f7   : > { %7801 = vmatprep.subr.mxu0 %v634_v42 }
 0x1f8   : > { %7802 = vmatpush3.msra.mxu0 %v634_v42 }
 0x1f9   : > { %7803 = vmatprep.subr.mxu0 %v633_v43 }
 0x1fa   : > { %7804 = vmatpush3.msra.mxu0 %v633_v43 }
 0x1fb   : > { %7805 = vmatprep.subr.mxu0 %v632_v44 }
 0x1fc   : > { %7806 = vmatpush3.msra.mxu0 %v632_v44 }
 0x2b5   : > { %v7787_v47 = vpop.f32.mrf.mxu0 }
 0x2b6   : > { %v446_v51 = vadd.f32 %v7787_v47, %v7395_v48 }
 0x2b7   : > { %v440_v49 = vpop.f32.mrf.mxu0 }
 0x2b8   : > { %v441_v50 = vadd.f32 %v7395_v48, %v440_v49  ;;  %v454_v53 = vsel %vm313_vm0, %v446_v51, 0.0 }
 0x2ba   : > { %v451_v52 = vsel %vm313_vm0, %v441_v50, 0.0 }
 0x2bb   : > { %452 = vadd.xlane.f32.xlu1 %v451_v52 }
 0x2bf   : > { %455 = vadd.xlane.f32.xlu1 %v454_v53  ;;  %v7403_v53 = vld [vmem:[%s10456_s5 + $0x7] ss:$0 sm:$0xff] }
 0x344   : > { %v453_v54 = vpop.xlane.xlu1 %452 }
 0x345   : > { %v457_v55 = vmul.f32 0.03125, %v453_v54 }
 0x347   : > { %v459_v56 = vsub.f32 %v441_v50, %v457_v55  ;;  %v7404_v55 = vld [vmem:[%s10456_s5 + $0x8] ss:$0 sm:$0xff] }
 0x348   : > { %v456_v57 = vpop.xlane.xlu1 %455 }
 0x349   : > { %v458_v58 = vmul.f32 0.03125, %v456_v57  ;;  %v461_v59 = vmul.f32 %v459_v56, %v459_v56 }
 0x34b   : > { %v460_v60 = vsub.f32 %v446_v51, %v458_v58  ;;  %v463_v61 = vsel %vm313_vm0, %v461_v59, 0.0 }
 0x34c   : > { %464 = vadd.xlane.f32.xlu1 %v463_v61 }
 0x34d   : > { %v462_v62 = vmul.f32 %v460_v60, %v460_v60 }
 0x34f   : > { %v466_v63 = vsel %vm313_vm0, %v462_v62, 0.0 }
 0x350   : > { %467 = vadd.xlane.f32.xlu1 %v466_v63 }
 0x3d5   : > { %v465_v4 = vpop.xlane.xlu1 %464 }
 0x3d6   : > { %v469_v5 = vmul.f32 0.03125, %v465_v4 }
 0x3d8   : > { %v471_v6 = vadd.f32 1e-05, %v469_v5 }
 0x3d9   : > { %v468_v7 = vpop.xlane.xlu1 %467 }
 0x3da   : > { %8354 = vrsqrt.f32 %v471_v6  ;;  %v470_v8 = vmul.f32 0.03125, %v468_v7 }
 0x3dc   : > { %v472_v9 = vadd.f32 1e-05, %v470_v8 }
 0x3de   : > { %8356 = vrsqrt.f32 %v472_v9 }
 0x3e7   : > { %v8355_v10 = vpop.eup %8354 }
 0x3e8   : > { %v475_v12 = vmul.f32 %v8355_v10, %v459_v56 }
 0x3ea   : > { %v481_v14 = vmul.f32 %v7398_v11, %v475_v12 }
 0x3eb   : > { %v8357_v15 = vpop.eup %8356 }
 0x3ec   : > { %v476_v16 = vmul.f32 %v8357_v15, %v460_v60  ;;  %v487_v17 = vadd.f32 %v7399_v13, %v481_v14 }
 0x3ee   : > { %v482_v18 = vmul.f32 %v7398_v11, %v476_v16  ;;  %vm489_vm3 = vcmp.ge.f32.partialorder %v487_v17, 0.0  ;;  %v491_v19 = vmul.f32 0.01, %v487_v17 }
 0x3f0   : > { %v488_v20 = vadd.f32 %v7399_v13, %v482_v18  ;;  %v493_v21 = vsel %vm489_vm3, %v487_v17, %v491_v19  ;;  %vm5727_vm3 = vcmask 64512  }
 0x3f1   : > { %7796 = vmatprep.mubr.msk.f32.mxu1 %vm313_vm0, %v493_v21 }
 0x3f2   : > { %vm490_vm4 = vcmp.ge.f32.partialorder %v488_v20, 0.0  ;;  %v492_v22 = vmul.f32 0.01, %v488_v20 }
 0x3f4   : > { %v494_v23 = vsel %vm490_vm4, %v488_v20, %v492_v22  ;;  %vm7132_vm4 = vcmask 97280  }
 0x3f5   : > { %7797 = vmatmul.mubr.msk.f32.vlgmr.msra.gmra.mxu1 %vm313_vm0, %v494_v23 }
 0x4b5   : > { %v7798_v24 = vpop.f32.mrf.mxu1 }
 0x4b6   : > { %v583_v28 = vadd.f32 %v7798_v24, %v7400_v25  ;;  %v9065_v24 = vld [vmem:[#allocation6 + $0x38] sm:$0xff] }
 0x4b7   : > { %v577_v26 = vpop.f32.mrf.mxu1 }
 0x4b8   : > { %v578_v27 = vadd.f32 %v7400_v25, %v577_v26  ;;  %v591_v30 = vsel %vm313_vm0, %v583_v28, 0.0  ;;  %v8848_v25 = vmov 0.0   ;;  %v9068_v26 = vld [vmem:[#allocation6 + $0x30] sm:$0xff] }
 0x4b9   : > { %7810 = vmatprep.subr.mxu1 %v8848_v25  ;;  %7818 = vmatprep.mubr.msk.f32.mxu1 %vm8849_vm7, %v8848_v25 }
 0x4ba   : > { %v588_v29 = vsel %vm313_vm0, %v578_v27, 0.0  ;;  %7811 = vmatpush3.msra.mxu1 %v9065_v24  ;;  %7821 = vmatprep.subr.mxu0 %v8848_v25 }
 0x4bb   : > { %589 = vadd.xlane.f32.xlu1 %v588_v29  ;;  %7812 = vmatprep.subr.mxu1 %v8848_v25  ;;  %v9081_v29 = vld [vmem:[#allocation6 + $0x20] sm:$0xff] }
 0x4bc   : > { %7813 = vmatpush3.msra.mxu1 %v9068_v26 }
 0x4bd   : > { %7814 = vmatprep.subr.mxu1 %v8848_v25 }
 0x4bf   : > { %592 = vadd.xlane.f32.xlu1 %v591_v30 }
 0x544   : > { %v590_v31 = vpop.xlane.xlu1 %589 }
 0x545   : > { %v594_v32 = vmul.f32 0.03125, %v590_v31 }
 0x547   : > { %v596_v33 = vsub.f32 %v578_v27, %v594_v32  ;;  %v9075_v27 = vld [vmem:[#allocation6 + $0x28] sm:$0xff] }
 0x548   : > { %v593_v34 = vpop.xlane.xlu1 %592  ;;  %7815 = vmatpush3.msra.mxu1 %v9075_v27 }
 0x549   : > { %v595_v35 = vmul.f32 0.03125, %v593_v34  ;;  %v598_v36 = vmul.f32 %v596_v33, %v596_v33  ;;  %7816 = vmatprep.subr.mxu1 %v8848_v25 }
 0x54a   : > { %7817 = vmatpush3.msra.mxu1 %v9081_v29 }
 0x54b   : > { %v597_v37 = vsub.f32 %v583_v28, %v595_v35  ;;  %v600_v38 = vsel %vm313_vm0, %v598_v36, 0.0  ;;  %7832 = vmatprep.subr.mxu1 %v8848_v25 }
 0x54c   : > { %601 = vadd.xlane.f32.xlu1 %v600_v38 }
 0x54d   : > { %v599_v39 = vmul.f32 %v597_v37, %v597_v37 }
 0x54f   : > { %v603_v40 = vsel %vm313_vm0, %v599_v39, 0.0 }
 0x550   : > { %604 = vadd.xlane.f32.xlu0 %v603_v40 }
 0x55d   : > { %747 = vrot.lane.b32.xlu1 %v9038_v45, %s8847_s16 }
 0x5d5   : > { %v602_v46 = vpop.xlane.xlu1 %601 }
 0x5d6   : > { %v606_v47 = vmul.f32 0.03125, %v602_v46 }
 0x5d8   : > { %v608_v48 = vadd.f32 1e-05, %v606_v47 }
 0x5d9   : > { %v605_v49 = vpop.xlane.xlu0 %604  ;;  %v748_v15 = vpop.permute.xlu1 %747 }
 0x5da   : > { %8358 = vrsqrt.f32 %v608_v48  ;;  %v607_v50 = vmul.f32 0.03125, %v605_v49 }
 0x5dc   : > { %v609_v51 = vadd.f32 1e-05, %v607_v50 }
 0x5de   : > { %8360 = vrsqrt.f32 %v609_v51 }
 0x5e7   : > { %v8359_v52 = vpop.eup %8358 }
 0x5e8   : > { %v612_v54 = vmul.f32 %v8359_v52, %v596_v33 }
 0x5ea   : > { %v618_v56 = vmul.f32 %v7403_v53, %v612_v54 }
 0x5eb   : > { %v8361_v57 = vpop.eup %8360 }
 0x5ec   : > { %v613_v58 = vmul.f32 %v8361_v57, %v597_v37  ;;  %v624_v59 = vadd.f32 %v7404_v55, %v618_v56 }
 0x5ee   : > { %v619_v60 = vmul.f32 %v7403_v53, %v613_v58  ;;  %vm626_vm5 = vcmp.ge.f32.partialorder %v624_v59, 0.0  ;;  %v628_v61 = vmul.f32 0.01, %v624_v59 }
 0x5f0   : > { %v625_v62 = vadd.f32 %v7404_v55, %v619_v60  ;;  %v630_v63 = vsel %vm626_vm5, %v624_v59, %v628_v61  ;;  %vm7135_vm5 = vcmask 130048  }
 0x5f1   : > { %7807 = vmatprep.mubr.msk.f32.mxu0 %vm313_vm0, %v630_v63 }
 0x5f2   : > { %vm627_vm6 = vcmp.ge.f32.partialorder %v625_v62, 0.0  ;;  %v629_v0 = vmul.f32 0.01, %v625_v62 }
 0x5f4   : > { %v631_v1 = vsel %vm627_vm6, %v625_v62, %v629_v0  ;;  %vm7138_vm6 = vcmask 162816  }
 0x5f5   : > { %7808 = vmatmul.mubr.msk.f32.vlgmr.msra.gmra.mxu0 %vm313_vm0, %v631_v1 }
 0x5f6   : > { %7822 = vmatpush3.msra.mxu0 %v9065_v24  ;;  %7829 = vmatprep.mubr.msk.f32.mxu0 %vm8849_vm7, %v8848_v25 }
 0x5f7   : > { %7823 = vmatprep.subr.mxu0 %v8848_v25 }
 0x5f8   : > { %7824 = vmatpush3.msra.mxu0 %v9068_v26 }
 0x5f9   : > { %7825 = vmatprep.subr.mxu0 %v8848_v25 }
 0x5fa   : > { %7826 = vmatpush3.msra.mxu0 %v9075_v27 }
 0x5fb   : > { %7827 = vmatprep.subr.mxu0 %v8848_v25 }
 0x5fc   : > { %7828 = vmatpush3.msra.mxu0 %v9081_v29 }
 0x5fd   : > { %7843 = vmatprep.subr.mxu0 %v8848_v25 }
 0x6b5   : > { %v7809_v3 = vpop.f32.mrf.mxu0 }
 0x6b6   : > { %v9053_v4 = vadd.f32 %v7809_v3, %v7405_v2 }
 0x6b7   : > { %v719_v5 = vpop.f32.mrf.mxu0 }
 0x6b8   : > { %v9055_v6 = vadd.f32 %v7405_v2, %v719_v5  ;;  %v733_v7 = vadd.f32 %v9038_v45, %v9053_v4 }
 0x6ba   : > { %v732_v8 = vadd.f32 %v9038_v45, %v9055_v6  ;;  %v7410_v9 = vmul.f32 -1.442695, %v733_v7 }
 0x6bc   : > { %v7409_v10 = vmul.f32 -1.442695, %v732_v8  ;;  %8362 = vpow2.f32 %v7410_v9 }
 0x6be   : > { %8364 = vpow2.f32 %v7409_v10 }
 0x6c9   : > { %v8363_v11 = vpop.eup %8362 }
 0x6ca   : > { %v741_v12 = vadd.f32 1.0, %v8363_v11 }
 0x6cb   : > { %v8365_v13 = vpop.eup %8364 }
 0x6cc   : > { %v740_v14 = vadd.f32 1.0, %v8365_v13  ;;  %8366 = vrcp.f32 %v741_v12 }
 0x6ce   : > { %8368 = vrcp.f32 %v740_v14 }
 0x6d9   : > { %v8367_v16 = vpop.eup %8366 }
 0x6da   : > { %v751_v17 = vmul.f32 %v8367_v16, %v748_v15  ;;  %v765_v31 = vsub.f32 1.0, %v8367_v16  ;;  %v777_v33 = vmul.f32 0.0, %v8367_v16 }
 0x6db   : > { %v8369_v18 = vpop.eup %8368 }
 0x6dc   : > { %v750_v19 = vmul.f32 %v8369_v18, %v748_v15  ;;  %756 = vrot.lane.b32.xlu0 %v751_v17, %s8847_s16  ;;  %v764_v35 = vsub.f32 1.0, %v8369_v18  ;;  %v776_v38 = vmul.f32 0.0, %v8369_v18 }
 0x6de   : > { %754 = vrot.lane.b32.xlu1 %v750_v19, %s8847_s16 }
 0x74e   : > { %v757_v20 = vpop.permute.xlu0 %756 }
 0x74f   : > { %v761_v21 = vadd.f32 %v757_v20, %v9053_v4 }
 0x750   : > { %v755_v22 = vpop.permute.xlu1 %754 }
 0x751   : > { %8370 = vtanh.f32 %v761_v21  ;;  %v760_v23 = vadd.f32 %v755_v22, %v9055_v6 }
 0x753   : > { %8372 = vtanh.f32 %v760_v23 }
 0x75e   : > { %v8371_v28 = vpop.eup %8370 }
 0x75f   : > { %770 = vrot.lane.b32.xlu1 %v8371_v28, %s8850_s29 }
 0x760   : > { %v8373_v30 = vpop.eup %8372 }
 0x761   : > { %768 = vrot.lane.b32.xlu0 %v8373_v30, %s8850_s29 }
 0x7d1   : > { %v771_v32 = vpop.permute.xlu1 %770 }
 0x7d2   : > { %v775_v34 = vmul.f32 %v771_v32, %v765_v31 }
 0x7d3   : > { %v769_v36 = vpop.permute.xlu0 %768 }
 0x7d4   : > { %v9097_v37 = vadd.f32 %v777_v33, %v775_v34  ;;  %v774_v39 = vmul.f32 %v769_v36, %v764_v35 }
 0x7d6   : > { %v791_v40 = vrot.slane %v9097_v37, 7  ;;  %v9100_v41 = vadd.f32 %v776_v38, %v774_v39 }
 0x7d8   : > { %v793_v42 = vsel %vm792_vm8, %v791_v40, %v9100_v41  ;;  %v918_v10 = vrot.slane %v9100_v41, 7 }
 0x7d9   : > { %794 = vrot.lane.b32.xlu1 %v793_v42, %s8850_s29 }
 0x84b   : > { %v795_v43 = vpop.permute.xlu1 %794 }
 0x84c   : > { %7819 = vmatmul.mubr.msk.f32.vlgmr.msra.gmra.mxu1 %vm313_vm0, %v795_v43 }
 0x84d   : > { %7833 = vmatpush3.msra.mxu1 %v9065_v24  ;;  %7840 = vmatprep.mubr.msk.f32.mxu1 %vm8849_vm7, %v8848_v25 }
 0x84e   : > { %7834 = vmatprep.subr.mxu1 %v8848_v25 }
 0x84f   : > { %7835 = vmatpush3.msra.mxu1 %v9068_v26 }
 0x850   : > { %7836 = vmatprep.subr.mxu1 %v8848_v25 }
 0x851   : > { %7837 = vmatpush3.msra.mxu1 %v9075_v27 }
 0x852   : > { %7838 = vmatprep.subr.mxu1 %v8848_v25 }
 0x853   : > { %7839 = vmatpush3.msra.mxu1 %v9081_v29 }
 0x854   : > { %7854 = vmatprep.subr.mxu1 %v8848_v25 }
 0x90c   : > { %v864_v44 = vpop.f32.mrf.mxu1 }
 0x90d   : > { %v865_v46 = vadd.f32 %v9038_v45, %v864_v44 }
 0x90e   : > { %v7820_v47 = vpop.f32.mrf.mxu1 }
 0x90f   : > { %888 = vrot.lane.b32.xlu1 %v865_v46, %s8847_s16  ;;  %v869_v48 = vrot.slane %v865_v46, 7  ;;  %v873_v49 = vadd.f32 %v865_v46, %v9053_v4 }
 0x911   : > { %886 = vrot.lane.b32.xlu0 %v869_v48, %s8847_s16  ;;  %v872_v50 = vadd.f32 %v869_v48, %v9055_v6  ;;  %v7413_v51 = vmul.f32 -1.442695, %v873_v49 }
 0x913   : > { %v7412_v52 = vmul.f32 -1.442695, %v872_v50  ;;  %8374 = vpow2.f32 %v7413_v51 }
 0x915   : > { %8376 = vpow2.f32 %v7412_v52 }
 0x920   : > { %v8375_v53 = vpop.eup %8374 }
 0x921   : > { %v881_v55 = vadd.f32 1.0, %v8375_v53 }
 0x922   : > { %v8377_v54 = vpop.eup %8376 }
 0x923   : > { %v880_v56 = vadd.f32 1.0, %v8377_v54  ;;  %8378 = vrcp.f32 %v881_v55 }
 0x925   : > { %8380 = vrcp.f32 %v880_v56 }
 0x930   : > { %v8379_v57 = vpop.eup %8378 }
 0x931   : > { %v907_v8 = vsub.f32 1.0, %v8379_v57  ;;  %v922_v15 = vmul.f32 %v8379_v57, %v791_v40 }
 0x932   : > { %v8381_v60 = vpop.eup %8380 }
 0x933   : > { %v906_v9 = vsub.f32 1.0, %v8381_v60  ;;  %v921_v13 = vmul.f32 %v8381_v60, %v918_v10 }
 0x981   : > { %v889_v58 = vpop.permute.xlu1 %888 }
 0x982   : > { %v893_v59 = vmul.f32 %v8379_v57, %v889_v58 }
 0x983   : > { %v887_v61 = vpop.permute.xlu0 %886 }
 0x984   : > { %v892_v62 = vmul.f32 %v8381_v60, %v887_v61  ;;  %898 = vrot.lane.b32.xlu1 %v893_v59, %s8847_s16 }
 0x986   : > { %896 = vrot.lane.b32.xlu0 %v892_v62, %s8847_s16 }
 0x9f6   : > { %v899_v63 = vpop.permute.xlu1 %898 }
 0x9f7   : > { %v903_v0 = vadd.f32 %v899_v63, %v9053_v4 }
 0x9f8   : > { %v897_v1 = vpop.permute.xlu0 %896 }
 0x9f9   : > { %8382 = vtanh.f32 %v903_v0  ;;  %v902_v2 = vadd.f32 %v897_v1, %v9055_v6 }
 0x9fb   : > { %8384 = vtanh.f32 %v902_v2 }
 0xa06   : > { %v8383_v3 = vpop.eup %8382 }
 0xa07   : > { %912 = vrot.lane.b32.xlu1 %v8383_v3, %s8850_s29 }
 0xa08   : > { %v8385_v5 = vpop.eup %8384 }
 0xa09   : > { %910 = vrot.lane.b32.xlu0 %v8385_v5, %s8850_s29 }
 0xa79   : > { %v913_v7 = vpop.permute.xlu1 %912 }
 0xa7a   : > { %v917_v12 = vmul.f32 %v913_v7, %v907_v8 }
 0xa7b   : > { %v911_v11 = vpop.permute.xlu0 %910 }
 0xa7c   : > { %v916_v14 = vmul.f32 %v911_v11, %v906_v9  ;;  %v9130_v17 = vadd.f32 %v922_v15, %v917_v12 }
 0xa7e   : > { %v9128_v16 = vadd.f32 %v921_v13, %v916_v14  ;;  %v1064_v55 = vrot.slane %v9130_v17, 7 }
 0xa80   : > { %v936_v18 = vrot.slane %v9128_v16, 1  ;;  %v1063_v58 = vrot.slane %v9128_v16, 7 }
 0xa82   : > { %v937_v19 = vsel %vm792_vm8, %v9130_v17, %v936_v18 }
 0xa83   : > { %938 = vrot.lane.b32.xlu0 %v937_v19, %s8850_s29 }
 0xaf5   : > { %v939_v20 = vpop.permute.xlu0 %938 }
 0xaf6   : > { %7830 = vmatmul.mubr.msk.f32.vlgmr.msra.gmra.mxu0 %vm313_vm0, %v939_v20 }
 0xaf7   : > { %7844 = vmatpush3.msra.mxu0 %v9065_v24  ;;  %7851 = vmatprep.mubr.msk.f32.mxu0 %vm8849_vm7, %v8848_v25 }
 0xaf8   : > { %7845 = vmatprep.subr.mxu0 %v8848_v25 }
 0xaf9   : > { %7846 = vmatpush3.msra.mxu0 %v9068_v26 }
 0xafa   : > { %7847 = vmatprep.subr.mxu0 %v8848_v25 }
 0xafb   : > { %7848 = vmatpush3.msra.mxu0 %v9075_v27 }
 0xafc   : > { %7849 = vmatprep.subr.mxu0 %v8848_v25 }
 0xafd   : > { %7850 = vmatpush3.msra.mxu0 %v9081_v29 }
 0xafe   : > { %7865 = vmatprep.subr.mxu0 %v8848_v25 }
 0xbb6   : > { %v1008_v21 = vpop.f32.mrf.mxu0 }
 0xbb7   : > { %v1009_v22 = vadd.f32 %v9038_v45, %v1008_v21 }
 0xbb8   : > { %v7831_v23 = vpop.f32.mrf.mxu0 }
 0xbb9   : > { %v1013_v28 = vrot.slane %v1009_v22, 6  ;;  %v1014_v30 = vrot.slane %v1009_v22, 7 }
 0xbbb   : > { %1033 = vrot.lane.b32.xlu0 %v1014_v30, %s8847_s16  ;;  %1031 = vrot.lane.b32.xlu1 %v1013_v28, %s8847_s16  ;;  %v1017_v31 = vadd.f32 %v1013_v28, %v9055_v6  ;;  %v1018_v32 = vadd.f32 %v1014_v30, %v9053_v4 }
 0xbbd   : > { %v7415_v33 = vmul.f32 -1.442695, %v1017_v31  ;;  %v7416_v34 = vmul.f32 -1.442695, %v1018_v32 }
 0xbbf   : > { %8386 = vpow2.f32 %v7415_v33 }
 0xbc0   : > { %8388 = vpow2.f32 %v7416_v34 }
 0xbcc   : > { %v8387_v35 = vpop.eup %8386 }
 0xbcd   : > { %v8389_v36 = vpop.eup %8388  ;;  %v1025_v38 = vadd.f32 1.0, %v8387_v35 }
 0xbce   : > { %v1026_v39 = vadd.f32 1.0, %v8389_v36 }
 0xbcf   : > { %8390 = vrcp.f32 %v1025_v38 }
 0xbd0   : > { %8392 = vrcp.f32 %v1026_v39 }
 0xbdc   : > { %v8391_v40 = vpop.eup %8390 }
 0xbdd   : > { %v8393_v42 = vpop.eup %8392  ;;  %v1051_v57 = vsub.f32 1.0, %v8391_v40  ;;  %v1067_v62 = vmul.f32 %v8391_v40, %v1063_v58 }
 0xbde   : > { %v1052_v54 = vsub.f32 1.0, %v8393_v42  ;;  %v1068_v59 = vmul.f32 %v8393_v42, %v1064_v55 }
 0xc2d   : > { %v1034_v43 = vpop.permute.xlu0 %1033  ;;  %v1032_v44 = vpop.permute.xlu1 %1031 }
 0xc2e   : > { %v1038_v46 = vmul.f32 %v8393_v42, %v1034_v43  ;;  %v1037_v47 = vmul.f32 %v8391_v40, %v1032_v44 }
 0xc30   : > { %1043 = vrot.lane.b32.xlu0 %v1038_v46, %s8847_s16  ;;  %1041 = vrot.lane.b32.xlu1 %v1037_v47, %s8847_s16 }
 0xca2   : > { %v1044_v48 = vpop.permute.xlu0 %1043  ;;  %v1042_v49 = vpop.permute.xlu1 %1041 }
 0xca3   : > { %v1048_v50 = vadd.f32 %v1044_v48, %v9053_v4  ;;  %v1047_v51 = vadd.f32 %v1042_v49, %v9055_v6 }
 0xca5   : > { %8394 = vtanh.f32 %v1048_v50 }
 0xca6   : > { %8396 = vtanh.f32 %v1047_v51 }
 0xcb2   : > { %v8395_v52 = vpop.eup %8394 }
 0xcb3   : > { %v8397_v53 = vpop.eup %8396  ;;  %1057 = vrot.lane.b32.xlu0 %v8395_v52, %s8850_s29 }
 0xcb4   : > { %1055 = vrot.lane.b32.xlu1 %v8397_v53, %s8850_s29 }
 0xd25   : > { %v1058_v56 = vpop.permute.xlu0 %1057 }
 0xd26   : > { %v1062_v60 = vmul.f32 %v1058_v56, %v1052_v54  ;;  %v1056_v61 = vpop.permute.xlu1 %1055 }
 0xd27   : > { %v1061_v63 = vmul.f32 %v1056_v61, %v1051_v57 }
 0xd28   : > { %v9160_v0 = vadd.f32 %v1068_v59, %v1062_v60 }
 0xd29   : > { %v9162_v1 = vadd.f32 %v1067_v62, %v1061_v63 }
 0xd2a   : > { %v1083_v2 = vrot.slane %v9160_v0, 1  ;;  %v1211_v43 = vrot.slane %v9160_v0, 7 }
 0xd2b   : > { %v1082_v3 = vrot.slane %v9162_v1, 2  ;;  %v1210_v47 = vrot.slane %v9162_v1, 7 }
 0xd2d   : > { %v1084_v5 = vsel %vm792_vm8, %v1083_v2, %v1082_v3 }
 0xd2e   : > { %1085 = vrot.lane.b32.xlu1 %v1084_v5, %s8850_s29 }
 0xda0   : > { %v1086_v7 = vpop.permute.xlu1 %1085 }
 0xda1   : > { %7841 = vmatmul.mubr.msk.f32.vlgmr.msra.gmra.mxu1 %vm313_vm0, %v1086_v7 }
 0xda2   : > { %7855 = vmatpush3.msra.mxu1 %v9065_v24  ;;  %7862 = vmatprep.mubr.msk.f32.mxu1 %vm8849_vm7, %v8848_v25 }
 0xda3   : > { %7856 = vmatprep.subr.mxu1 %v8848_v25 }
 0xda4   : > { %7857 = vmatpush3.msra.mxu1 %v9068_v26 }
 0xda5   : > { %7858 = vmatprep.subr.mxu1 %v8848_v25 }
 0xda6   : > { %7859 = vmatpush3.msra.mxu1 %v9075_v27 }
 0xda7   : > { %7860 = vmatprep.subr.mxu1 %v8848_v25 }
 0xda8   : > { %7861 = vmatpush3.msra.mxu1 %v9081_v29 }
 0xda9   : > { %7876 = vmatprep.subr.mxu1 %v8848_v25 }
 0xe61   : > { %v1155_v8 = vpop.f32.mrf.mxu1 }
 0xe62   : > { %v1156_v9 = vadd.f32 %v9038_v45, %v1155_v8 }
 0xe63   : > { %v7842_v10 = vpop.f32.mrf.mxu1 }
 0xe64   : > { %v1160_v11 = vrot.slane %v1156_v9, 5  ;;  %v1161_v12 = vrot.slane %v1156_v9, 6 }
 0xe66   : > { %1180 = vrot.lane.b32.xlu1 %v1161_v12, %s8847_s16  ;;  %1178 = vrot.lane.b32.xlu0 %v1160_v11, %s8847_s16  ;;  %v1164_v13 = vadd.f32 %v1160_v11, %v9055_v6  ;;  %v1165_v14 = vadd.f32 %v1161_v12, %v9053_v4 }
 0xe68   : > { %v7418_v15 = vmul.f32 -1.442695, %v1164_v13  ;;  %v7419_v18 = vmul.f32 -1.442695, %v1165_v14 }
 0xe6a   : > { %8398 = vpow2.f32 %v7418_v15 }
 0xe6b   : > { %8400 = vpow2.f32 %v7419_v18 }
 0xe77   : > { %v8399_v19 = vpop.eup %8398 }
 0xe78   : > { %v8401_v20 = vpop.eup %8400  ;;  %v1172_v21 = vadd.f32 1.0, %v8399_v19 }
 0xe79   : > { %v1173_v22 = vadd.f32 1.0, %v8401_v20 }
 0xe7a   : > { %8402 = vrcp.f32 %v1172_v21 }
 0xe7b   : > { %8404 = vrcp.f32 %v1173_v22 }
 0xe87   : > { %v8403_v23 = vpop.eup %8402 }
 0xe88   : > { %v8405_v28 = vpop.eup %8404  ;;  %v1198_v46 = vsub.f32 1.0, %v8403_v23  ;;  %v1214_v51 = vmul.f32 %v8403_v23, %v1210_v47 }
 0xe89   : > { %v1199_v42 = vsub.f32 1.0, %v8405_v28  ;;  %v1215_v48 = vmul.f32 %v8405_v28, %v1211_v43 }
 0xed8   : > { %v1181_v30 = vpop.permute.xlu1 %1180  ;;  %v1179_v31 = vpop.permute.xlu0 %1178 }
 0xed9   : > { %v1185_v32 = vmul.f32 %v8405_v28, %v1181_v30  ;;  %v1184_v33 = vmul.f32 %v8403_v23, %v1179_v31 }
 0xedb   : > { %1190 = vrot.lane.b32.xlu1 %v1185_v32, %s8847_s16  ;;  %1188 = vrot.lane.b32.xlu0 %v1184_v33, %s8847_s16 }
 0xf4d   : > { %v1191_v34 = vpop.permute.xlu1 %1190  ;;  %v1189_v35 = vpop.permute.xlu0 %1188 }
 0xf4e   : > { %v1195_v36 = vadd.f32 %v1191_v34, %v9053_v4  ;;  %v1194_v38 = vadd.f32 %v1189_v35, %v9055_v6 }
 0xf50   : > { %8406 = vtanh.f32 %v1195_v36 }
 0xf51   : > { %8408 = vtanh.f32 %v1194_v38 }
 0xf5d   : > { %v8407_v39 = vpop.eup %8406 }
 0xf5e   : > { %v8409_v40 = vpop.eup %8408  ;;  %1204 = vrot.lane.b32.xlu1 %v8407_v39, %s8850_s29 }
 0xf5f   : > { %1202 = vrot.lane.b32.xlu0 %v8409_v40, %s8850_s29 }
 0xfd0   : > { %v1205_v44 = vpop.permute.xlu1 %1204 }
 0xfd1   : > { %v1209_v49 = vmul.f32 %v1205_v44, %v1199_v42  ;;  %v1203_v50 = vpop.permute.xlu0 %1202 }
 0xfd2   : > { %v1208_v52 = vmul.f32 %v1203_v50, %v1198_v46 }
 0xfd3   : > { %v9192_v53 = vadd.f32 %v1215_v48, %v1209_v49 }
 0xfd4   : > { %v9194_v54 = vadd.f32 %v1214_v51, %v1208_v52 }
 0xfd5   : > { %v1230_v55 = vrot.slane %v9192_v53, 2  ;;  %v1358_v32 = vrot.slane %v9192_v53, 7 }
 0xfd6   : > { %v1229_v56 = vrot.slane %v9194_v54, 3  ;;  %v1357_v35 = vrot.slane %v9194_v54, 7 }
 0xfd8   : > { %v1231_v57 = vsel %vm792_vm8, %v1230_v55, %v1229_v56 }
 0xfd9   : > { %1232 = vrot.lane.b32.xlu0 %v1231_v57, %s8850_s29 }
0x104b   : > { %v1233_v58 = vpop.permute.xlu0 %1232 }
0x104c   : > { %7852 = vmatmul.mubr.msk.f32.vlgmr.msra.gmra.mxu0 %vm313_vm0, %v1233_v58 }
0x104d   : > { %7866 = vmatpush3.msra.mxu0 %v9065_v24  ;;  %7873 = vmatprep.mubr.msk.f32.mxu0 %vm8849_vm7, %v8848_v25 }
0x104e   : > { %7867 = vmatprep.subr.mxu0 %v8848_v25 }
0x104f   : > { %7868 = vmatpush3.msra.mxu0 %v9068_v26 }
0x1050   : > { %7869 = vmatprep.subr.mxu0 %v8848_v25 }
0x1051   : > { %7870 = vmatpush3.msra.mxu0 %v9075_v27 }
0x1052   : > { %7871 = vmatprep.subr.mxu0 %v8848_v25 }
0x1053   : > { %7872 = vmatpush3.msra.mxu0 %v9081_v29 }
0x110c   : > { %v1302_v59 = vpop.f32.mrf.mxu0 }
0x110d   : > { %v1303_v60 = vadd.f32 %v9038_v45, %v1302_v59 }
0x110e   : > { %v7853_v61 = vpop.f32.mrf.mxu0 }
0x110f   : > { %v1307_v62 = vrot.slane %v1303_v60, 4  ;;  %v1308_v63 = vrot.slane %v1303_v60, 5 }
0x1111   : > { %1327 = vrot.lane.b32.xlu0 %v1308_v63, %s8847_s16  ;;  %1325 = vrot.lane.b32.xlu1 %v1307_v62, %s8847_s16  ;;  %v1311_v2 = vadd.f32 %v1307_v62, %v9055_v6  ;;  %v1312_v3 = vadd.f32 %v1308_v63, %v9053_v4 }
0x1113   : > { %v7421_v5 = vmul.f32 -1.442695, %v1311_v2  ;;  %v7422_v7 = vmul.f32 -1.442695, %v1312_v3 }
0x1115   : > { %8410 = vpow2.f32 %v7421_v5 }
0x1116   : > { %8412 = vpow2.f32 %v7422_v7 }
0x1122   : > { %v8411_v8 = vpop.eup %8410 }
0x1123   : > { %v8413_v9 = vpop.eup %8412  ;;  %v1319_v10 = vadd.f32 1.0, %v8411_v8 }
0x1124   : > { %v1320_v11 = vadd.f32 1.0, %v8413_v9 }
0x1125   : > { %8414 = vrcp.f32 %v1319_v10 }
0x1126   : > { %8416 = vrcp.f32 %v1320_v11 }
0x1132   : > { %v8415_v12 = vpop.eup %8414 }
0x1133   : > { %v8417_v13 = vpop.eup %8416  ;;  %v1345_v34 = vsub.f32 1.0, %v8415_v12  ;;  %v1361_v40 = vmul.f32 %v8415_v12, %v1357_v35 }
0x1134   : > { %v1346_v31 = vsub.f32 1.0, %v8417_v13  ;;  %v1362_v36 = vmul.f32 %v8417_v13, %v1358_v32 }
0x1183   : > { %v1328_v14 = vpop.permute.xlu0 %1327  ;;  %v1326_v15 = vpop.permute.xlu1 %1325 }
0x1184   : > { %v1332_v18 = vmul.f32 %v8417_v13, %v1328_v14  ;;  %v1331_v19 = vmul.f32 %v8415_v12, %v1326_v15 }
0x1186   : > { %1337 = vrot.lane.b32.xlu0 %v1332_v18, %s8847_s16  ;;  %1335 = vrot.lane.b32.xlu1 %v1331_v19, %s8847_s16 }
0x11f8   : > { %v1338_v20 = vpop.permute.xlu0 %1337  ;;  %v1336_v21 = vpop.permute.xlu1 %1335 }
0x11f9   : > { %v1342_v22 = vadd.f32 %v1338_v20, %v9053_v4  ;;  %v1341_v23 = vadd.f32 %v1336_v21, %v9055_v6 }
0x11fb   : > { %8418 = vtanh.f32 %v1342_v22 }
0x11fc   : > { %8420 = vtanh.f32 %v1341_v23 }
0x1208   : > { %v8419_v28 = vpop.eup %8418 }
0x1209   : > { %v8421_v30 = vpop.eup %8420  ;;  %1351 = vrot.lane.b32.xlu0 %v8419_v28, %s8850_s29 }
0x120a   : > { %1349 = vrot.lane.b32.xlu1 %v8421_v30, %s8850_s29 }
0x127b   : > { %v1352_v33 = vpop.permute.xlu0 %1351 }
0x127c   : > { %v1356_v38 = vmul.f32 %v1352_v33, %v1346_v31  ;;  %v1350_v39 = vpop.permute.xlu1 %1349 }
0x127d   : > { %v1355_v42 = vmul.f32 %v1350_v39, %v1345_v34 }
0x127e   : > { %v9223_v43 = vadd.f32 %v1362_v36, %v1356_v38 }
0x127f   : > { %v9225_v44 = vadd.f32 %v1361_v40, %v1355_v42 }
0x1280   : > { %v1377_v46 = vrot.slane %v9223_v43, 3  ;;  %v1505_v14 = vrot.slane %v9223_v43, 7 }
0x1281   : > { %v1376_v47 = vrot.slane %v9225_v44, 4  ;;  %v1504_v19 = vrot.slane %v9225_v44, 7 }
0x1283   : > { %v1378_v48 = vsel %vm792_vm8, %v1377_v46, %v1376_v47 }
0x1284   : > { %1379 = vrot.lane.b32.xlu1 %v1378_v48, %s8850_s29 }
0x12f6   : > { %v1380_v49 = vpop.permute.xlu1 %1379 }
0x12f7   : > { %7863 = vmatmul.mubr.msk.f32.vlgmr.msra.gmra.mxu1 %vm313_vm0, %v1380_v49 }
0x12f8   : > { %7877 = vmatpush3.msra.mxu1 %v9065_v24  ;;  %7884 = vmatprep.mubr.msk.f32.mxu1 %vm8849_vm7, %v8848_v25 }
0x12f9   : > { %7878 = vmatprep.subr.mxu1 %v8848_v25 }
0x12fa   : > { %7879 = vmatpush3.msra.mxu1 %v9068_v26 }
0x12fb   : > { %7880 = vmatprep.subr.mxu1 %v8848_v25 }
0x12fc   : > { %7881 = vmatpush3.msra.mxu1 %v9075_v27 }
0x12fd   : > { %7882 = vmatprep.subr.mxu1 %v8848_v25 }
0x12fe   : > { %7883 = vmatpush3.msra.mxu1 %v9081_v29 }
0x12ff   : > { %7898 = vmatprep.subr.mxu1 %v8848_v25 }
0x13b7   : > { %v1449_v50 = vpop.f32.mrf.mxu1 }
0x13b8   : > { %v1450_v24 = vadd.f32 %v9038_v45, %v1449_v50 }
0x13b9   : > { %v7864_v51 = vpop.f32.mrf.mxu1 }
0x13ba   : > { %v1454_v52 = vrot.slane %v1450_v24, 3  ;;  %v1455_v55 = vrot.slane %v1450_v24, 4 }
0x13bc   : > { %1474 = vrot.lane.b32.xlu1 %v1455_v55, %s8847_s16  ;;  %1472 = vrot.lane.b32.xlu0 %v1454_v52, %s8847_s16  ;;  %v1458_v26 = vadd.f32 %v1454_v52, %v9055_v6  ;;  %v1459_v27 = vadd.f32 %v1455_v55, %v9053_v4 }
0x13be   : > { %v7424_v56 = vmul.f32 -1.442695, %v1458_v26  ;;  %v7425_v57 = vmul.f32 -1.442695, %v1459_v27 }
0x13c0   : > { %8422 = vpow2.f32 %v7424_v56 }
0x13c1   : > { %8424 = vpow2.f32 %v7425_v57 }
0x13cd   : > { %v8423_v29 = vpop.eup %8422 }
0x13ce   : > { %v8425_v58 = vpop.eup %8424  ;;  %v1466_v59 = vadd.f32 1.0, %v8423_v29 }
0x13cf   : > { %v1467_v60 = vadd.f32 1.0, %v8425_v58 }
0x13d0   : > { %8426 = vrcp.f32 %v1466_v59 }
0x13d1   : > { %8428 = vrcp.f32 %v1467_v60 }
0x13dd   : > { %v8427_v61 = vpop.eup %8426 }
0x13de   : > { %v8429_v62 = vpop.eup %8428  ;;  %v1492_v18 = vsub.f32 1.0, %v8427_v61  ;;  %v1508_v23 = vmul.f32 %v8427_v61, %v1504_v19 }
0x13df   : > { %v1493_v13 = vsub.f32 1.0, %v8429_v62  ;;  %v1509_v20 = vmul.f32 %v8429_v62, %v1505_v14 }
0x142e   : > { %v1475_v63 = vpop.permute.xlu1 %1474  ;;  %v1473_v2 = vpop.permute.xlu0 %1472 }
0x142f   : > { %v1479_v3 = vmul.f32 %v8429_v62, %v1475_v63  ;;  %v1478_v5 = vmul.f32 %v8427_v61, %v1473_v2 }
0x1431   : > { %1484 = vrot.lane.b32.xlu1 %v1479_v3, %s8847_s16  ;;  %1482 = vrot.lane.b32.xlu0 %v1478_v5, %s8847_s16 }
0x14a3   : > { %v1485_v7 = vpop.permute.xlu1 %1484  ;;  %v1483_v8 = vpop.permute.xlu0 %1482 }
0x14a4   : > { %v1489_v9 = vadd.f32 %v1485_v7, %v9053_v4  ;;  %v1488_v10 = vadd.f32 %v1483_v8, %v9055_v6 }
0x14a6   : > { %8430 = vtanh.f32 %v1489_v9 }
0x14a7   : > { %8432 = vtanh.f32 %v1488_v10 }
0x14b3   : > { %v8431_v11 = vpop.eup %8430 }
0x14b4   : > { %v8433_v12 = vpop.eup %8432  ;;  %1498 = vrot.lane.b32.xlu1 %v8431_v11, %s8850_s29 }
0x14b5   : > { %1496 = vrot.lane.b32.xlu0 %v8433_v12, %s8850_s29 }
0x1526   : > { %v1499_v15 = vpop.permute.xlu1 %1498 }
0x1527   : > { %v1503_v21 = vmul.f32 %v1499_v15, %v1493_v13  ;;  %v1497_v22 = vpop.permute.xlu0 %1496 }
0x1528   : > { %v1502_v28 = vmul.f32 %v1497_v22, %v1492_v18 }
0x1529   : > { %v9255_v30 = vadd.f32 %v1509_v20, %v1503_v21 }
0x152a   : > { %v9257_v31 = vadd.f32 %v1508_v23, %v1502_v28 }
0x152b   : > { %v1524_v32 = vrot.slane %v9255_v30, 4  ;;  %v1652_v3 = vrot.slane %v9255_v30, 7 }
0x152c   : > { %v1523_v33 = vrot.slane %v9257_v31, 5  ;;  %v1651_v8 = vrot.slane %v9257_v31, 7 }
0x152e   : > { %v1525_v34 = vsel %vm792_vm8, %v1524_v32, %v1523_v33 }
0x152f   : > { %1526 = vrot.lane.b32.xlu0 %v1525_v34, %s8850_s29 }
0x15a1   : > { %v1527_v35 = vpop.permute.xlu0 %1526 }
0x15a2   : > { %7874 = vmatmul.mubr.msk.f32.vlgmr.msra.gmra.mxu0 %vm313_vm0, %v1527_v35 }
0x1662   : > { %v1596_v36 = vpop.f32.mrf.mxu0 }
0x1663   : > { %v1597_v38 = vadd.f32 %v9038_v45, %v1596_v36 }
0x1664   : > { %v7875_v39 = vpop.f32.mrf.mxu0 }
0x1665   : > { %v1601_v40 = vrot.slane %v1597_v38, 2  ;;  %v1602_v42 = vrot.slane %v1597_v38, 3 }
0x1667   : > { %1621 = vrot.lane.b32.xlu0 %v1602_v42, %s8847_s16  ;;  %1619 = vrot.lane.b32.xlu1 %v1601_v40, %s8847_s16  ;;  %v1605_v46 = vadd.f32 %v1601_v40, %v9055_v6  ;;  %v1606_v47 = vadd.f32 %v1602_v42, %v9053_v4 }
0x1669   : > { %v7427_v48 = vmul.f32 -1.442695, %v1605_v46  ;;  %v7428_v49 = vmul.f32 -1.442695, %v1606_v47 }
0x166b   : > { %8434 = vpow2.f32 %v7427_v48 }
0x166c   : > { %8436 = vpow2.f32 %v7428_v49 }
0x1678   : > { %v8435_v50 = vpop.eup %8434 }
0x1679   : > { %v8437_v24 = vpop.eup %8436  ;;  %v1613_v51 = vadd.f32 1.0, %v8435_v50 }
0x167a   : > { %v1614_v52 = vadd.f32 1.0, %v8437_v24 }
0x167b   : > { %8438 = vrcp.f32 %v1613_v51 }
0x167c   : > { %8440 = vrcp.f32 %v1614_v52 }
0x1688   : > { %v8439_v55 = vpop.eup %8438 }
0x1689   : > { %v8441_v26 = vpop.eup %8440  ;;  %v1639_v7 = vsub.f32 1.0, %v8439_v55  ;;  %v1655_v12 = vmul.f32 %v8439_v55, %v1651_v8 }
0x168a   : > { %v1640_v2 = vsub.f32 1.0, %v8441_v26  ;;  %v1656_v9 = vmul.f32 %v8441_v26, %v1652_v3 }
0x16d9   : > { %v1622_v27 = vpop.permute.xlu0 %1621  ;;  %v1620_v56 = vpop.permute.xlu1 %1619 }
0x16da   : > { %v1626_v57 = vmul.f32 %v8441_v26, %v1622_v27  ;;  %v1625_v29 = vmul.f32 %v8439_v55, %v1620_v56 }
0x16dc   : > { %1631 = vrot.lane.b32.xlu0 %v1626_v57, %s8847_s16  ;;  %1629 = vrot.lane.b32.xlu1 %v1625_v29, %s8847_s16 }
0x174e   : > { %v1632_v58 = vpop.permute.xlu0 %1631  ;;  %v1630_v59 = vpop.permute.xlu1 %1629 }
0x174f   : > { %v1636_v60 = vadd.f32 %v1632_v58, %v9053_v4  ;;  %v1635_v61 = vadd.f32 %v1630_v59, %v9055_v6  ;;  %v9333_v58 = vld [vmem:[%s10455_s4 + $0x3] ss:$0 sm:$0xff] }
0x1751   : > { %8442 = vtanh.f32 %v1636_v60 }
0x1752   : > { %8444 = vtanh.f32 %v1635_v61 }
0x175e   : > { %v8443_v62 = vpop.eup %8442 }
0x175f   : > { %v8445_v63 = vpop.eup %8444  ;;  %1645 = vrot.lane.b32.xlu0 %v8443_v62, %s8850_s29 }
0x1760   : > { %1643 = vrot.lane.b32.xlu1 %v8445_v63, %s8850_s29 }
0x17d1   : > { %v1646_v5 = vpop.permute.xlu0 %1645 }
0x17d2   : > { %v1650_v10 = vmul.f32 %v1646_v5, %v1640_v2  ;;  %v1644_v11 = vpop.permute.xlu1 %1643 }
0x17d3   : > { %v1649_v13 = vmul.f32 %v1644_v11, %v1639_v7 }
0x17d4   : > { %v9277_v14 = vadd.f32 %v1656_v9, %v1650_v10 }
0x17d5   : > { %v9279_v15 = vadd.f32 %v1655_v12, %v1649_v13 }
0x17d6   : > { %v1671_v18 = vrot.slane %v9277_v14, 5 }
0x17d7   : > { %v1670_v19 = vrot.slane %v9279_v15, 6 }
0x17d9   : > { %v1672_v20 = vsel %vm792_vm8, %v1671_v18, %v1670_v19  ;;  %v7432_v19 = vld [vmem:[%s10455_s4 + $0x2] ss:$0 sm:$0xff] }
0x17da   : > { %1673 = vrot.lane.b32.xlu1 %v1672_v20, %s8850_s29 }
0x184c   : > { %v1674_v21 = vpop.permute.xlu1 %1673 }
0x184d   : > { %7885 = vmatmul.mubr.msk.f32.vlgmr.msra.gmra.mxu1 %vm313_vm0, %v1674_v21 }
0x184e   : > { %7906 = vmatprep.mubr.msk.f32.mxu1 %vm8849_vm7, %v8848_v25 }
0x190d   : > { %v1743_v22 = vpop.f32.mrf.mxu1 }
0x190e   : > { %v1744_v23 = vadd.f32 %v9038_v45, %v1743_v22 }
0x190f   : > { %v7886_v28 = vpop.f32.mrf.mxu1 }
0x1910   : > { %v1748_v32 = vrot.slane %v1744_v23, 1  ;;  %v1749_v33 = vrot.slane %v1744_v23, 2 }
0x1912   : > { %1768 = vrot.lane.b32.xlu1 %v1749_v33, %s8847_s16  ;;  %1766 = vrot.lane.b32.xlu0 %v1748_v32, %s8847_s16  ;;  %v1752_v34 = vadd.f32 %v1748_v32, %v9055_v6  ;;  %v1753_v35 = vadd.f32 %v1749_v33, %v9053_v4 }
0x1914   : > { %v7430_v36 = vmul.f32 -1.442695, %v1752_v34  ;;  %v7431_v38 = vmul.f32 -1.442695, %v1753_v35 }
0x1916   : > { %8446 = vpow2.f32 %v7430_v36 }
0x1917   : > { %8448 = vpow2.f32 %v7431_v38 }
0x1923   : > { %v8447_v39 = vpop.eup %8446 }
0x1924   : > { %v8449_v40 = vpop.eup %8448  ;;  %v1760_v42 = vadd.f32 1.0, %v8447_v39 }
0x1925   : > { %v1761_v46 = vadd.f32 1.0, %v8449_v40 }
0x1926   : > { %8450 = vrcp.f32 %v1760_v42 }
0x1927   : > { %8452 = vrcp.f32 %v1761_v46 }
0x1933   : > { %v8451_v45 = vpop.eup %8450 }
0x1934   : > { %v8453_v47 = vpop.eup %8452 }
0x1984   : > { %v1769_v48 = vpop.permute.xlu1 %1768  ;;  %v1767_v49 = vpop.permute.xlu0 %1766 }
0x1985   : > { %v1773_v50 = vmul.f32 %v8453_v47, %v1769_v48  ;;  %v1772_v24 = vmul.f32 %v8451_v45, %v1767_v49 }
0x1987   : > { %1778 = vrot.lane.b32.xlu1 %v1773_v50, %s8847_s16  ;;  %1776 = vrot.lane.b32.xlu0 %v1772_v24, %s8847_s16 }
0x19f9   : > { %v1779_v51 = vpop.permute.xlu1 %1778  ;;  %v1777_v52 = vpop.permute.xlu0 %1776 }
0x19fa   : > { %v1783_v55 = vadd.f32 %v1779_v51, %v9053_v4  ;;  %v1782_v26 = vadd.f32 %v1777_v52, %v9055_v6  ;;  %v1823_v4 = vld [vmem:[#allocation6 + $0x58] sm:$0xff]  ;;  %v1822_v6 = vld [vmem:[#allocation6 + $0x50] sm:$0xff] }
0x19fb   : > { %7887 = vmatprep.subr.mxu0 %v1823_v4  ;;  %v9374_v51 = vld [vmem:[#allocation6 + $0x78] sm:$0xff]  ;;  %v9376_v52 = vld [vmem:[#allocation6 + $0x70] sm:$0xff] }
0x19fc   : > { %8454 = vtanh.f32 %v1783_v55  ;;  %7888 = vmatpush3.msra.mxu0 %v1823_v4  ;;  %7899 = vmatpush3.msra.mxu1 %v9374_v51  ;;  %v9381_v55 = vld [vmem:[#allocation6 + $0x68] sm:$0xff] }
0x19fd   : > { %8456 = vtanh.f32 %v1782_v26  ;;  %7889 = vmatprep.subr.mxu0 %v1822_v6  ;;  %7900 = vmatprep.subr.mxu1 %v8848_v25  ;;  %v9387_v26 = vld [vmem:[#allocation6 + $0x60] sm:$0xff] }
0x19fe   : > { %7890 = vmatpush3.msra.mxu0 %v1822_v6  ;;  %7901 = vmatpush3.msra.mxu1 %v9376_v52 }
0x19ff   : > { %7902 = vmatprep.subr.mxu1 %v8848_v25 }
0x1a00   : > { %7903 = vmatpush3.msra.mxu1 %v9381_v55 }
0x1a01   : > { %7904 = vmatprep.subr.mxu1 %v8848_v25 }
0x1a02   : > { %7905 = vmatpush3.msra.mxu1 %v9387_v26 }
0x1a03   : > { %7920 = vmatprep.subr.mxu1 %v8848_v25 }
0x1a09   : > { %v8455_v27 = vpop.eup %8454 }
0x1a0a   : > { %v8457_v56 = vpop.eup %8456  ;;  %1792 = vrot.lane.b32.xlu1 %v8455_v27, %s8850_s29 }
0x1a0b   : > { %1790 = vrot.lane.b32.xlu0 %v8457_v56, %s8850_s29 }
0x1a0e   : > { %927 = vrot.lane.b32.xlu1 %v9128_v16, %s8850_s29  ;;  %v1786_v16 = vsub.f32 1.0, %v8451_v45 }
0x1a0f   : > { %782 = vrot.lane.b32.xlu0 %v9100_v41, %s8850_s29 }
0x1a12   : > { %1220 = vrot.lane.b32.xlu1 %v9194_v54, %s8850_s29 }
0x1a13   : > { %1073 = vrot.lane.b32.xlu0 %v9162_v1, %s8850_s29 }
0x1a16   : > { %1514 = vrot.lane.b32.xlu1 %v9257_v31, %s8850_s29 }
0x1a17   : > { %1367 = vrot.lane.b32.xlu0 %v9225_v44, %s8850_s29  ;;  %v1799_v44 = vrot.slane %v9277_v14, 7 }
0x1a19   : > { %v1803_v59 = vmul.f32 %v8453_v47, %v1799_v44 }
0x1a1a   : > { %929 = vrot.lane.b32.xlu1 %v9130_v17, %s8850_s29  ;;  %v1821_v17 = vld [vmem:[#allocation6 + $0x48] sm:$0xff] }
0x1a1b   : > { %1661 = vrot.lane.b32.xlu0 %v9279_v15, %s8850_s29  ;;  %7891 = vmatprep.subr.mxu0 %v1821_v17 }
0x1a1c   : > { %7892 = vmatpush3.msra.mxu0 %v1821_v17 }
0x1a1e   : > { %1222 = vrot.lane.b32.xlu1 %v9192_v53, %s8850_s29 }
0x1a1f   : > { %784 = vrot.lane.b32.xlu0 %v9097_v37, %s8850_s29  ;;  %v1798_v37 = vrot.slane %v9279_v15, 7 }
0x1a21   : > { %v1802_v53 = vmul.f32 %v8451_v45, %v1798_v37 }
0x1a22   : > { %1516 = vrot.lane.b32.xlu1 %v9255_v30, %s8850_s29 }
0x1a23   : > { %1075 = vrot.lane.b32.xlu0 %v9160_v0, %s8850_s29  ;;  %v1787_v0 = vsub.f32 1.0, %v8453_v47 }
0x1a27   : > { %1369 = vrot.lane.b32.xlu0 %v9223_v43, %s8850_s29  ;;  %v1820_v43 = vld [vmem:[#allocation6 + $0x40] sm:$0xff] }
0x1a28   : > { %7893 = vmatprep.subr.mxu0 %v1820_v43 }
0x1a29   : > { %7894 = vmatpush3.msra.mxu0 %v1820_v43 }
0x1a2a   : > { %7909 = vmatprep.subr.mxu0 %v8848_v25 }
0x1a2b   : > { %1663 = vrot.lane.b32.xlu0 %v9277_v14, %s8850_s29 }
0x1a2f   : > { %1935 = vrot.lane.b32.xlu0 %v9333_v58, %s8847_s16 }
0x1a7c   : > { %v1793_v41 = vpop.permute.xlu1 %1792 }
0x1a7d   : > { %v1791_v1 = vpop.permute.xlu0 %1790  ;;  %v1797_v30 = vmul.f32 %v1793_v41, %v1787_v0 }
0x1a7e   : > { %v1796_v54 = vmul.f32 %v1791_v1, %v1786_v16 }
0x1a7f   : > { %v1805_v60 = vadd.f32 %v1803_v59, %v1797_v30 }
0x1a80   : > { %v1804_v31 = vadd.f32 %v1802_v53, %v1796_v54  ;;  %v928_v57 = vpop.permute.xlu1 %927 }
0x1a81   : > { %934 = vst.msk [vmem:[#allocation2] sm:$0x2] %vm933_vm9, %v928_v57  ;;  %v783_v29 = vpop.permute.xlu0 %782 }
0x1a82   : > { %789 = vst.msk [vmem:[#allocation2] sm:$0x1] %vm788_vm10, %v783_v29  ;;  %1808 = vrot.lane.b32.xlu1 %v1804_v31, %s8850_s29 }
0x1a84   : > { %v1221_v61 = vpop.permute.xlu1 %1220 }
0x1a85   : > { %1227 = vst.msk [vmem:[#allocation2] sm:$0x8] %vm1226_vm11, %v1221_v61  ;;  %v1074_v62 = vpop.permute.xlu0 %1073 }
0x1a86   : > { %1080 = vst.msk [vmem:[#allocation2] sm:$0x4] %vm1079_vm12, %v1074_v62  ;;  %1810 = vrot.lane.b32.xlu1 %v1805_v60, %s8850_s29 }
0x1a88   : > { %v1515_v63 = vpop.permute.xlu1 %1514 }
0x1a89   : > { %1521 = vst.msk [vmem:[#allocation2] sm:$0x20] %vm1520_vm13, %v1515_v63  ;;  %v1368_v2 = vpop.permute.xlu0 %1367 }
0x1a8a   : > { %1374 = vst.msk [vmem:[#allocation2] sm:$0x10] %vm1373_vm14, %v1368_v2 }
0x1a8c   : > { %v930_v3 = vpop.permute.xlu1 %929 }
0x1a8d   : > { %935 = vst.msk [vmem:[#allocation2 + $0x8] sm:$0x2] %vm933_vm9, %v930_v3  ;;  %v1662_v5 = vpop.permute.xlu0 %1661 }
0x1a8e   : > { %1668 = vst.msk [vmem:[#allocation2] sm:$0x40] %vm1667_vm15, %v1662_v5 }
0x1a90   : > { %v1223_v7 = vpop.permute.xlu1 %1222 }
0x1a91   : > { %1228 = vst.msk [vmem:[#allocation2 + $0x8] sm:$0x8] %vm1226_vm11, %v1223_v7  ;;  %v785_v8 = vpop.permute.xlu0 %784 }
0x1a92   : > { %790 = vst.msk [vmem:[#allocation2 + $0x8] sm:$0x1] %vm788_vm10, %v785_v8 }
0x1a94   : > { %v1517_v9 = vpop.permute.xlu1 %1516 }
0x1a95   : > { %1522 = vst.msk [vmem:[#allocation2 + $0x8] sm:$0x20] %vm1520_vm13, %v1517_v9  ;;  %v1076_v10 = vpop.permute.xlu0 %1075 }
0x1a96   : > { %1081 = vst.msk [vmem:[#allocation2 + $0x8] sm:$0x4] %vm1079_vm12, %v1076_v10 }
0x1a99   : > { %v1370_v11 = vpop.permute.xlu0 %1369 }
0x1a9a   : > { %1375 = vst.msk [vmem:[#allocation2 + $0x8] sm:$0x10] %vm1373_vm14, %v1370_v11 }
0x1a9d   : > { %v1664_v12 = vpop.permute.xlu0 %1663 }
0x1a9e   : > { %1669 = vst.msk [vmem:[#allocation2 + $0x8] sm:$0x40] %vm1667_vm15, %v1664_v12 }
0x1aa1   : > { %v1936_v40 = vpop.permute.xlu0 %1935 }
0x1af4   : > { %v1809_v13 = vpop.permute.xlu1 %1808 }
0x1af5   : > { %1815 = vst.msk [vmem:[#allocation2] sm:$0x80] %vm1814_vm1, %v1809_v13 }
0x1af8   : > { %v1811_v14 = vpop.permute.xlu1 %1810 }
0x1af9   : > { %1816 = vst.msk [vmem:[#allocation2 + $0x8] sm:$0x80] %vm1814_vm1, %v1811_v14 }
0x1afc   : > { %v1817_v15 = vld [vmem:[#allocation2] sm:$0xff] }
0x1afd   : > { %7895 = vmatprep.mubr.msk.f32.mxu0 %vm313_vm0, %v1817_v15 }
0x1b00   : > { %v1818_v18 = vld [vmem:[#allocation2 + $0x8] sm:$0xff] }
0x1b01   : > { %7896 = vmatmul.mubr.msk.f32.vlgmr.msra.gmra.mxu0 %vm313_vm0, %v1818_v18 }
0x1b02   : > { %7917 = vmatprep.mubr.msk.f32.mxu0 %vm8849_vm7, %v8848_v25  ;;  %7910 = vmatpush3.msra.mxu0 %v9374_v51 }
0x1b03   : > { %7911 = vmatprep.subr.mxu0 %v8848_v25 }
0x1b04   : > { %7912 = vmatpush3.msra.mxu0 %v9376_v52 }
0x1b05   : > { %7913 = vmatprep.subr.mxu0 %v8848_v25 }
0x1b06   : > { %7914 = vmatpush3.msra.mxu0 %v9381_v55 }
0x1b07   : > { %7915 = vmatprep.subr.mxu0 %v8848_v25 }
0x1b08   : > { %7916 = vmatpush3.msra.mxu0 %v9387_v26 }
0x1b09   : > { %7931 = vmatprep.subr.mxu0 %v8848_v25 }
0x1bc1   : > { %v7897_v20 = vpop.f32.mrf.mxu0 }
0x1bc2   : > { %v9362_v21 = vadd.f32 %v7897_v20, %v7432_v19 }
0x1bc3   : > { %v1907_v22 = vpop.f32.mrf.mxu0 }
0x1bc4   : > { %v9364_v23 = vadd.f32 %v7432_v19, %v1907_v22  ;;  %v1921_v28 = vadd.f32 %v9333_v58, %v9362_v21 }
0x1bc6   : > { %v1920_v32 = vadd.f32 %v9333_v58, %v9364_v23  ;;  %v7437_v33 = vmul.f32 -1.442695, %v1921_v28 }
0x1bc8   : > { %v7436_v34 = vmul.f32 -1.442695, %v1920_v32  ;;  %8458 = vpow2.f32 %v7437_v33 }
0x1bca   : > { %8460 = vpow2.f32 %v7436_v34 }
0x1bd5   : > { %v8459_v35 = vpop.eup %8458 }
0x1bd6   : > { %v1929_v36 = vadd.f32 1.0, %v8459_v35 }
0x1bd7   : > { %v8461_v38 = vpop.eup %8460 }
0x1bd8   : > { %v1928_v39 = vadd.f32 1.0, %v8461_v38  ;;  %8462 = vrcp.f32 %v1929_v36 }
0x1bda   : > { %8464 = vrcp.f32 %v1928_v39 }
0x1be5   : > { %v8463_v42 = vpop.eup %8462 }
0x1be6   : > { %v1939_v46 = vmul.f32 %v8463_v42, %v1936_v40  ;;  %v1953_v4 = vsub.f32 1.0, %v8463_v42  ;;  %v1965_v41 = vmul.f32 0.0, %v8463_v42 }
0x1be7   : > { %v8465_v45 = vpop.eup %8464 }
0x1be8   : > { %v1938_v47 = vmul.f32 %v8465_v45, %v1936_v40  ;;  %1944 = vrot.lane.b32.xlu1 %v1939_v46, %s8847_s16  ;;  %v1952_v37 = vsub.f32 1.0, %v8465_v45  ;;  %v1964_v0 = vmul.f32 0.0, %v8465_v45 }
0x1bea   : > { %1942 = vrot.lane.b32.xlu0 %v1938_v47, %s8847_s16 }
0x1c5a   : > { %v1945_v48 = vpop.permute.xlu1 %1944 }
0x1c5b   : > { %v1949_v49 = vadd.f32 %v1945_v48, %v9362_v21 }
0x1c5c   : > { %v1943_v50 = vpop.permute.xlu0 %1942 }
0x1c5d   : > { %8466 = vtanh.f32 %v1949_v49  ;;  %v1948_v24 = vadd.f32 %v1943_v50, %v9364_v23 }
0x1c5f   : > { %8468 = vtanh.f32 %v1948_v24 }
0x1c6a   : > { %v8467_v27 = vpop.eup %8466 }
0x1c6b   : > { %1958 = vrot.lane.b32.xlu1 %v8467_v27, %s8850_s29 }
0x1c6c   : > { %v8469_v56 = vpop.eup %8468 }
0x1c6d   : > { %1956 = vrot.lane.b32.xlu0 %v8469_v56, %s8850_s29 }
0x1cdd   : > { %v1959_v6 = vpop.permute.xlu1 %1958 }
0x1cde   : > { %v1963_v16 = vmul.f32 %v1959_v6, %v1953_v4 }
0x1cdf   : > { %v1957_v17 = vpop.permute.xlu0 %1956 }
0x1ce0   : > { %v9400_v1 = vadd.f32 %v1965_v41, %v1963_v16  ;;  %v1962_v53 = vmul.f32 %v1957_v17, %v1952_v37 }
0x1ce2   : > { %v1978_v54 = vrot.slane %v9400_v1, 7  ;;  %v9403_v43 = vadd.f32 %v1964_v0, %v1962_v53 }
0x1ce4   : > { %v1979_v44 = vsel %vm792_vm8, %v1978_v54, %v9403_v43  ;;  %v2104_v34 = vrot.slane %v9403_v43, 7 }
0x1ce5   : > { %1980 = vrot.lane.b32.xlu1 %v1979_v44, %s8850_s29 }
0x1d57   : > { %v1981_v30 = vpop.permute.xlu1 %1980 }
0x1d58   : > { %7907 = vmatmul.mubr.msk.f32.vlgmr.msra.gmra.mxu1 %vm313_vm0, %v1981_v30 }
0x1d59   : > { %7921 = vmatpush3.msra.mxu1 %v9374_v51  ;;  %7928 = vmatprep.mubr.msk.f32.mxu1 %vm8849_vm7, %v8848_v25 }
0x1d5a   : > { %7922 = vmatprep.subr.mxu1 %v8848_v25 }
0x1d5b   : > { %7923 = vmatpush3.msra.mxu1 %v9376_v52 }
0x1d5c   : > { %7924 = vmatprep.subr.mxu1 %v8848_v25 }
0x1d5d   : > { %7925 = vmatpush3.msra.mxu1 %v9381_v55 }
0x1d5e   : > { %7926 = vmatprep.subr.mxu1 %v8848_v25 }
0x1d5f   : > { %7927 = vmatpush3.msra.mxu1 %v9387_v26 }
0x1d60   : > { %7942 = vmatprep.subr.mxu1 %v8848_v25 }
0x1e18   : > { %v2050_v31 = vpop.f32.mrf.mxu1 }
0x1e19   : > { %v2051_v57 = vadd.f32 %v9333_v58, %v2050_v31 }
0x1e1a   : > { %v7908_v29 = vpop.f32.mrf.mxu1 }
0x1e1b   : > { %2074 = vrot.lane.b32.xlu1 %v2051_v57, %s8847_s16  ;;  %v2055_v59 = vrot.slane %v2051_v57, 7  ;;  %v2059_v60 = vadd.f32 %v2051_v57, %v9362_v21 }
0x1e1d   : > { %2072 = vrot.lane.b32.xlu0 %v2055_v59, %s8847_s16  ;;  %v2058_v61 = vadd.f32 %v2055_v59, %v9364_v23  ;;  %v7440_v62 = vmul.f32 -1.442695, %v2059_v60 }
0x1e1f   : > { %v7439_v63 = vmul.f32 -1.442695, %v2058_v61  ;;  %8470 = vpow2.f32 %v7440_v62 }
0x1e21   : > { %8472 = vpow2.f32 %v7439_v63 }
0x1e2c   : > { %v8471_v2 = vpop.eup %8470 }
0x1e2d   : > { %v2067_v5 = vadd.f32 1.0, %v8471_v2 }
0x1e2e   : > { %v8473_v3 = vpop.eup %8472 }
0x1e2f   : > { %v2066_v7 = vadd.f32 1.0, %v8473_v3  ;;  %8474 = vrcp.f32 %v2067_v5 }
0x1e31   : > { %8476 = vrcp.f32 %v2066_v7 }
0x1e3c   : > { %v8475_v8 = vpop.eup %8474 }
0x1e3d   : > { %v2093_v32 = vsub.f32 1.0, %v8475_v8  ;;  %v2108_v40 = vmul.f32 %v8475_v8, %v1978_v54 }
0x1e3e   : > { %v8477_v11 = vpop.eup %8476 }
0x1e3f   : > { %v2092_v33 = vsub.f32 1.0, %v8477_v11  ;;  %v2107_v38 = vmul.f32 %v8477_v11, %v2104_v34 }
0x1e8d   : > { %v2075_v9 = vpop.permute.xlu1 %2074 }
0x1e8e   : > { %v2079_v10 = vmul.f32 %v8475_v8, %v2075_v9 }
0x1e8f   : > { %v2073_v12 = vpop.permute.xlu0 %2072 }
0x1e90   : > { %v2078_v13 = vmul.f32 %v8477_v11, %v2073_v12  ;;  %2084 = vrot.lane.b32.xlu1 %v2079_v10, %s8847_s16 }
0x1e92   : > { %2082 = vrot.lane.b32.xlu0 %v2078_v13, %s8847_s16 }
0x1f02   : > { %v2085_v14 = vpop.permute.xlu1 %2084 }
0x1f03   : > { %v2089_v15 = vadd.f32 %v2085_v14, %v9362_v21 }
0x1f04   : > { %v2083_v18 = vpop.permute.xlu0 %2082 }
0x1f05   : > { %8478 = vtanh.f32 %v2089_v15  ;;  %v2088_v19 = vadd.f32 %v2083_v18, %v9364_v23 }
0x1f07   : > { %8480 = vtanh.f32 %v2088_v19 }
0x1f12   : > { %v8479_v20 = vpop.eup %8478 }
0x1f13   : > { %2098 = vrot.lane.b32.xlu1 %v8479_v20, %s8850_s29 }
0x1f14   : > { %v8481_v22 = vpop.eup %8480 }
0x1f15   : > { %2096 = vrot.lane.b32.xlu0 %v8481_v22, %s8850_s29 }
0x1f85   : > { %v2099_v28 = vpop.permute.xlu1 %2098 }
0x1f86   : > { %v2103_v36 = vmul.f32 %v2099_v28, %v2093_v32 }
0x1f87   : > { %v2097_v35 = vpop.permute.xlu0 %2096 }
0x1f88   : > { %v2102_v39 = vmul.f32 %v2097_v35, %v2092_v33  ;;  %v9433_v46 = vadd.f32 %v2108_v40, %v2103_v36 }
0x1f8a   : > { %v9431_v42 = vadd.f32 %v2107_v38, %v2102_v39  ;;  %v2249_v5 = vrot.slane %v9433_v46, 7 }
0x1f8c   : > { %v2121_v45 = vrot.slane %v9431_v42, 1  ;;  %v2248_v9 = vrot.slane %v9431_v42, 7 }
0x1f8e   : > { %v2122_v47 = vsel %vm792_vm8, %v9433_v46, %v2121_v45 }
0x1f8f   : > { %2123 = vrot.lane.b32.xlu0 %v2122_v47, %s8850_s29 }
0x2001   : > { %v2124_v48 = vpop.permute.xlu0 %2123 }
0x2002   : > { %7918 = vmatmul.mubr.msk.f32.vlgmr.msra.gmra.mxu0 %vm313_vm0, %v2124_v48 }
0x2003   : > { %7932 = vmatpush3.msra.mxu0 %v9374_v51  ;;  %7939 = vmatprep.mubr.msk.f32.mxu0 %vm8849_vm7, %v8848_v25 }
0x2004   : > { %7933 = vmatprep.subr.mxu0 %v8848_v25 }
0x2005   : > { %7934 = vmatpush3.msra.mxu0 %v9376_v52 }
0x2006   : > { %7935 = vmatprep.subr.mxu0 %v8848_v25 }
0x2007   : > { %7936 = vmatpush3.msra.mxu0 %v9381_v55 }
0x2008   : > { %7937 = vmatprep.subr.mxu0 %v8848_v25 }
0x2009   : > { %7938 = vmatpush3.msra.mxu0 %v9387_v26 }
0x200a   : > { %7953 = vmatprep.subr.mxu0 %v8848_v25 }
0x20c2   : > { %v2193_v49 = vpop.f32.mrf.mxu0 }
0x20c3   : > { %v2194_v50 = vadd.f32 %v9333_v58, %v2193_v49 }
0x20c4   : > { %v7919_v24 = vpop.f32.mrf.mxu0 }
0x20c5   : > { %v2198_v27 = vrot.slane %v2194_v50, 6  ;;  %v2199_v56 = vrot.slane %v2194_v50, 7 }
0x20c7   : > { %2218 = vrot.lane.b32.xlu0 %v2199_v56, %s8847_s16  ;;  %2216 = vrot.lane.b32.xlu1 %v2198_v27, %s8847_s16  ;;  %v2202_v4 = vadd.f32 %v2198_v27, %v9364_v23  ;;  %v2203_v6 = vadd.f32 %v2199_v56, %v9362_v21 }
0x20c9   : > { %v7442_v41 = vmul.f32 -1.442695, %v2202_v4  ;;  %v7443_v16 = vmul.f32 -1.442695, %v2203_v6 }
0x20cb   : > { %8482 = vpow2.f32 %v7442_v41 }
0x20cc   : > { %8484 = vpow2.f32 %v7443_v16 }
0x20d8   : > { %v8483_v37 = vpop.eup %8482 }
0x20d9   : > { %v8485_v17 = vpop.eup %8484  ;;  %v2210_v0 = vadd.f32 1.0, %v8483_v37 }
0x20da   : > { %v2211_v53 = vadd.f32 1.0, %v8485_v17 }
0x20db   : > { %8486 = vrcp.f32 %v2210_v0 }
0x20dc   : > { %8488 = vrcp.f32 %v2211_v53 }
0x20e8   : > { %v8487_v54 = vpop.eup %8486 }
0x20e9   : > { %v8489_v44 = vpop.eup %8488  ;;  %v2236_v8 = vsub.f32 1.0, %v8487_v54  ;;  %v2252_v13 = vmul.f32 %v8487_v54, %v2248_v9 }
0x20ea   : > { %v2237_v3 = vsub.f32 1.0, %v8489_v44  ;;  %v2253_v10 = vmul.f32 %v8489_v44, %v2249_v5 }
0x2139   : > { %v2219_v30 = vpop.permute.xlu0 %2218  ;;  %v2217_v31 = vpop.permute.xlu1 %2216 }
0x213a   : > { %v2223_v57 = vmul.f32 %v8489_v44, %v2219_v30  ;;  %v2222_v29 = vmul.f32 %v8487_v54, %v2217_v31 }
0x213c   : > { %2228 = vrot.lane.b32.xlu0 %v2223_v57, %s8847_s16  ;;  %2226 = vrot.lane.b32.xlu1 %v2222_v29, %s8847_s16 }
0x21ae   : > { %v2229_v59 = vpop.permute.xlu0 %2228  ;;  %v2227_v60 = vpop.permute.xlu1 %2226 }
0x21af   : > { %v2233_v61 = vadd.f32 %v2229_v59, %v9362_v21  ;;  %v2232_v62 = vadd.f32 %v2227_v60, %v9364_v23 }
0x21b1   : > { %8490 = vtanh.f32 %v2233_v61 }
0x21b2   : > { %8492 = vtanh.f32 %v2232_v62 }
0x21be   : > { %v8491_v63 = vpop.eup %8490 }
0x21bf   : > { %v8493_v2 = vpop.eup %8492  ;;  %2242 = vrot.lane.b32.xlu0 %v8491_v63, %s8850_s29 }
0x21c0   : > { %2240 = vrot.lane.b32.xlu1 %v8493_v2, %s8850_s29 }
0x2231   : > { %v2243_v7 = vpop.permute.xlu0 %2242 }
0x2232   : > { %v2247_v11 = vmul.f32 %v2243_v7, %v2237_v3  ;;  %v2241_v12 = vpop.permute.xlu1 %2240 }
0x2233   : > { %v2246_v14 = vmul.f32 %v2241_v12, %v2236_v8 }
0x2234   : > { %v9463_v15 = vadd.f32 %v2253_v10, %v2247_v11 }
0x2235   : > { %v9465_v18 = vadd.f32 %v2252_v13, %v2246_v14 }
0x2236   : > { %v2267_v19 = vrot.slane %v9463_v15, 1  ;;  %v2395_v30 = vrot.slane %v9463_v15, 7 }
0x2237   : > { %v2266_v20 = vrot.slane %v9465_v18, 2  ;;  %v2394_v29 = vrot.slane %v9465_v18, 7 }
0x2239   : > { %v2268_v22 = vsel %vm792_vm8, %v2267_v19, %v2266_v20 }
0x223a   : > { %2269 = vrot.lane.b32.xlu1 %v2268_v22, %s8850_s29 }
0x22ac   : > { %v2270_v28 = vpop.permute.xlu1 %2269 }
0x22ad   : > { %7929 = vmatmul.mubr.msk.f32.vlgmr.msra.gmra.mxu1 %vm313_vm0, %v2270_v28 }
0x22ae   : > { %7943 = vmatpush3.msra.mxu1 %v9374_v51  ;;  %7950 = vmatprep.mubr.msk.f32.mxu1 %vm8849_vm7, %v8848_v25 }
0x22af   : > { %7944 = vmatprep.subr.mxu1 %v8848_v25 }
0x22b0   : > { %7945 = vmatpush3.msra.mxu1 %v9376_v52 }
0x22b1   : > { %7946 = vmatprep.subr.mxu1 %v8848_v25 }
0x22b2   : > { %7947 = vmatpush3.msra.mxu1 %v9381_v55 }
0x22b3   : > { %7948 = vmatprep.subr.mxu1 %v8848_v25 }
0x22b4   : > { %7949 = vmatpush3.msra.mxu1 %v9387_v26 }
0x22b5   : > { %7964 = vmatprep.subr.mxu1 %v8848_v25 }
0x236d   : > { %v2339_v32 = vpop.f32.mrf.mxu1 }
0x236e   : > { %v2340_v33 = vadd.f32 %v9333_v58, %v2339_v32 }
0x236f   : > { %v7930_v34 = vpop.f32.mrf.mxu1 }
0x2370   : > { %v2344_v35 = vrot.slane %v2340_v33, 5  ;;  %v2345_v36 = vrot.slane %v2340_v33, 6 }
0x2372   : > { %2364 = vrot.lane.b32.xlu1 %v2345_v36, %s8847_s16  ;;  %2362 = vrot.lane.b32.xlu0 %v2344_v35, %s8847_s16  ;;  %v2348_v38 = vadd.f32 %v2344_v35, %v9364_v23  ;;  %v2349_v39 = vadd.f32 %v2345_v36, %v9362_v21 }
0x2374   : > { %v7445_v40 = vmul.f32 -1.442695, %v2348_v38  ;;  %v7446_v45 = vmul.f32 -1.442695, %v2349_v39 }
0x2376   : > { %8494 = vpow2.f32 %v7445_v40 }
0x2377   : > { %8496 = vpow2.f32 %v7446_v45 }
0x2383   : > { %v8495_v47 = vpop.eup %8494 }
0x2384   : > { %v8497_v48 = vpop.eup %8496  ;;  %v2356_v49 = vadd.f32 1.0, %v8495_v47 }
0x2385   : > { %v2357_v50 = vadd.f32 1.0, %v8497_v48 }
0x2386   : > { %8498 = vrcp.f32 %v2356_v49 }
0x2387   : > { %8500 = vrcp.f32 %v2357_v50 }
0x2393   : > { %v8499_v24 = vpop.eup %8498 }
0x2394   : > { %v8501_v27 = vpop.eup %8500  ;;  %v2382_v57 = vsub.f32 1.0, %v8499_v24  ;;  %v2398_v62 = vmul.f32 %v8499_v24, %v2394_v29 }
0x2395   : > { %v2383_v44 = vsub.f32 1.0, %v8501_v27  ;;  %v2399_v59 = vmul.f32 %v8501_v27, %v2395_v30 }
0x23e4   : > { %v2365_v56 = vpop.permute.xlu1 %2364  ;;  %v2363_v4 = vpop.permute.xlu0 %2362 }
0x23e5   : > { %v2369_v6 = vmul.f32 %v8501_v27, %v2365_v56  ;;  %v2368_v41 = vmul.f32 %v8499_v24, %v2363_v4 }
0x23e7   : > { %2374 = vrot.lane.b32.xlu1 %v2369_v6, %s8847_s16  ;;  %2372 = vrot.lane.b32.xlu0 %v2368_v41, %s8847_s16 }
0x2459   : > { %v2375_v16 = vpop.permute.xlu1 %2374  ;;  %v2373_v37 = vpop.permute.xlu0 %2372 }
0x245a   : > { %v2379_v17 = vadd.f32 %v2375_v16, %v9362_v21  ;;  %v2378_v0 = vadd.f32 %v2373_v37, %v9364_v23 }
0x245c   : > { %8502 = vtanh.f32 %v2379_v17 }
0x245d   : > { %8504 = vtanh.f32 %v2378_v0 }
0x2469   : > { %v8503_v53 = vpop.eup %8502 }
0x246a   : > { %v8505_v54 = vpop.eup %8504  ;;  %2388 = vrot.lane.b32.xlu1 %v8503_v53, %s8850_s29 }
0x246b   : > { %2386 = vrot.lane.b32.xlu0 %v8505_v54, %s8850_s29 }
0x24dc   : > { %v2389_v31 = vpop.permute.xlu1 %2388 }
0x24dd   : > { %v2393_v60 = vmul.f32 %v2389_v31, %v2383_v44  ;;  %v2387_v61 = vpop.permute.xlu0 %2386 }
0x24de   : > { %v2392_v63 = vmul.f32 %v2387_v61, %v2382_v57 }
0x24df   : > { %v9495_v2 = vadd.f32 %v2399_v59, %v2393_v60 }
0x24e0   : > { %v9497_v3 = vadd.f32 %v2398_v62, %v2392_v63 }
0x24e1   : > { %v2413_v5 = vrot.slane %v9495_v2, 2  ;;  %v2541_v6 = vrot.slane %v9495_v2, 7 }
0x24e2   : > { %v2412_v7 = vrot.slane %v9497_v3, 3  ;;  %v2540_v37 = vrot.slane %v9497_v3, 7 }
0x24e4   : > { %v2414_v8 = vsel %vm792_vm8, %v2413_v5, %v2412_v7 }
0x24e5   : > { %2415 = vrot.lane.b32.xlu0 %v2414_v8, %s8850_s29 }
0x2557   : > { %v2416_v9 = vpop.permute.xlu0 %2415 }
0x2558   : > { %7940 = vmatmul.mubr.msk.f32.vlgmr.msra.gmra.mxu0 %vm313_vm0, %v2416_v9 }
0x2559   : > { %7954 = vmatpush3.msra.mxu0 %v9374_v51  ;;  %7961 = vmatprep.mubr.msk.f32.mxu0 %vm8849_vm7, %v8848_v25 }
0x255a   : > { %7955 = vmatprep.subr.mxu0 %v8848_v25 }
0x255b   : > { %7956 = vmatpush3.msra.mxu0 %v9376_v52 }
0x255c   : > { %7957 = vmatprep.subr.mxu0 %v8848_v25 }
0x255d   : > { %7958 = vmatpush3.msra.mxu0 %v9381_v55 }
0x255e   : > { %7959 = vmatprep.subr.mxu0 %v8848_v25 }
0x255f   : > { %7960 = vmatpush3.msra.mxu0 %v9387_v26 }
0x2618   : > { %v2485_v10 = vpop.f32.mrf.mxu0 }
0x2619   : > { %v2486_v11 = vadd.f32 %v9333_v58, %v2485_v10 }
0x261a   : > { %v7941_v12 = vpop.f32.mrf.mxu0 }
0x261b   : > { %v2490_v13 = vrot.slane %v2486_v11, 4  ;;  %v2491_v14 = vrot.slane %v2486_v11, 5 }
0x261d   : > { %2510 = vrot.lane.b32.xlu0 %v2491_v14, %s8847_s16  ;;  %2508 = vrot.lane.b32.xlu1 %v2490_v13, %s8847_s16  ;;  %v2494_v19 = vadd.f32 %v2490_v13, %v9364_v23  ;;  %v2495_v20 = vadd.f32 %v2491_v14, %v9362_v21 }
0x261f   : > { %v7448_v22 = vmul.f32 -1.442695, %v2494_v19  ;;  %v7449_v28 = vmul.f32 -1.442695, %v2495_v20 }
0x2621   : > { %8506 = vpow2.f32 %v7448_v22 }
0x2622   : > { %8508 = vpow2.f32 %v7449_v28 }
0x262e   : > { %v8507_v32 = vpop.eup %8506 }
0x262f   : > { %v8509_v33 = vpop.eup %8508  ;;  %v2502_v34 = vadd.f32 1.0, %v8507_v32 }
0x2630   : > { %v2503_v35 = vadd.f32 1.0, %v8509_v33 }
0x2631   : > { %8510 = vrcp.f32 %v2502_v34 }
0x2632   : > { %8512 = vrcp.f32 %v2503_v35 }
0x263e   : > { %v8511_v36 = vpop.eup %8510 }
0x263f   : > { %v8513_v38 = vpop.eup %8512  ;;  %v2528_v16 = vsub.f32 1.0, %v8511_v36  ;;  %v2544_v54 = vmul.f32 %v8511_v36, %v2540_v37 }
0x2640   : > { %v2529_v4 = vsub.f32 1.0, %v8513_v38  ;;  %v2545_v17 = vmul.f32 %v8513_v38, %v2541_v6 }
0x268f   : > { %v2511_v39 = vpop.permute.xlu0 %2510  ;;  %v2509_v40 = vpop.permute.xlu1 %2508 }
0x2690   : > { %v2515_v45 = vmul.f32 %v8513_v38, %v2511_v39  ;;  %v2514_v47 = vmul.f32 %v8511_v36, %v2509_v40 }
0x2692   : > { %2520 = vrot.lane.b32.xlu0 %v2515_v45, %s8847_s16  ;;  %2518 = vrot.lane.b32.xlu1 %v2514_v47, %s8847_s16 }
0x2704   : > { %v2521_v48 = vpop.permute.xlu0 %2520  ;;  %v2519_v49 = vpop.permute.xlu1 %2518 }
0x2705   : > { %v2525_v50 = vadd.f32 %v2521_v48, %v9362_v21  ;;  %v2524_v24 = vadd.f32 %v2519_v49, %v9364_v23 }
0x2707   : > { %8514 = vtanh.f32 %v2525_v50 }
0x2708   : > { %8516 = vtanh.f32 %v2524_v24 }
0x2714   : > { %v8515_v27 = vpop.eup %8514 }
0x2715   : > { %v8517_v56 = vpop.eup %8516  ;;  %2534 = vrot.lane.b32.xlu0 %v8515_v27, %s8850_s29 }
0x2716   : > { %2532 = vrot.lane.b32.xlu1 %v8517_v56, %s8850_s29 }
0x2787   : > { %v2535_v41 = vpop.permute.xlu0 %2534 }
0x2788   : > { %v2539_v0 = vmul.f32 %v2535_v41, %v2529_v4  ;;  %v2533_v53 = vpop.permute.xlu1 %2532 }
0x2789   : > { %v2538_v44 = vmul.f32 %v2533_v53, %v2528_v16 }
0x278a   : > { %v9526_v30 = vadd.f32 %v2545_v17, %v2539_v0 }
0x278b   : > { %v9528_v31 = vadd.f32 %v2544_v54, %v2538_v44 }
0x278c   : > { %v2559_v57 = vrot.slane %v9526_v30, 3  ;;  %v2687_v39 = vrot.slane %v9526_v30, 7 }
0x278d   : > { %v2558_v29 = vrot.slane %v9528_v31, 4  ;;  %v2686_v47 = vrot.slane %v9528_v31, 7 }
0x278f   : > { %v2560_v59 = vsel %vm792_vm8, %v2559_v57, %v2558_v29 }
0x2790   : > { %2561 = vrot.lane.b32.xlu1 %v2560_v59, %s8850_s29 }
0x2802   : > { %v2562_v60 = vpop.permute.xlu1 %2561 }
0x2803   : > { %7951 = vmatmul.mubr.msk.f32.vlgmr.msra.gmra.mxu1 %vm313_vm0, %v2562_v60 }
0x2804   : > { %7965 = vmatpush3.msra.mxu1 %v9374_v51  ;;  %7972 = vmatprep.mubr.msk.f32.mxu1 %vm8849_vm7, %v8848_v25 }
0x2805   : > { %7966 = vmatprep.subr.mxu1 %v8848_v25 }
0x2806   : > { %7967 = vmatpush3.msra.mxu1 %v9376_v52 }
0x2807   : > { %7968 = vmatprep.subr.mxu1 %v8848_v25 }
0x2808   : > { %7969 = vmatpush3.msra.mxu1 %v9381_v55 }
0x2809   : > { %7970 = vmatprep.subr.mxu1 %v8848_v25 }
0x280a   : > { %7971 = vmatpush3.msra.mxu1 %v9387_v26 }
0x280b   : > { %7986 = vmatprep.subr.mxu1 %v8848_v25 }
0x28c3   : > { %v2631_v61 = vpop.f32.mrf.mxu1 }
0x28c4   : > { %v2632_v51 = vadd.f32 %v9333_v58, %v2631_v61 }
0x28c5   : > { %v7952_v62 = vpop.f32.mrf.mxu1 }
0x28c6   : > { %v2636_v63 = vrot.slane %v2632_v51, 3  ;;  %v2637_v5 = vrot.slane %v2632_v51, 4 }
0x28c8   : > { %2656 = vrot.lane.b32.xlu1 %v2637_v5, %s8847_s16  ;;  %2654 = vrot.lane.b32.xlu0 %v2636_v63, %s8847_s16  ;;  %v2640_v52 = vadd.f32 %v2636_v63, %v9364_v23  ;;  %v2641_v55 = vadd.f32 %v2637_v5, %v9362_v21 }
0x28ca   : > { %v7451_v7 = vmul.f32 -1.442695, %v2640_v52  ;;  %v7452_v8 = vmul.f32 -1.442695, %v2641_v55 }
0x28cc   : > { %8518 = vpow2.f32 %v7451_v7 }
0x28cd   : > { %8520 = vpow2.f32 %v7452_v8 }
0x28d9   : > { %v8519_v26 = vpop.eup %8518 }
0x28da   : > { %v8521_v9 = vpop.eup %8520  ;;  %v2648_v10 = vadd.f32 1.0, %v8519_v26 }
0x28db   : > { %v2649_v11 = vadd.f32 1.0, %v8521_v9 }
0x28dc   : > { %8522 = vrcp.f32 %v2648_v10 }
0x28dd   : > { %8524 = vrcp.f32 %v2649_v11 }
0x28e9   : > { %v8523_v12 = vpop.eup %8522 }
0x28ea   : > { %v8525_v13 = vpop.eup %8524  ;;  %v2674_v45 = vsub.f32 1.0, %v8523_v12  ;;  %v2690_v24 = vmul.f32 %v8523_v12, %v2686_v47 }
0x28eb   : > { %v2675_v38 = vsub.f32 1.0, %v8525_v13  ;;  %v2691_v48 = vmul.f32 %v8525_v13, %v2687_v39 }
0x293a   : > { %v2657_v14 = vpop.permute.xlu1 %2656  ;;  %v2655_v19 = vpop.permute.xlu0 %2654 }
0x293b   : > { %v2661_v20 = vmul.f32 %v8525_v13, %v2657_v14  ;;  %v2660_v22 = vmul.f32 %v8523_v12, %v2655_v19 }
0x293d   : > { %2666 = vrot.lane.b32.xlu1 %v2661_v20, %s8847_s16  ;;  %2664 = vrot.lane.b32.xlu0 %v2660_v22, %s8847_s16 }
0x29af   : > { %v2667_v28 = vpop.permute.xlu1 %2666  ;;  %v2665_v32 = vpop.permute.xlu0 %2664 }
0x29b0   : > { %v2671_v33 = vadd.f32 %v2667_v28, %v9362_v21  ;;  %v2670_v34 = vadd.f32 %v2665_v32, %v9364_v23 }
0x29b2   : > { %8526 = vtanh.f32 %v2671_v33 }
0x29b3   : > { %8528 = vtanh.f32 %v2670_v34 }
0x29bf   : > { %v8527_v35 = vpop.eup %8526 }
0x29c0   : > { %v8529_v36 = vpop.eup %8528  ;;  %2680 = vrot.lane.b32.xlu1 %v8527_v35, %s8850_s29 }
0x29c1   : > { %2678 = vrot.lane.b32.xlu0 %v8529_v36, %s8850_s29 }
0x2a32   : > { %v2681_v40 = vpop.permute.xlu1 %2680 }
0x2a33   : > { %v2685_v49 = vmul.f32 %v2681_v40, %v2675_v38  ;;  %v2679_v50 = vpop.permute.xlu0 %2678 }
0x2a34   : > { %v2684_v27 = vmul.f32 %v2679_v50, %v2674_v45 }
0x2a35   : > { %v9558_v56 = vadd.f32 %v2691_v48, %v2685_v49 }
0x2a36   : > { %v9560_v4 = vadd.f32 %v2690_v24, %v2684_v27 }
0x2a37   : > { %v2705_v6 = vrot.slane %v9558_v56, 4  ;;  %v2833_v20 = vrot.slane %v9558_v56, 7 }
0x2a38   : > { %v2704_v41 = vrot.slane %v9560_v4, 5  ;;  %v2832_v32 = vrot.slane %v9560_v4, 7 }
0x2a3a   : > { %v2706_v16 = vsel %vm792_vm8, %v2705_v6, %v2704_v41 }
0x2a3b   : > { %2707 = vrot.lane.b32.xlu0 %v2706_v16, %s8850_s29 }
0x2aad   : > { %v2708_v37 = vpop.permute.xlu0 %2707 }
0x2aae   : > { %7962 = vmatmul.mubr.msk.f32.vlgmr.msra.gmra.mxu0 %vm313_vm0, %v2708_v37 }
0x2b6e   : > { %v2777_v17 = vpop.f32.mrf.mxu0 }
0x2b6f   : > { %v2778_v0 = vadd.f32 %v9333_v58, %v2777_v17 }
0x2b70   : > { %v7963_v53 = vpop.f32.mrf.mxu0 }
0x2b71   : > { %v2782_v54 = vrot.slane %v2778_v0, 2  ;;  %v2783_v44 = vrot.slane %v2778_v0, 3 }
0x2b73   : > { %2802 = vrot.lane.b32.xlu0 %v2783_v44, %s8847_s16  ;;  %2800 = vrot.lane.b32.xlu1 %v2782_v54, %s8847_s16  ;;  %v2786_v57 = vadd.f32 %v2782_v54, %v9364_v23  ;;  %v2787_v29 = vadd.f32 %v2783_v44, %v9362_v21 }
0x2b75   : > { %v7454_v59 = vmul.f32 -1.442695, %v2786_v57  ;;  %v7455_v60 = vmul.f32 -1.442695, %v2787_v29 }
0x2b77   : > { %8530 = vpow2.f32 %v7454_v59 }
0x2b78   : > { %8532 = vpow2.f32 %v7455_v60 }
0x2b84   : > { %v8531_v61 = vpop.eup %8530 }
0x2b85   : > { %v8533_v51 = vpop.eup %8532  ;;  %v2794_v62 = vadd.f32 1.0, %v8531_v61 }
0x2b86   : > { %v2795_v63 = vadd.f32 1.0, %v8533_v51 }
0x2b87   : > { %8534 = vrcp.f32 %v2794_v62 }
0x2b88   : > { %8536 = vrcp.f32 %v2795_v63 }
0x2b94   : > { %v8535_v5 = vpop.eup %8534 }
0x2b95   : > { %v8537_v52 = vpop.eup %8536  ;;  %v2820_v28 = vsub.f32 1.0, %v8535_v5  ;;  %v2836_v36 = vmul.f32 %v8535_v5, %v2832_v32 }
0x2b96   : > { %v2821_v19 = vsub.f32 1.0, %v8537_v52  ;;  %v2837_v33 = vmul.f32 %v8537_v52, %v2833_v20 }
0x2be5   : > { %v2803_v55 = vpop.permute.xlu0 %2802  ;;  %v2801_v7 = vpop.permute.xlu1 %2800 }
0x2be6   : > { %v2807_v8 = vmul.f32 %v8537_v52, %v2803_v55  ;;  %v2806_v26 = vmul.f32 %v8535_v5, %v2801_v7 }
0x2be8   : > { %2812 = vrot.lane.b32.xlu0 %v2807_v8, %s8847_s16  ;;  %2810 = vrot.lane.b32.xlu1 %v2806_v26, %s8847_s16 }
0x2c5a   : > { %v2813_v9 = vpop.permute.xlu0 %2812  ;;  %v2811_v10 = vpop.permute.xlu1 %2810 }
0x2c5b   : > { %v2817_v11 = vadd.f32 %v2813_v9, %v9362_v21  ;;  %v2816_v12 = vadd.f32 %v2811_v10, %v9364_v23  ;;  %v9636_v9 = vld [vmem:[%s10455_s4 + $0x5] ss:$0 sm:$0xff] }
0x2c5d   : > { %8538 = vtanh.f32 %v2817_v11 }
0x2c5e   : > { %8540 = vtanh.f32 %v2816_v12 }
0x2c6a   : > { %v8539_v13 = vpop.eup %8538 }
0x2c6b   : > { %v8541_v14 = vpop.eup %8540  ;;  %2826 = vrot.lane.b32.xlu0 %v8539_v13, %s8850_s29 }
0x2c6c   : > { %2824 = vrot.lane.b32.xlu1 %v8541_v14, %s8850_s29 }
0x2cdd   : > { %v2827_v22 = vpop.permute.xlu0 %2826 }
0x2cde   : > { %v2831_v34 = vmul.f32 %v2827_v22, %v2821_v19  ;;  %v2825_v35 = vpop.permute.xlu1 %2824 }
0x2cdf   : > { %v2830_v38 = vmul.f32 %v2825_v35, %v2820_v28 }
0x2ce0   : > { %v9580_v39 = vadd.f32 %v2837_v33, %v2831_v34 }
0x2ce1   : > { %v9582_v40 = vadd.f32 %v2836_v36, %v2830_v38 }
0x2ce2   : > { %v2851_v45 = vrot.slane %v9580_v39, 5 }
0x2ce3   : > { %v2850_v47 = vrot.slane %v9582_v40, 6 }
0x2ce5   : > { %v2852_v48 = vsel %vm792_vm8, %v2851_v45, %v2850_v47  ;;  %v7459_v47 = vld [vmem:[%s10455_s4 + $0x4] ss:$0 sm:$0xff] }
0x2ce6   : > { %2853 = vrot.lane.b32.xlu1 %v2852_v48, %s8850_s29 }
0x2d58   : > { %v2854_v49 = vpop.permute.xlu1 %2853 }
0x2d59   : > { %7973 = vmatmul.mubr.msk.f32.vlgmr.msra.gmra.mxu1 %vm313_vm0, %v2854_v49 }
0x2d5a   : > { %7994 = vmatprep.mubr.msk.f32.mxu1 %vm8849_vm7, %v8848_v25 }
0x2e19   : > { %v2923_v50 = vpop.f32.mrf.mxu1 }
0x2e1a   : > { %v2924_v24 = vadd.f32 %v9333_v58, %v2923_v50 }
0x2e1b   : > { %v7974_v27 = vpop.f32.mrf.mxu1 }
0x2e1c   : > { %v2928_v6 = vrot.slane %v2924_v24, 1  ;;  %v2929_v41 = vrot.slane %v2924_v24, 2 }
0x2e1e   : > { %2948 = vrot.lane.b32.xlu1 %v2929_v41, %s8847_s16  ;;  %2946 = vrot.lane.b32.xlu0 %v2928_v6, %s8847_s16  ;;  %v2932_v16 = vadd.f32 %v2928_v6, %v9364_v23  ;;  %v2933_v37 = vadd.f32 %v2929_v41, %v9362_v21 }
0x2e20   : > { %v7457_v17 = vmul.f32 -1.442695, %v2932_v16  ;;  %v7458_v0 = vmul.f32 -1.442695, %v2933_v37 }
0x2e22   : > { %8542 = vpow2.f32 %v7457_v17 }
0x2e23   : > { %8544 = vpow2.f32 %v7458_v0 }
0x2e2f   : > { %v8543_v53 = vpop.eup %8542 }
0x2e30   : > { %v8545_v54 = vpop.eup %8544  ;;  %v2940_v44 = vadd.f32 1.0, %v8543_v53 }
0x2e31   : > { %v2941_v57 = vadd.f32 1.0, %v8545_v54 }
0x2e32   : > { %8546 = vrcp.f32 %v2940_v44 }
0x2e33   : > { %8548 = vrcp.f32 %v2941_v57 }
0x2e3f   : > { %v8547_v58 = vpop.eup %8546 }
0x2e40   : > { %v8549_v29 = vpop.eup %8548 }
0x2e90   : > { %v2949_v59 = vpop.permute.xlu1 %2948  ;;  %v2947_v60 = vpop.permute.xlu0 %2946 }
0x2e91   : > { %v2953_v61 = vmul.f32 %v8549_v29, %v2949_v59  ;;  %v2952_v51 = vmul.f32 %v8547_v58, %v2947_v60 }
0x2e93   : > { %2958 = vrot.lane.b32.xlu1 %v2953_v61, %s8847_s16  ;;  %2956 = vrot.lane.b32.xlu0 %v2952_v51, %s8847_s16 }
0x2f05   : > { %v2959_v62 = vpop.permute.xlu1 %2958  ;;  %v2957_v63 = vpop.permute.xlu0 %2956 }
0x2f06   : > { %v2963_v5 = vadd.f32 %v2959_v62, %v9362_v21  ;;  %v2962_v52 = vadd.f32 %v2957_v63, %v9364_v23  ;;  %v3002_v21 = vld [vmem:[#allocation6 + $0x98] sm:$0xff]  ;;  %v3001_v23 = vld [vmem:[#allocation6 + $0x90] sm:$0xff] }
0x2f07   : > { %7975 = vmatprep.subr.mxu0 %v3002_v21  ;;  %v9677_v62 = vld [vmem:[#allocation6 + $0xb8] sm:$0xff]  ;;  %v9679_v63 = vld [vmem:[#allocation6 + $0xb0] sm:$0xff] }
0x2f08   : > { %8550 = vtanh.f32 %v2963_v5  ;;  %7976 = vmatpush3.msra.mxu0 %v3002_v21  ;;  %7987 = vmatpush3.msra.mxu1 %v9677_v62  ;;  %v9684_v5 = vld [vmem:[#allocation6 + $0xa8] sm:$0xff] }
0x2f09   : > { %8552 = vtanh.f32 %v2962_v52  ;;  %7977 = vmatprep.subr.mxu0 %v3001_v23  ;;  %7988 = vmatprep.subr.mxu1 %v8848_v25  ;;  %v9690_v52 = vld [vmem:[#allocation6 + $0xa0] sm:$0xff] }
0x2f0a   : > { %7978 = vmatpush3.msra.mxu0 %v3001_v23  ;;  %7989 = vmatpush3.msra.mxu1 %v9679_v63 }
0x2f0b   : > { %7990 = vmatprep.subr.mxu1 %v8848_v25 }
0x2f0c   : > { %7991 = vmatpush3.msra.mxu1 %v9684_v5 }
0x2f0d   : > { %7992 = vmatprep.subr.mxu1 %v8848_v25 }
0x2f0e   : > { %7993 = vmatpush3.msra.mxu1 %v9690_v52 }
0x2f0f   : > { %8008 = vmatprep.subr.mxu1 %v8848_v25 }
0x2f15   : > { %v8551_v55 = vpop.eup %8550 }
0x2f16   : > { %v8553_v7 = vpop.eup %8552  ;;  %2972 = vrot.lane.b32.xlu1 %v8551_v55, %s8850_s29 }
0x2f17   : > { %2970 = vrot.lane.b32.xlu0 %v8553_v7, %s8850_s29 }
0x2f1a   : > { %2113 = vrot.lane.b32.xlu1 %v9431_v42, %s8850_s29 }
0x2f1b   : > { %1970 = vrot.lane.b32.xlu0 %v9403_v43, %s8850_s29  ;;  %v3000_v43 = vld [vmem:[#allocation6 + $0x88] sm:$0xff] }
0x2f1c   : > { %7979 = vmatprep.subr.mxu0 %v3000_v43 }
0x2f1d   : > { %7980 = vmatpush3.msra.mxu0 %v3000_v43 }
0x2f1e   : > { %2404 = vrot.lane.b32.xlu1 %v9497_v3, %s8850_s29 }
0x2f1f   : > { %2258 = vrot.lane.b32.xlu0 %v9465_v18, %s8850_s29 }
0x2f22   : > { %2696 = vrot.lane.b32.xlu1 %v9560_v4, %s8850_s29 }
0x2f23   : > { %2550 = vrot.lane.b32.xlu0 %v9528_v31, %s8850_s29  ;;  %v2979_v31 = vrot.slane %v9580_v39, 7 }
0x2f25   : > { %v2983_v10 = vmul.f32 %v8549_v29, %v2979_v31 }
0x2f26   : > { %2115 = vrot.lane.b32.xlu1 %v9433_v46, %s8850_s29  ;;  %v2978_v46 = vrot.slane %v9582_v40, 7 }
0x2f27   : > { %2842 = vrot.lane.b32.xlu0 %v9582_v40, %s8850_s29 }
0x2f28   : > { %v2982_v3 = vmul.f32 %v8547_v58, %v2978_v46 }
0x2f2a   : > { %2406 = vrot.lane.b32.xlu1 %v9495_v2, %s8850_s29  ;;  %v2967_v2 = vsub.f32 1.0, %v8549_v29 }
0x2f2b   : > { %1972 = vrot.lane.b32.xlu0 %v9400_v1, %s8850_s29  ;;  %v2966_v1 = vsub.f32 1.0, %v8547_v58 }
0x2f2e   : > { %2698 = vrot.lane.b32.xlu1 %v9558_v56, %s8850_s29 }
0x2f2f   : > { %2260 = vrot.lane.b32.xlu0 %v9463_v15, %s8850_s29  ;;  %v2999_v15 = vld [vmem:[#allocation6 + $0x80] sm:$0xff] }
0x2f30   : > { %7981 = vmatprep.subr.mxu0 %v2999_v15 }
0x2f31   : > { %7982 = vmatpush3.msra.mxu0 %v2999_v15 }
0x2f32   : > { %7997 = vmatprep.subr.mxu0 %v8848_v25 }
0x2f33   : > { %2552 = vrot.lane.b32.xlu0 %v9526_v30, %s8850_s29 }
0x2f37   : > { %2844 = vrot.lane.b32.xlu0 %v9580_v39, %s8850_s29 }
0x2f3b   : > { %3114 = vrot.lane.b32.xlu0 %v9636_v9, %s8847_s16 }
0x2f88   : > { %v2973_v42 = vpop.permute.xlu1 %2972 }
0x2f89   : > { %v2971_v18 = vpop.permute.xlu0 %2970  ;;  %v2977_v56 = vmul.f32 %v2973_v42, %v2967_v2 }
0x2f8a   : > { %v2976_v30 = vmul.f32 %v2971_v18, %v2966_v1 }
0x2f8b   : > { %v2985_v11 = vadd.f32 %v2983_v10, %v2977_v56 }
0x2f8c   : > { %v2984_v4 = vadd.f32 %v2982_v3, %v2976_v30  ;;  %v2114_v8 = vpop.permute.xlu1 %2113 }
0x2f8d   : > { %2119 = vst.msk [vmem:[#allocation2] sm:$0x2] %vm933_vm9, %v2114_v8  ;;  %v1971_v26 = vpop.permute.xlu0 %1970 }
0x2f8e   : > { %1976 = vst.msk [vmem:[#allocation2] sm:$0x1] %vm788_vm10, %v1971_v26  ;;  %2988 = vrot.lane.b32.xlu1 %v2984_v4, %s8850_s29 }
0x2f90   : > { %v2405_v12 = vpop.permute.xlu1 %2404 }
0x2f91   : > { %2410 = vst.msk [vmem:[#allocation2] sm:$0x8] %vm1226_vm11, %v2405_v12  ;;  %v2259_v13 = vpop.permute.xlu0 %2258 }
0x2f92   : > { %2264 = vst.msk [vmem:[#allocation2] sm:$0x4] %vm1079_vm12, %v2259_v13  ;;  %2990 = vrot.lane.b32.xlu1 %v2985_v11, %s8850_s29 }
0x2f94   : > { %v2697_v14 = vpop.permute.xlu1 %2696 }
0x2f95   : > { %2702 = vst.msk [vmem:[#allocation2] sm:$0x20] %vm1520_vm13, %v2697_v14  ;;  %v2551_v19 = vpop.permute.xlu0 %2550 }
0x2f96   : > { %2556 = vst.msk [vmem:[#allocation2] sm:$0x10] %vm1373_vm14, %v2551_v19 }
0x2f98   : > { %v2116_v20 = vpop.permute.xlu1 %2115 }
0x2f99   : > { %2120 = vst.msk [vmem:[#allocation2 + $0x8] sm:$0x2] %vm933_vm9, %v2116_v20  ;;  %v2843_v22 = vpop.permute.xlu0 %2842 }
0x2f9a   : > { %2848 = vst.msk [vmem:[#allocation2] sm:$0x40] %vm1667_vm15, %v2843_v22 }
0x2f9c   : > { %v2407_v28 = vpop.permute.xlu1 %2406 }
0x2f9d   : > { %2411 = vst.msk [vmem:[#allocation2 + $0x8] sm:$0x8] %vm1226_vm11, %v2407_v28  ;;  %v1973_v32 = vpop.permute.xlu0 %1972 }
0x2f9e   : > { %1977 = vst.msk [vmem:[#allocation2 + $0x8] sm:$0x1] %vm788_vm10, %v1973_v32 }
0x2fa0   : > { %v2699_v33 = vpop.permute.xlu1 %2698 }
0x2fa1   : > { %2703 = vst.msk [vmem:[#allocation2 + $0x8] sm:$0x20] %vm1520_vm13, %v2699_v33  ;;  %v2261_v34 = vpop.permute.xlu0 %2260 }
0x2fa2   : > { %2265 = vst.msk [vmem:[#allocation2 + $0x8] sm:$0x4] %vm1079_vm12, %v2261_v34 }
0x2fa5   : > { %v2553_v35 = vpop.permute.xlu0 %2552 }
0x2fa6   : > { %2557 = vst.msk [vmem:[#allocation2 + $0x8] sm:$0x10] %vm1373_vm14, %v2553_v35 }
0x2fa9   : > { %v2845_v36 = vpop.permute.xlu0 %2844 }
0x2faa   : > { %2849 = vst.msk [vmem:[#allocation2 + $0x8] sm:$0x40] %vm1667_vm15, %v2845_v36 }
0x2fad   : > { %v3115_v54 = vpop.permute.xlu0 %3114 }
0x3000   : > { %v2989_v38 = vpop.permute.xlu1 %2988 }
0x3001   : > { %2994 = vst.msk [vmem:[#allocation2] sm:$0x80] %vm1814_vm1, %v2989_v38 }
0x3004   : > { %v2991_v39 = vpop.permute.xlu1 %2990 }
0x3005   : > { %2995 = vst.msk [vmem:[#allocation2 + $0x8] sm:$0x80] %vm1814_vm1, %v2991_v39 }
0x3008   : > { %v2996_v40 = vld [vmem:[#allocation2] sm:$0xff] }
0x3009   : > { %7983 = vmatprep.mubr.msk.f32.mxu0 %vm313_vm0, %v2996_v40 }
0x300c   : > { %v2997_v45 = vld [vmem:[#allocation2 + $0x8] sm:$0xff] }
0x300d   : > { %7984 = vmatmul.mubr.msk.f32.vlgmr.msra.gmra.mxu0 %vm313_vm0, %v2997_v45 }
0x300e   : > { %8005 = vmatprep.mubr.msk.f32.mxu0 %vm8849_vm7, %v8848_v25  ;;  %7998 = vmatpush3.msra.mxu0 %v9677_v62 }
0x300f   : > { %7999 = vmatprep.subr.mxu0 %v8848_v25 }
0x3010   : > { %8000 = vmatpush3.msra.mxu0 %v9679_v63 }
0x3011   : > { %8001 = vmatprep.subr.mxu0 %v8848_v25 }
0x3012   : > { %8002 = vmatpush3.msra.mxu0 %v9684_v5 }
0x3013   : > { %8003 = vmatprep.subr.mxu0 %v8848_v25 }
0x3014   : > { %8004 = vmatpush3.msra.mxu0 %v9690_v52 }
0x3015   : > { %8019 = vmatprep.subr.mxu0 %v8848_v25 }
0x30cd   : > { %v7985_v48 = vpop.f32.mrf.mxu0 }
0x30ce   : > { %v9665_v49 = vadd.f32 %v7985_v48, %v7459_v47 }
0x30cf   : > { %v3086_v50 = vpop.f32.mrf.mxu0 }
0x30d0   : > { %v9667_v24 = vadd.f32 %v7459_v47, %v3086_v50  ;;  %v3100_v27 = vadd.f32 %v9636_v9, %v9665_v49 }
0x30d2   : > { %v3099_v6 = vadd.f32 %v9636_v9, %v9667_v24  ;;  %v7464_v41 = vmul.f32 -1.442695, %v3100_v27 }
0x30d4   : > { %v7463_v16 = vmul.f32 -1.442695, %v3099_v6  ;;  %8554 = vpow2.f32 %v7464_v41 }
0x30d6   : > { %8556 = vpow2.f32 %v7463_v16 }
0x30e1   : > { %v8555_v37 = vpop.eup %8554 }
0x30e2   : > { %v3108_v17 = vadd.f32 1.0, %v8555_v37 }
0x30e3   : > { %v8557_v0 = vpop.eup %8556 }
0x30e4   : > { %v3107_v53 = vadd.f32 1.0, %v8557_v0  ;;  %8558 = vrcp.f32 %v3108_v17 }
0x30e6   : > { %8560 = vrcp.f32 %v3107_v53 }
0x30f1   : > { %v8559_v44 = vpop.eup %8558 }
0x30f2   : > { %v3118_v57 = vmul.f32 %v8559_v44, %v3115_v54  ;;  %v3132_v21 = vsub.f32 1.0, %v8559_v44  ;;  %v3144_v43 = vmul.f32 0.0, %v8559_v44 }
0x30f3   : > { %v8561_v58 = vpop.eup %8560 }
0x30f4   : > { %v3117_v29 = vmul.f32 %v8561_v58, %v3115_v54  ;;  %3123 = vrot.lane.b32.xlu1 %v3118_v57, %s8847_s16  ;;  %v3131_v1 = vsub.f32 1.0, %v8561_v58  ;;  %v3143_v15 = vmul.f32 0.0, %v8561_v58 }
0x30f6   : > { %3121 = vrot.lane.b32.xlu0 %v3117_v29, %s8847_s16 }
0x3166   : > { %v3124_v59 = vpop.permute.xlu1 %3123 }
0x3167   : > { %v3128_v60 = vadd.f32 %v3124_v59, %v9665_v49 }
0x3168   : > { %v3122_v61 = vpop.permute.xlu0 %3121 }
0x3169   : > { %8562 = vtanh.f32 %v3128_v60  ;;  %v3127_v51 = vadd.f32 %v3122_v61, %v9667_v24 }
0x316b   : > { %8564 = vtanh.f32 %v3127_v51 }
0x3176   : > { %v8563_v55 = vpop.eup %8562 }
0x3177   : > { %3137 = vrot.lane.b32.xlu1 %v8563_v55, %s8850_s29 }
0x3178   : > { %v8565_v7 = vpop.eup %8564 }
0x3179   : > { %3135 = vrot.lane.b32.xlu0 %v8565_v7, %s8850_s29 }
0x31e9   : > { %v3138_v23 = vpop.permute.xlu1 %3137 }
0x31ea   : > { %v3142_v42 = vmul.f32 %v3138_v23, %v3132_v21 }
0x31eb   : > { %v3136_v46 = vpop.permute.xlu0 %3135 }
0x31ec   : > { %v9703_v18 = vadd.f32 %v3144_v43, %v3142_v42  ;;  %v3141_v2 = vmul.f32 %v3136_v46, %v3131_v1 }
0x31ee   : > { %v3157_v3 = vrot.slane %v9703_v18, 7  ;;  %v9706_v30 = vadd.f32 %v3143_v15, %v3141_v2 }
0x31f0   : > { %v3158_v31 = vsel %vm792_vm8, %v3157_v3, %v9706_v30  ;;  %v3283_v16 = vrot.slane %v9706_v30, 7 }
0x31f1   : > { %3159 = vrot.lane.b32.xlu1 %v3158_v31, %s8850_s29 }
0x3263   : > { %v3160_v56 = vpop.permute.xlu1 %3159 }
0x3264   : > { %7995 = vmatmul.mubr.msk.f32.vlgmr.msra.gmra.mxu1 %vm313_vm0, %v3160_v56 }
0x3265   : > { %8009 = vmatpush3.msra.mxu1 %v9677_v62  ;;  %8016 = vmatprep.mubr.msk.f32.mxu1 %vm8849_vm7, %v8848_v25 }
0x3266   : > { %8010 = vmatprep.subr.mxu1 %v8848_v25 }
0x3267   : > { %8011 = vmatpush3.msra.mxu1 %v9679_v63 }
0x3268   : > { %8012 = vmatprep.subr.mxu1 %v8848_v25 }
0x3269   : > { %8013 = vmatpush3.msra.mxu1 %v9684_v5 }
0x326a   : > { %8014 = vmatprep.subr.mxu1 %v8848_v25 }
0x326b   : > { %8015 = vmatpush3.msra.mxu1 %v9690_v52 }
0x326c   : > { %8030 = vmatprep.subr.mxu1 %v8848_v25 }
0x3324   : > { %v3229_v4 = vpop.f32.mrf.mxu1 }
0x3325   : > { %v3230_v8 = vadd.f32 %v9636_v9, %v3229_v4 }
0x3326   : > { %v7996_v26 = vpop.f32.mrf.mxu1 }
0x3327   : > { %v3234_v10 = vrot.slane %v3230_v8, 7  ;;  %3253 = vrot.lane.b32.xlu1 %v3230_v8, %s8847_s16  ;;  %v3238_v11 = vadd.f32 %v3230_v8, %v9665_v49 }
0x3329   : > { %3251 = vrot.lane.b32.xlu0 %v3234_v10, %s8847_s16  ;;  %v3237_v12 = vadd.f32 %v3234_v10, %v9667_v24  ;;  %v7467_v13 = vmul.f32 -1.442695, %v3238_v11 }
0x332b   : > { %v7466_v14 = vmul.f32 -1.442695, %v3237_v12  ;;  %8566 = vpow2.f32 %v7467_v13 }
0x332d   : > { %8568 = vpow2.f32 %v7466_v14 }
0x3338   : > { %v8567_v19 = vpop.eup %8566 }
0x3339   : > { %v3246_v22 = vadd.f32 1.0, %v8567_v19 }
0x333a   : > { %v8569_v20 = vpop.eup %8568 }
0x333b   : > { %v3245_v28 = vadd.f32 1.0, %v8569_v20  ;;  %8570 = vrcp.f32 %v3246_v22 }
0x333d   : > { %8572 = vrcp.f32 %v3245_v28 }
0x3348   : > { %v8571_v32 = vpop.eup %8570 }
0x3349   : > { %v3272_v6 = vsub.f32 1.0, %v8571_v32  ;;  %v3287_v54 = vmul.f32 %v8571_v32, %v3157_v3 }
0x334a   : > { %v8573_v35 = vpop.eup %8572 }
0x334b   : > { %v3271_v41 = vsub.f32 1.0, %v8573_v35  ;;  %v3286_v0 = vmul.f32 %v8573_v35, %v3283_v16 }
0x3399   : > { %v3254_v33 = vpop.permute.xlu1 %3253 }
0x339a   : > { %v3258_v34 = vmul.f32 %v8571_v32, %v3254_v33 }
0x339b   : > { %v3252_v36 = vpop.permute.xlu0 %3251 }
0x339c   : > { %v3257_v38 = vmul.f32 %v8573_v35, %v3252_v36  ;;  %3263 = vrot.lane.b32.xlu1 %v3258_v34, %s8847_s16 }
0x339e   : > { %3261 = vrot.lane.b32.xlu0 %v3257_v38, %s8847_s16 }
0x340e   : > { %v3264_v39 = vpop.permute.xlu1 %3263 }
0x340f   : > { %v3268_v40 = vadd.f32 %v3264_v39, %v9665_v49 }
0x3410   : > { %v3262_v45 = vpop.permute.xlu0 %3261 }
0x3411   : > { %8574 = vtanh.f32 %v3268_v40  ;;  %v3267_v47 = vadd.f32 %v3262_v45, %v9667_v24 }
0x3413   : > { %8576 = vtanh.f32 %v3267_v47 }
0x341e   : > { %v8575_v48 = vpop.eup %8574 }
0x341f   : > { %3277 = vrot.lane.b32.xlu1 %v8575_v48, %s8850_s29 }
0x3420   : > { %v8577_v50 = vpop.eup %8576 }
0x3421   : > { %3275 = vrot.lane.b32.xlu0 %v8577_v50, %s8850_s29 }
0x3491   : > { %v3278_v27 = vpop.permute.xlu1 %3277 }
0x3492   : > { %v3282_v17 = vmul.f32 %v3278_v27, %v3272_v6 }
0x3493   : > { %v3276_v37 = vpop.permute.xlu0 %3275 }
0x3494   : > { %v3281_v53 = vmul.f32 %v3276_v37, %v3271_v41  ;;  %v9736_v57 = vadd.f32 %v3287_v54, %v3282_v17 }
0x3496   : > { %v9734_v44 = vadd.f32 %v3286_v0, %v3281_v53  ;;  %v3428_v22 = vrot.slane %v9736_v57, 7 }
0x3498   : > { %v3300_v58 = vrot.slane %v9734_v44, 1  ;;  %v3427_v33 = vrot.slane %v9734_v44, 7 }
0x349a   : > { %v3301_v29 = vsel %vm792_vm8, %v9736_v57, %v3300_v58 }
0x349b   : > { %3302 = vrot.lane.b32.xlu0 %v3301_v29, %s8850_s29 }
0x350d   : > { %v3303_v59 = vpop.permute.xlu0 %3302 }
0x350e   : > { %8006 = vmatmul.mubr.msk.f32.vlgmr.msra.gmra.mxu0 %vm313_vm0, %v3303_v59 }
0x350f   : > { %8020 = vmatpush3.msra.mxu0 %v9677_v62  ;;  %8027 = vmatprep.mubr.msk.f32.mxu0 %vm8849_vm7, %v8848_v25 }
0x3510   : > { %8021 = vmatprep.subr.mxu0 %v8848_v25 }
0x3511   : > { %8022 = vmatpush3.msra.mxu0 %v9679_v63 }
0x3512   : > { %8023 = vmatprep.subr.mxu0 %v8848_v25 }
0x3513   : > { %8024 = vmatpush3.msra.mxu0 %v9684_v5 }
0x3514   : > { %8025 = vmatprep.subr.mxu0 %v8848_v25 }
0x3515   : > { %8026 = vmatpush3.msra.mxu0 %v9690_v52 }
0x3516   : > { %8041 = vmatprep.subr.mxu0 %v8848_v25 }
0x35ce   : > { %v3372_v60 = vpop.f32.mrf.mxu0 }
0x35cf   : > { %v3373_v61 = vadd.f32 %v9636_v9, %v3372_v60 }
0x35d0   : > { %v8007_v51 = vpop.f32.mrf.mxu0 }
0x35d1   : > { %v3377_v55 = vrot.slane %v3373_v61, 6  ;;  %v3378_v7 = vrot.slane %v3373_v61, 7 }
0x35d3   : > { %3397 = vrot.lane.b32.xlu0 %v3378_v7, %s8847_s16  ;;  %3395 = vrot.lane.b32.xlu1 %v3377_v55, %s8847_s16  ;;  %v3381_v21 = vadd.f32 %v3377_v55, %v9667_v24  ;;  %v3382_v23 = vadd.f32 %v3378_v7, %v9665_v49 }
0x35d5   : > { %v7469_v43 = vmul.f32 -1.442695, %v3381_v21  ;;  %v7470_v42 = vmul.f32 -1.442695, %v3382_v23 }
0x35d7   : > { %8578 = vpow2.f32 %v7469_v43 }
0x35d8   : > { %8580 = vpow2.f32 %v7470_v42 }
0x35e4   : > { %v8579_v1 = vpop.eup %8578 }
0x35e5   : > { %v8581_v46 = vpop.eup %8580  ;;  %v3389_v15 = vadd.f32 1.0, %v8579_v1 }
0x35e6   : > { %v3390_v2 = vadd.f32 1.0, %v8581_v46 }
0x35e7   : > { %8582 = vrcp.f32 %v3389_v15 }
0x35e8   : > { %8584 = vrcp.f32 %v3390_v2 }
0x35f4   : > { %v8583_v3 = vpop.eup %8582 }
0x35f5   : > { %v8585_v31 = vpop.eup %8584  ;;  %v3415_v32 = vsub.f32 1.0, %v8583_v3  ;;  %v3431_v38 = vmul.f32 %v8583_v3, %v3427_v33 }
0x35f6   : > { %v3416_v20 = vsub.f32 1.0, %v8585_v31  ;;  %v3432_v34 = vmul.f32 %v8585_v31, %v3428_v22 }
0x3645   : > { %v3398_v56 = vpop.permute.xlu0 %3397  ;;  %v3396_v4 = vpop.permute.xlu1 %3395 }
0x3646   : > { %v3402_v8 = vmul.f32 %v8585_v31, %v3398_v56  ;;  %v3401_v26 = vmul.f32 %v8583_v3, %v3396_v4 }
0x3648   : > { %3407 = vrot.lane.b32.xlu0 %v3402_v8, %s8847_s16  ;;  %3405 = vrot.lane.b32.xlu1 %v3401_v26, %s8847_s16 }
0x36ba   : > { %v3408_v10 = vpop.permute.xlu0 %3407  ;;  %v3406_v11 = vpop.permute.xlu1 %3405 }
0x36bb   : > { %v3412_v12 = vadd.f32 %v3408_v10, %v9665_v49  ;;  %v3411_v13 = vadd.f32 %v3406_v11, %v9667_v24 }
0x36bd   : > { %8586 = vtanh.f32 %v3412_v12 }
0x36be   : > { %8588 = vtanh.f32 %v3411_v13 }
0x36ca   : > { %v8587_v14 = vpop.eup %8586 }
0x36cb   : > { %v8589_v19 = vpop.eup %8588  ;;  %3421 = vrot.lane.b32.xlu0 %v8587_v14, %s8850_s29 }
0x36cc   : > { %3419 = vrot.lane.b32.xlu1 %v8589_v19, %s8850_s29 }
0x373d   : > { %v3422_v28 = vpop.permute.xlu0 %3421 }
0x373e   : > { %v3426_v35 = vmul.f32 %v3422_v28, %v3416_v20  ;;  %v3420_v36 = vpop.permute.xlu1 %3419 }
0x373f   : > { %v3425_v39 = vmul.f32 %v3420_v36, %v3415_v32 }
0x3740   : > { %v9766_v40 = vadd.f32 %v3432_v34, %v3426_v35 }
0x3741   : > { %v9768_v45 = vadd.f32 %v3431_v38, %v3425_v39 }
0x3742   : > { %v3446_v47 = vrot.slane %v9766_v40, 1  ;;  %v3574_v56 = vrot.slane %v9766_v40, 7 }
0x3743   : > { %v3445_v48 = vrot.slane %v9768_v45, 2  ;;  %v3573_v26 = vrot.slane %v9768_v45, 7 }
0x3745   : > { %v3447_v50 = vsel %vm792_vm8, %v3446_v47, %v3445_v48 }
0x3746   : > { %3448 = vrot.lane.b32.xlu1 %v3447_v50, %s8850_s29 }
0x37b8   : > { %v3449_v27 = vpop.permute.xlu1 %3448 }
0x37b9   : > { %8017 = vmatmul.mubr.msk.f32.vlgmr.msra.gmra.mxu1 %vm313_vm0, %v3449_v27 }
0x37ba   : > { %8031 = vmatpush3.msra.mxu1 %v9677_v62  ;;  %8038 = vmatprep.mubr.msk.f32.mxu1 %vm8849_vm7, %v8848_v25 }
0x37bb   : > { %8032 = vmatprep.subr.mxu1 %v8848_v25 }
0x37bc   : > { %8033 = vmatpush3.msra.mxu1 %v9679_v63 }
0x37bd   : > { %8034 = vmatprep.subr.mxu1 %v8848_v25 }
0x37be   : > { %8035 = vmatpush3.msra.mxu1 %v9684_v5 }
0x37bf   : > { %8036 = vmatprep.subr.mxu1 %v8848_v25 }
0x37c0   : > { %8037 = vmatpush3.msra.mxu1 %v9690_v52 }
0x37c1   : > { %8052 = vmatprep.subr.mxu1 %v8848_v25 }
0x3879   : > { %v3518_v6 = vpop.f32.mrf.mxu1 }
0x387a   : > { %v3519_v41 = vadd.f32 %v9636_v9, %v3518_v6 }
0x387b   : > { %v8018_v16 = vpop.f32.mrf.mxu1 }
0x387c   : > { %v3523_v37 = vrot.slane %v3519_v41, 5  ;;  %v3524_v17 = vrot.slane %v3519_v41, 6 }
0x387e   : > { %3543 = vrot.lane.b32.xlu1 %v3524_v17, %s8847_s16  ;;  %3541 = vrot.lane.b32.xlu0 %v3523_v37, %s8847_s16  ;;  %v3527_v0 = vadd.f32 %v3523_v37, %v9667_v24  ;;  %v3528_v53 = vadd.f32 %v3524_v17, %v9665_v49 }
0x3880   : > { %v7472_v54 = vmul.f32 -1.442695, %v3527_v0  ;;  %v7473_v58 = vmul.f32 -1.442695, %v3528_v53 }
0x3882   : > { %8590 = vpow2.f32 %v7472_v54 }
0x3883   : > { %8592 = vpow2.f32 %v7473_v58 }
0x388f   : > { %v8591_v29 = vpop.eup %8590 }
0x3890   : > { %v8593_v59 = vpop.eup %8592  ;;  %v3535_v60 = vadd.f32 1.0, %v8591_v29 }
0x3891   : > { %v3536_v61 = vadd.f32 1.0, %v8593_v59 }
0x3892   : > { %8594 = vrcp.f32 %v3535_v60 }
0x3893   : > { %8596 = vrcp.f32 %v3536_v61 }
0x389f   : > { %v8595_v51 = vpop.eup %8594 }
0x38a0   : > { %v8597_v55 = vpop.eup %8596  ;;  %v3561_v8 = vsub.f32 1.0, %v8595_v51  ;;  %v3577_v13 = vmul.f32 %v8595_v51, %v3573_v26 }
0x38a1   : > { %v3562_v31 = vsub.f32 1.0, %v8597_v55  ;;  %v3578_v10 = vmul.f32 %v8597_v55, %v3574_v56 }
0x38f0   : > { %v3544_v7 = vpop.permute.xlu1 %3543  ;;  %v3542_v21 = vpop.permute.xlu0 %3541 }
0x38f1   : > { %v3548_v23 = vmul.f32 %v8597_v55, %v3544_v7  ;;  %v3547_v43 = vmul.f32 %v8595_v51, %v3542_v21 }
0x38f3   : > { %3553 = vrot.lane.b32.xlu1 %v3548_v23, %s8847_s16  ;;  %3551 = vrot.lane.b32.xlu0 %v3547_v43, %s8847_s16 }
0x3965   : > { %v3554_v42 = vpop.permute.xlu1 %3553  ;;  %v3552_v1 = vpop.permute.xlu0 %3551 }
0x3966   : > { %v3558_v46 = vadd.f32 %v3554_v42, %v9665_v49  ;;  %v3557_v15 = vadd.f32 %v3552_v1, %v9667_v24 }
0x3968   : > { %8598 = vtanh.f32 %v3558_v46 }
0x3969   : > { %8600 = vtanh.f32 %v3557_v15 }
0x3975   : > { %v8599_v2 = vpop.eup %8598 }
0x3976   : > { %v8601_v3 = vpop.eup %8600  ;;  %3567 = vrot.lane.b32.xlu1 %v8599_v2, %s8850_s29 }
0x3977   : > { %3565 = vrot.lane.b32.xlu0 %v8601_v3, %s8850_s29 }
0x39e8   : > { %v3568_v4 = vpop.permute.xlu1 %3567 }
0x39e9   : > { %v3572_v11 = vmul.f32 %v3568_v4, %v3562_v31  ;;  %v3566_v12 = vpop.permute.xlu0 %3565 }
0x39ea   : > { %v3571_v14 = vmul.f32 %v3566_v12, %v3561_v8 }
0x39eb   : > { %v9798_v19 = vadd.f32 %v3578_v10, %v3572_v11 }
0x39ec   : > { %v9800_v20 = vadd.f32 %v3577_v13, %v3571_v14 }
0x39ed   : > { %v3592_v22 = vrot.slane %v9798_v19, 2  ;;  %v3720_v23 = vrot.slane %v9798_v19, 7 }
0x39ee   : > { %v3591_v28 = vrot.slane %v9800_v20, 3  ;;  %v3719_v1 = vrot.slane %v9800_v20, 7 }
0x39f0   : > { %v3593_v32 = vsel %vm792_vm8, %v3592_v22, %v3591_v28 }
0x39f1   : > { %3594 = vrot.lane.b32.xlu0 %v3593_v32, %s8850_s29 }
0x3a63   : > { %v3595_v33 = vpop.permute.xlu0 %3594 }
0x3a64   : > { %8028 = vmatmul.mubr.msk.f32.vlgmr.msra.gmra.mxu0 %vm313_vm0, %v3595_v33 }
0x3a65   : > { %8042 = vmatpush3.msra.mxu0 %v9677_v62  ;;  %8049 = vmatprep.mubr.msk.f32.mxu0 %vm8849_vm7, %v8848_v25 }
0x3a66   : > { %8043 = vmatprep.subr.mxu0 %v8848_v25 }
0x3a67   : > { %8044 = vmatpush3.msra.mxu0 %v9679_v63 }
0x3a68   : > { %8045 = vmatprep.subr.mxu0 %v8848_v25 }
0x3a69   : > { %8046 = vmatpush3.msra.mxu0 %v9684_v5 }
0x3a6a   : > { %8047 = vmatprep.subr.mxu0 %v8848_v25 }
0x3a6b   : > { %8048 = vmatpush3.msra.mxu0 %v9690_v52 }
0x3b24   : > { %v3664_v34 = vpop.f32.mrf.mxu0 }
0x3b25   : > { %v3665_v35 = vadd.f32 %v9636_v9, %v3664_v34 }
0x3b26   : > { %v8029_v36 = vpop.f32.mrf.mxu0 }
0x3b27   : > { %v3669_v38 = vrot.slane %v3665_v35, 4  ;;  %v3670_v39 = vrot.slane %v3665_v35, 5 }
0x3b29   : > { %3689 = vrot.lane.b32.xlu0 %v3670_v39, %s8847_s16  ;;  %3687 = vrot.lane.b32.xlu1 %v3669_v38, %s8847_s16  ;;  %v3673_v47 = vadd.f32 %v3669_v38, %v9667_v24  ;;  %v3674_v48 = vadd.f32 %v3670_v39, %v9665_v49 }
0x3b2b   : > { %v7475_v50 = vmul.f32 -1.442695, %v3673_v47  ;;  %v7476_v27 = vmul.f32 -1.442695, %v3674_v48 }
0x3b2d   : > { %8602 = vpow2.f32 %v7475_v50 }
0x3b2e   : > { %8604 = vpow2.f32 %v7476_v27 }
0x3b3a   : > { %v8603_v6 = vpop.eup %8602 }
0x3b3b   : > { %v8605_v41 = vpop.eup %8604  ;;  %v3681_v16 = vadd.f32 1.0, %v8603_v6 }
0x3b3c   : > { %v3682_v37 = vadd.f32 1.0, %v8605_v41 }
0x3b3d   : > { %8606 = vrcp.f32 %v3681_v16 }
0x3b3e   : > { %8608 = vrcp.f32 %v3682_v37 }
0x3b4a   : > { %v8607_v17 = vpop.eup %8606 }
0x3b4b   : > { %v8609_v0 = vpop.eup %8608  ;;  %v3707_v42 = vsub.f32 1.0, %v8607_v17  ;;  %v3723_v3 = vmul.f32 %v8607_v17, %v3719_v1 }
0x3b4c   : > { %v3708_v21 = vsub.f32 1.0, %v8609_v0  ;;  %v3724_v46 = vmul.f32 %v8609_v0, %v3720_v23 }
0x3b9b   : > { %v3690_v53 = vpop.permute.xlu0 %3689  ;;  %v3688_v54 = vpop.permute.xlu1 %3687 }
0x3b9c   : > { %v3694_v58 = vmul.f32 %v8609_v0, %v3690_v53  ;;  %v3693_v29 = vmul.f32 %v8607_v17, %v3688_v54 }
0x3b9e   : > { %3699 = vrot.lane.b32.xlu0 %v3694_v58, %s8847_s16  ;;  %3697 = vrot.lane.b32.xlu1 %v3693_v29, %s8847_s16 }
0x3c10   : > { %v3700_v59 = vpop.permute.xlu0 %3699  ;;  %v3698_v60 = vpop.permute.xlu1 %3697 }
0x3c11   : > { %v3704_v61 = vadd.f32 %v3700_v59, %v9665_v49  ;;  %v3703_v51 = vadd.f32 %v3698_v60, %v9667_v24 }
0x3c13   : > { %8610 = vtanh.f32 %v3704_v61 }
0x3c14   : > { %8612 = vtanh.f32 %v3703_v51 }
0x3c20   : > { %v8611_v55 = vpop.eup %8610 }
0x3c21   : > { %v8613_v7 = vpop.eup %8612  ;;  %3713 = vrot.lane.b32.xlu0 %v8611_v55, %s8850_s29 }
0x3c22   : > { %3711 = vrot.lane.b32.xlu1 %v8613_v7, %s8850_s29 }
0x3c93   : > { %v3714_v43 = vpop.permute.xlu0 %3713 }
0x3c94   : > { %v3718_v15 = vmul.f32 %v3714_v43, %v3708_v21  ;;  %v3712_v2 = vpop.permute.xlu1 %3711 }
0x3c95   : > { %v3717_v31 = vmul.f32 %v3712_v2, %v3707_v42 }
0x3c96   : > { %v9829_v56 = vadd.f32 %v3724_v46, %v3718_v15 }
0x3c97   : > { %v9831_v4 = vadd.f32 %v3723_v3, %v3717_v31 }
0x3c98   : > { %v3738_v8 = vrot.slane %v9829_v56, 3  ;;  %v3866_v53 = vrot.slane %v9829_v56, 7 }
0x3c99   : > { %v3737_v26 = vrot.slane %v9831_v4, 4  ;;  %v3865_v29 = vrot.slane %v9831_v4, 7 }
0x3c9b   : > { %v3739_v10 = vsel %vm792_vm8, %v3738_v8, %v3737_v26 }
0x3c9c   : > { %3740 = vrot.lane.b32.xlu1 %v3739_v10, %s8850_s29 }
0x3d0e   : > { %v3741_v11 = vpop.permute.xlu1 %3740 }
0x3d0f   : > { %8039 = vmatmul.mubr.msk.f32.vlgmr.msra.gmra.mxu1 %vm313_vm0, %v3741_v11 }
0x3d10   : > { %8053 = vmatpush3.msra.mxu1 %v9677_v62  ;;  %8060 = vmatprep.mubr.msk.f32.mxu1 %vm8849_vm7, %v8848_v25 }
0x3d11   : > { %8054 = vmatprep.subr.mxu1 %v8848_v25 }
0x3d12   : > { %8055 = vmatpush3.msra.mxu1 %v9679_v63 }
0x3d13   : > { %8056 = vmatprep.subr.mxu1 %v8848_v25 }
0x3d14   : > { %8057 = vmatpush3.msra.mxu1 %v9684_v5 }
0x3d15   : > { %8058 = vmatprep.subr.mxu1 %v8848_v25 }
0x3d16   : > { %8059 = vmatpush3.msra.mxu1 %v9690_v52 }
0x3dcf   : > { %v3810_v12 = vpop.f32.mrf.mxu1 }
0x3dd0   : > { %v3811_v13 = vadd.f32 %v9636_v9, %v3810_v12 }
0x3dd1   : > { %v8040_v14 = vpop.f32.mrf.mxu1 }
0x3dd2   : > { %v3815_v62 = vrot.slane %v3811_v13, 3  ;;  %v3816_v22 = vrot.slane %v3811_v13, 4 }
0x3dd4   : > { %3835 = vrot.lane.b32.xlu1 %v3816_v22, %s8847_s16  ;;  %3833 = vrot.lane.b32.xlu0 %v3815_v62, %s8847_s16  ;;  %v3819_v63 = vadd.f32 %v3815_v62, %v9667_v24  ;;  %v3820_v28 = vadd.f32 %v3816_v22, %v9665_v49 }
0x3dd6   : > { %v7478_v32 = vmul.f32 -1.442695, %v3819_v63  ;;  %v7479_v5 = vmul.f32 -1.442695, %v3820_v28 }
0x3dd8   : > { %8614 = vpow2.f32 %v7478_v32 }
0x3dd9   : > { %8616 = vpow2.f32 %v7479_v5 }
0x3de5   : > { %v8615_v33 = vpop.eup %8614 }
0x3de6   : > { %v8617_v52 = vpop.eup %8616  ;;  %v3827_v34 = vadd.f32 1.0, %v8615_v33 }
0x3de7   : > { %v3828_v35 = vadd.f32 1.0, %v8617_v52 }
0x3de8   : > { %8618 = vrcp.f32 %v3827_v34 }
0x3de9   : > { %8620 = vrcp.f32 %v3828_v35 }
0x3df5   : > { %v8619_v36 = vpop.eup %8618 }
0x3df6   : > { %v8621_v38 = vpop.eup %8620  ;;  %v3853_v58 = vsub.f32 1.0, %v8619_v36  ;;  %v3869_v51 = vmul.f32 %v8619_v36, %v3865_v29 }
0x3df7   : > { %v3854_v0 = vsub.f32 1.0, %v8621_v38  ;;  %v3870_v59 = vmul.f32 %v8621_v38, %v3866_v53 }
0x3e46   : > { %v3836_v39 = vpop.permute.xlu1 %3835  ;;  %v3834_v47 = vpop.permute.xlu0 %3833 }
0x3e47   : > { %v3840_v48 = vmul.f32 %v8621_v38, %v3836_v39  ;;  %v3839_v50 = vmul.f32 %v8619_v36, %v3834_v47 }
0x3e49   : > { %3845 = vrot.lane.b32.xlu1 %v3840_v48, %s8847_s16  ;;  %3843 = vrot.lane.b32.xlu0 %v3839_v50, %s8847_s16 }
0x3ebb   : > { %v3846_v27 = vpop.permute.xlu1 %3845  ;;  %v3844_v6 = vpop.permute.xlu0 %3843 }
0x3ebc   : > { %v3850_v41 = vadd.f32 %v3846_v27, %v9665_v49  ;;  %v3849_v16 = vadd.f32 %v3844_v6, %v9667_v24 }
0x3ebe   : > { %8622 = vtanh.f32 %v3850_v41 }
0x3ebf   : > { %8624 = vtanh.f32 %v3849_v16 }
0x3ecb   : > { %v8623_v37 = vpop.eup %8622 }
0x3ecc   : > { %v8625_v17 = vpop.eup %8624  ;;  %3859 = vrot.lane.b32.xlu1 %v8623_v37, %s8850_s29 }
0x3ecd   : > { %3857 = vrot.lane.b32.xlu0 %v8625_v17, %s8850_s29 }
0x3f3e   : > { %v3860_v54 = vpop.permute.xlu1 %3859 }
0x3f3f   : > { %v3864_v60 = vmul.f32 %v3860_v54, %v3854_v0  ;;  %v3858_v61 = vpop.permute.xlu0 %3857 }
0x3f40   : > { %v3863_v55 = vmul.f32 %v3858_v61, %v3853_v58 }
0x3f41   : > { %v9860_v7 = vadd.f32 %v3870_v59, %v3864_v60 }
0x3f42   : > { %v9862_v21 = vadd.f32 %v3869_v51, %v3863_v55 }
0x3f43   : > { %v3884_v23 = vrot.slane %v9860_v7, 4  ;;  %v4012_v48 = vrot.slane %v9860_v7, 7 }
0x3f44   : > { %v3883_v43 = vrot.slane %v9862_v21, 5  ;;  %v4011_v6 = vrot.slane %v9862_v21, 7 }
0x3f46   : > { %v3885_v42 = vsel %vm792_vm8, %v3884_v23, %v3883_v43 }
0x3f47   : > { %3886 = vrot.lane.b32.xlu0 %v3885_v42, %s8850_s29 }
0x3fb9   : > { %v3887_v1 = vpop.permute.xlu0 %3886 }
0x3fba   : > { %8050 = vmatmul.mubr.msk.f32.vlgmr.msra.gmra.mxu0 %vm313_vm0, %v3887_v1 }
0x407a   : > { %v3956_v46 = vpop.f32.mrf.mxu0 }
0x407b   : > { %v3957_v15 = vadd.f32 %v9636_v9, %v3956_v46 }
0x407c   : > { %v8051_v2 = vpop.f32.mrf.mxu0 }
0x407d   : > { %v3961_v3 = vrot.slane %v3957_v15, 2  ;;  %v3962_v31 = vrot.slane %v3957_v15, 3 }
0x407f   : > { %3981 = vrot.lane.b32.xlu0 %v3962_v31, %s8847_s16  ;;  %3979 = vrot.lane.b32.xlu1 %v3961_v3, %s8847_s16  ;;  %v3965_v8 = vadd.f32 %v3961_v3, %v9667_v24  ;;  %v3966_v26 = vadd.f32 %v3962_v31, %v9665_v49 }
0x4081   : > { %v7481_v10 = vmul.f32 -1.442695, %v3965_v8  ;;  %v7482_v11 = vmul.f32 -1.442695, %v3966_v26 }
0x4083   : > { %8626 = vpow2.f32 %v7481_v10 }
0x4084   : > { %8628 = vpow2.f32 %v7482_v11 }
0x4090   : > { %v8627_v12 = vpop.eup %8626 }
0x4091   : > { %v8629_v13 = vpop.eup %8628  ;;  %v3973_v14 = vadd.f32 1.0, %v8627_v12 }
0x4092   : > { %v3974_v62 = vadd.f32 1.0, %v8629_v13 }
0x4093   : > { %8630 = vrcp.f32 %v3973_v14 }
0x4094   : > { %8632 = vrcp.f32 %v3974_v62 }
0x40a0   : > { %v8631_v22 = vpop.eup %8630 }
0x40a1   : > { %v8633_v63 = vpop.eup %8632  ;;  %v3999_v27 = vsub.f32 1.0, %v8631_v22  ;;  %v4015_v17 = vmul.f32 %v8631_v22, %v4011_v6 }
0x40a2   : > { %v4000_v47 = vsub.f32 1.0, %v8633_v63  ;;  %v4016_v41 = vmul.f32 %v8633_v63, %v4012_v48 }
0x40f1   : > { %v3982_v28 = vpop.permute.xlu0 %3981  ;;  %v3980_v32 = vpop.permute.xlu1 %3979 }
0x40f2   : > { %v3986_v5 = vmul.f32 %v8633_v63, %v3982_v28  ;;  %v3985_v33 = vmul.f32 %v8631_v22, %v3980_v32 }
0x40f4   : > { %3991 = vrot.lane.b32.xlu0 %v3986_v5, %s8847_s16  ;;  %3989 = vrot.lane.b32.xlu1 %v3985_v33, %s8847_s16 }
0x4166   : > { %v3992_v52 = vpop.permute.xlu0 %3991  ;;  %v3990_v34 = vpop.permute.xlu1 %3989 }
0x4167   : > { %v3996_v35 = vadd.f32 %v3992_v52, %v9665_v49  ;;  %v3995_v36 = vadd.f32 %v3990_v34, %v9667_v24 }
0x4169   : > { %8634 = vtanh.f32 %v3996_v35 }
0x416a   : > { %8636 = vtanh.f32 %v3995_v36 }
0x4176   : > { %v8635_v38 = vpop.eup %8634 }
0x4177   : > { %v8637_v39 = vpop.eup %8636  ;;  %4005 = vrot.lane.b32.xlu0 %v8635_v38, %s8850_s29 }
0x4178   : > { %4003 = vrot.lane.b32.xlu1 %v8637_v39, %s8850_s29 }
0x41e9   : > { %v4006_v50 = vpop.permute.xlu0 %4005 }
0x41ea   : > { %v4010_v16 = vmul.f32 %v4006_v50, %v4000_v47  ;;  %v4004_v37 = vpop.permute.xlu1 %4003 }
0x41eb   : > { %v4009_v0 = vmul.f32 %v4004_v37, %v3999_v27 }
0x41ec   : > { %v9882_v53 = vadd.f32 %v4016_v41, %v4010_v16 }
0x41ed   : > { %v9884_v54 = vadd.f32 %v4015_v17, %v4009_v0 }
0x41ee   : > { %v4030_v58 = vrot.slane %v9882_v53, 5  ;;  %v4158_v52 = vrot.slane %v9882_v53, 7 }
0x41ef   : > { %v4029_v29 = vrot.slane %v9884_v54, 6 }
0x41f1   : > { %v4031_v59 = vsel %vm792_vm8, %v4030_v58, %v4029_v29  ;;  %vm7144_vm8 = vcmask 228352  }
0x41f2   : > { %4032 = vrot.lane.b32.xlu1 %v4031_v59, %s8850_s29 }
0x4264   : > { %v4033_v60 = vpop.permute.xlu1 %4032 }
0x4265   : > { %8061 = vmatmul.mubr.msk.f32.vlgmr.msra.gmra.mxu1 %vm313_vm0, %v4033_v60 }
0x4325   : > { %v4102_v61 = vpop.f32.mrf.mxu1 }
0x4326   : > { %v4103_v51 = vadd.f32 %v9636_v9, %v4102_v61 }
0x4327   : > { %v8062_v55 = vpop.f32.mrf.mxu1 }
0x4328   : > { %v4107_v23 = vrot.slane %v4103_v51, 1  ;;  %v4108_v43 = vrot.slane %v4103_v51, 2  ;;  %v4356_v51 = vld [vmem:[#allocation3 + $0x90] sm:$0xff]  ;;  %v4355_v55 = vld [vmem:[#allocation3 + $0x88] sm:$0xff] }
0x432a   : > { %4127 = vrot.lane.b32.xlu1 %v4108_v43, %s8847_s16  ;;  %4125 = vrot.lane.b32.xlu0 %v4107_v23, %s8847_s16  ;;  %v4111_v42 = vadd.f32 %v4107_v23, %v9667_v24  ;;  %v4112_v1 = vadd.f32 %v4108_v43, %v9665_v49  ;;  %v4354_v23 = vld [vmem:[#allocation3 + $0x80] sm:$0xff]  ;;  %v7486_v43 = vld [vmem:[%s10456_s5 + $0x9] ss:$0 sm:$0xff] }
0x432c   : > { %v7484_v46 = vmul.f32 -1.442695, %v4111_v42  ;;  %v7485_v15 = vmul.f32 -1.442695, %v4112_v1  ;;  %v7489_v42 = vld [vmem:[%s10456_s5 + $0xa] ss:$0 sm:$0xff] }
0x432e   : > { %8638 = vpow2.f32 %v7484_v46 }
0x432f   : > { %8640 = vpow2.f32 %v7485_v15 }
0x433b   : > { %v8639_v2 = vpop.eup %8638 }
0x433c   : > { %v8641_v3 = vpop.eup %8640  ;;  %v4119_v31 = vadd.f32 1.0, %v8639_v2 }
0x433d   : > { %v4120_v8 = vadd.f32 1.0, %v8641_v3 }
0x433e   : > { %8642 = vrcp.f32 %v4119_v31 }
0x433f   : > { %8644 = vrcp.f32 %v4120_v8 }
0x434b   : > { %v8643_v9 = vpop.eup %8642 }
0x434c   : > { %v9896_v26 = vpop.eup %8644 }
0x434d   : > { %v4162_v39 = vmul.f32 %v9896_v26, %v4158_v52 }
0x439c   : > { %v4128_v10 = vpop.permute.xlu1 %4127  ;;  %v4126_v11 = vpop.permute.xlu0 %4125 }
0x439d   : > { %v4132_v12 = vmul.f32 %v9896_v26, %v4128_v10  ;;  %v4131_v13 = vmul.f32 %v8643_v9, %v4126_v11  ;;  %v7492_v10 = vld [vmem:[%s10456_s5 + $0xb] ss:$0 sm:$0xff] }
0x439f   : > { %4137 = vrot.lane.b32.xlu1 %v4132_v12, %s8847_s16  ;;  %4135 = vrot.lane.b32.xlu0 %v4131_v13, %s8847_s16  ;;  %s8860_s16 = smov 12  }
0x4411   : > { %v4138_v14 = vpop.permute.xlu1 %4137  ;;  %v4136_v62 = vpop.permute.xlu0 %4135 }
0x4412   : > { %v4142_v22 = vadd.f32 %v4138_v14, %v9665_v49  ;;  %v4141_v63 = vadd.f32 %v4136_v62, %v9667_v24  ;;  %v4181_v49 = vld [vmem:[#allocation3 + $0x58] sm:$0xff] }
0x4413   : > { %8063 = vmatprep.subr.mxu0 %v4181_v49  ;;  %v4272_v24 = vld [vmem:[#allocation3 + $0x78] sm:$0xff] }
0x4414   : > { %8646 = vtanh.f32 %v4142_v22  ;;  %8064 = vmatpush3.msra.mxu0 %v4181_v49  ;;  %8074 = vmatprep.subr.mxu1 %v4272_v24 }
0x4415   : > { %8648 = vtanh.f32 %v4141_v63  ;;  %8075 = vmatpush3.msra.mxu1 %v4272_v24 }
0x4421   : > { %v8647_v28 = vpop.eup %8646 }
0x4422   : > { %v8649_v32 = vpop.eup %8648  ;;  %4151 = vrot.lane.b32.xlu1 %v8647_v28, %s8850_s29 }
0x4423   : > { %4149 = vrot.lane.b32.xlu0 %v8649_v32, %s8850_s29 }
0x4426   : > { %3292 = vrot.lane.b32.xlu1 %v9734_v44, %s8850_s29  ;;  %v4271_v44 = vld [vmem:[#allocation3 + $0x70] sm:$0xff] }
0x4427   : > { %3149 = vrot.lane.b32.xlu0 %v9706_v30, %s8850_s29  ;;  %v4180_v30 = vld [vmem:[#allocation3 + $0x50] sm:$0xff]  ;;  %8076 = vmatprep.subr.mxu1 %v4271_v44 }
0x4428   : > { %8065 = vmatprep.subr.mxu0 %v4180_v30  ;;  %8077 = vmatpush3.msra.mxu1 %v4271_v44 }
0x4429   : > { %8066 = vmatpush3.msra.mxu0 %v4180_v30 }
0x442a   : > { %3583 = vrot.lane.b32.xlu1 %v9800_v20, %s8850_s29 }
0x442b   : > { %3437 = vrot.lane.b32.xlu0 %v9768_v45, %s8850_s29  ;;  %v4157_v45 = vrot.slane %v9884_v54, 7 }
0x442d   : > { %v4161_v5 = vmul.f32 %v8643_v9, %v4157_v45 }
0x442e   : > { %3875 = vrot.lane.b32.xlu1 %v9862_v21, %s8850_s29  ;;  %v4146_v21 = vsub.f32 1.0, %v9896_v26 }
0x442f   : > { %3729 = vrot.lane.b32.xlu0 %v9831_v4, %s8850_s29  ;;  %v4269_v4 = vld [vmem:[#allocation3 + $0x60] sm:$0xff] }
0x4432   : > { %3294 = vrot.lane.b32.xlu1 %v9736_v57, %s8850_s29 }
0x4433   : > { %4021 = vrot.lane.b32.xlu0 %v9884_v54, %s8850_s29 }
0x4436   : > { %3585 = vrot.lane.b32.xlu1 %v9798_v19, %s8850_s29  ;;  %v4270_v19 = vld [vmem:[#allocation3 + $0x68] sm:$0xff] }
0x4437   : > { %3151 = vrot.lane.b32.xlu0 %v9703_v18, %s8850_s29  ;;  %v4179_v18 = vld [vmem:[#allocation3 + $0x48] sm:$0xff]  ;;  %8078 = vmatprep.subr.mxu1 %v4270_v19 }
0x4438   : > { %8067 = vmatprep.subr.mxu0 %v4179_v18  ;;  %8079 = vmatpush3.msra.mxu1 %v4270_v19 }
0x4439   : > { %8068 = vmatpush3.msra.mxu0 %v4179_v18  ;;  %8080 = vmatprep.subr.mxu1 %v4269_v4 }
0x443a   : > { %3877 = vrot.lane.b32.xlu1 %v9860_v7, %s8850_s29  ;;  %v4357_v7 = vld [vmem:[#allocation3 + $0x98] sm:$0xff]  ;;  %8081 = vmatpush3.msra.mxu1 %v4269_v4 }
0x443b   : > { %3439 = vrot.lane.b32.xlu0 %v9766_v40, %s8850_s29  ;;  %v4145_v40 = vsub.f32 1.0, %v8643_v9  ;;  %8096 = vmatprep.subr.mxu1 %v8848_v25 }
0x443f   : > { %3731 = vrot.lane.b32.xlu0 %v9829_v56, %s8850_s29  ;;  %v4178_v56 = vld [vmem:[#allocation3 + $0x40] sm:$0xff] }
0x4440   : > { %8069 = vmatprep.subr.mxu0 %v4178_v56 }
0x4441   : > { %8070 = vmatpush3.msra.mxu0 %v4178_v56 }
0x4442   : > { %8085 = vmatprep.subr.mxu0 %v4357_v7 }
0x4443   : > { %4023 = vrot.lane.b32.xlu0 %v9882_v53, %s8850_s29 }
0x4494   : > { %v4152_v57 = vpop.permute.xlu1 %4151 }
0x4495   : > { %v4150_v20 = vpop.permute.xlu0 %4149  ;;  %v4156_v34 = vmul.f32 %v4152_v57, %v4146_v21 }
0x4496   : > { %v4155_v33 = vmul.f32 %v4150_v20, %v4145_v40 }
0x4497   : > { %v4164_v47 = vadd.f32 %v4162_v39, %v4156_v34 }
0x4498   : > { %v4163_v35 = vadd.f32 %v4161_v5, %v4155_v33  ;;  %v3293_v36 = vpop.permute.xlu1 %3292 }
0x4499   : > { %3298 = vst.msk [vmem:[#allocation2] sm:$0x2] %vm933_vm9, %v3293_v36  ;;  %v3150_v38 = vpop.permute.xlu0 %3149 }
0x449a   : > { %3155 = vst.msk [vmem:[#allocation2] sm:$0x1] %vm788_vm10, %v3150_v38  ;;  %4167 = vrot.lane.b32.xlu1 %v4163_v35, %s8850_s29 }
0x449c   : > { %v3584_v48 = vpop.permute.xlu1 %3583 }
0x449d   : > { %3589 = vst.msk [vmem:[#allocation2] sm:$0x8] %vm1226_vm11, %v3584_v48  ;;  %v3438_v50 = vpop.permute.xlu0 %3437 }
0x449e   : > { %3443 = vst.msk [vmem:[#allocation2] sm:$0x4] %vm1079_vm12, %v3438_v50  ;;  %4169 = vrot.lane.b32.xlu1 %v4164_v47, %s8850_s29  ;;  %s8853_s29 = smov 116  }
0x44a0   : > { %v3876_v27 = vpop.permute.xlu1 %3875 }
0x44a1   : > { %3881 = vst.msk [vmem:[#allocation2] sm:$0x20] %vm1520_vm13, %v3876_v27  ;;  %v3730_v6 = vpop.permute.xlu0 %3729 }
0x44a2   : > { %3735 = vst.msk [vmem:[#allocation2] sm:$0x10] %vm1373_vm14, %v3730_v6 }
0x44a4   : > { %v3295_v41 = vpop.permute.xlu1 %3294 }
0x44a5   : > { %3299 = vst.msk [vmem:[#allocation2 + $0x8] sm:$0x2] %vm933_vm9, %v3295_v41  ;;  %v4022_v16 = vpop.permute.xlu0 %4021 }
0x44a6   : > { %4027 = vst.msk [vmem:[#allocation2] sm:$0x40] %vm1667_vm15, %v4022_v16 }
0x44a8   : > { %v3586_v37 = vpop.permute.xlu1 %3585 }
0x44a9   : > { %3590 = vst.msk [vmem:[#allocation2 + $0x8] sm:$0x8] %vm1226_vm11, %v3586_v37  ;;  %v3152_v17 = vpop.permute.xlu0 %3151 }
0x44aa   : > { %3156 = vst.msk [vmem:[#allocation2 + $0x8] sm:$0x1] %vm788_vm10, %v3152_v17 }
0x44ac   : > { %v3878_v0 = vpop.permute.xlu1 %3877 }
0x44ad   : > { %3882 = vst.msk [vmem:[#allocation2 + $0x8] sm:$0x20] %vm1520_vm13, %v3878_v0  ;;  %v3440_v53 = vpop.permute.xlu0 %3439 }
0x44ae   : > { %3444 = vst.msk [vmem:[#allocation2 + $0x8] sm:$0x4] %vm1079_vm12, %v3440_v53 }
0x44b1   : > { %v3732_v54 = vpop.permute.xlu0 %3731 }
0x44b2   : > { %3736 = vst.msk [vmem:[#allocation2 + $0x8] sm:$0x10] %vm1373_vm14, %v3732_v54 }
0x44b5   : > { %v4024_v58 = vpop.permute.xlu0 %4023 }
0x44b6   : > { %4028 = vst.msk [vmem:[#allocation2 + $0x8] sm:$0x40] %vm1667_vm15, %v4024_v58 }
0x450c   : > { %v4168_v29 = vpop.permute.xlu1 %4167 }
0x450d   : > { %4173 = vst.msk [vmem:[#allocation2] sm:$0x80] %vm1814_vm1, %v4168_v29 }
0x4510   : > { %v4170_v59 = vpop.permute.xlu1 %4169 }
0x4511   : > { %4174 = vst.msk [vmem:[#allocation2 + $0x8] sm:$0x80] %vm1814_vm1, %v4170_v59 }
0x4514   : > { %v4175_v60 = vld [vmem:[#allocation2] sm:$0xff] }
0x4515   : > { %8071 = vmatprep.mubr.msk.f32.mxu0 %vm313_vm0, %v4175_v60  ;;  %8082 = vmatprep.mubr.msk.f32.mxu1 %vm313_vm0, %v4175_v60 }
0x4518   : > { %v4176_v61 = vld [vmem:[#allocation2 + $0x8] sm:$0xff] }
0x4519   : > { %8072 = vmatmul.mubr.msk.f32.vlgmr.msra.gmra.mxu0 %vm313_vm0, %v4176_v61  ;;  %8083 = vmatmul.mubr.msk.f32.vlgmr.msra.gmra.mxu1 %vm313_vm0, %v4176_v61 }
0x451a   : > { %8086 = vmatpush3.msra.mxu0 %v4357_v7  ;;  %8093 = vmatprep.mubr.msk.f32.mxu0 %vm313_vm0, %v4175_v60 }
0x451b   : > { %8087 = vmatprep.subr.mxu0 %v4356_v51  ;;  %8098 = vmatprep.mubr.msk.f32.mxu1 %vm8849_vm7, %v8848_v25 }
0x451c   : > { %8088 = vmatpush3.msra.mxu0 %v4356_v51 }
0x451d   : > { %8089 = vmatprep.subr.mxu0 %v4355_v55 }
0x451e   : > { %8090 = vmatpush3.msra.mxu0 %v4355_v55 }
0x451f   : > { %8091 = vmatprep.subr.mxu0 %v4354_v23 }
0x4520   : > { %8092 = vmatpush3.msra.mxu0 %v4354_v23 }
0x4521   : > { %8094 = vmatmul.mubr.msk.f32.vlgmr.msra.gmra.mxu0 %vm313_vm0, %v4176_v61  ;;  %8116 = vmatprep.subr.mxu0 %v8848_v25 }
0x4522   : > { %8118 = vmatprep.mubr.msk.f32.mxu0 %vm8849_vm7, %v8848_v25 }
0x45d9   : > { %v8073_v1 = vpop.f32.mrf.mxu0  ;;  %v8084_v46 = vpop.f32.mrf.mxu1 }
0x45da   : > { %v4265_v15 = vadd.f32 %v8073_v1, %v7486_v43  ;;  %v4350_v2 = vadd.f32 %v8084_v46, %v7489_v42 }
0x45db   : > { %v4344_v3 = vpop.f32.mrf.mxu1  ;;  %v4259_v31 = vpop.f32.mrf.mxu0 }
0x45dc   : > { %v4345_v8 = vadd.f32 %v7489_v42, %v4344_v3  ;;  %4442 = vrot.lane.b32.xlu1 %v4265_v15, %s8851_s26  ;;  %4472 = vrot.lane.b32.xlu0 %v4350_v2, %s8851_s26  ;;  %v4260_v9 = vadd.f32 %v7486_v43, %v4259_v31 }
0x45de   : > { %8097 = vmatpush3.xpose.msk.msra.mxu1 %vm4542_vm2, %v4345_v8 }
0x45df   : > { %8101 = vmatprep.subr.mxu1 %v8848_v25 }
0x45e0   : > { %4476 = vrot.lane.b32.xlu1 %v4350_v2, %s8852_s28  ;;  %4470 = vrot.lane.b32.xlu0 %v4345_v8, %s8851_s26 }
0x45e1   : > { %8099 = vmatmul.mubr.msk.f32.vlgmr.msra.gmra.mxu1 %vm4542_vm2, %v4260_v9  ;;  %v8095_v26 = vpop.f32.mrf.mxu0 }
0x45e2   : > { %8102 = vmatpush3.xpose.msk.msra.mxu1 %vm4542_vm2, %v4350_v2  ;;  %8103 = vmatprep.mubr.msk.f32.mxu1 %vm8849_vm7, %v8848_v25  ;;  %v10014_v11 = vadd.f32 %v8095_v26, %v7492_v10 }
0x45e3   : > { %8106 = vmatprep.subr.mxu1 %v8848_v25  ;;  %v4429_v12 = vpop.f32.mrf.mxu0 }
0x45e4   : > { %4446 = vrot.lane.b32.xlu1 %v4265_v15, %s8852_s28  ;;  %4474 = vrot.lane.b32.xlu0 %v4345_v8, %s8852_s28  ;;  %v10020_v13 = vadd.f32 %v7492_v10, %v4429_v12 }
0x45e5   : > { %8104 = vmatmul.mubr.msk.f32.vlgmr.msra.gmra.mxu1 %vm4542_vm2, %v4265_v15 }
0x45e6   : > { %8108 = vmatprep.mubr.msk.f32.mxu1 %vm8849_vm7, %v8848_v25 }
0x45e8   : > { %4480 = vrot.lane.b32.xlu1 %v4350_v2, %s8853_s29  ;;  %4444 = vrot.lane.b32.xlu0 %v4260_v9, %s8852_s28 }
0x45ec   : > { %4450 = vrot.lane.b32.xlu1 %v4265_v15, %s8853_s29  ;;  %4478 = vrot.lane.b32.xlu0 %v4345_v8, %s8853_s29 }
0x45f0   : > { %4484 = vrot.lane.b32.xlu1 %v4350_v2, %s8854_s9  ;;  %4448 = vrot.lane.b32.xlu0 %v4260_v9, %s8853_s29 }
0x45f4   : > { %4440 = vrot.lane.b32.xlu1 %v4260_v9, %s8851_s26  ;;  %4482 = vrot.lane.b32.xlu0 %v4345_v8, %s8854_s9 }
0x45f8   : > { %4454 = vrot.lane.b32.xlu1 %v4265_v15, %s8854_s9  ;;  %4452 = vrot.lane.b32.xlu0 %v4260_v9, %s8854_s9 }
0x45fc   : > { %4488 = vrot.lane.b32.xlu1 %v4350_v2, %s8855_s10  ;;  %4486 = vrot.lane.b32.xlu0 %v4345_v8, %s8855_s10 }
0x4600   : > { %4458 = vrot.lane.b32.xlu1 %v4265_v15, %s8855_s10  ;;  %4456 = vrot.lane.b32.xlu0 %v4260_v9, %s8855_s10 }
0x4604   : > { %4492 = vrot.lane.b32.xlu1 %v4350_v2, %s8856_s11  ;;  %4490 = vrot.lane.b32.xlu0 %v4345_v8, %s8856_s11 }
0x4608   : > { %4462 = vrot.lane.b32.xlu1 %v4265_v15, %s8856_s11  ;;  %4460 = vrot.lane.b32.xlu0 %v4260_v9, %s8856_s11 }
0x460c   : > { %4496 = vrot.lane.b32.xlu1 %v4350_v2, %s8857_s12  ;;  %4494 = vrot.lane.b32.xlu0 %v4345_v8, %s8857_s12 }
0x4610   : > { %4466 = vrot.lane.b32.xlu1 %v4265_v15, %s8857_s12  ;;  %4464 = vrot.lane.b32.xlu0 %v4260_v9, %s8857_s12 }
0x4614   : > { %4508 = vrot.lane.b32.xlu1 %v10014_v11, %s8852_s28  ;;  %4502 = vrot.lane.b32.xlu0 %v10014_v11, %s8851_s26 }
0x4618   : > { %4514 = vrot.lane.b32.xlu1 %v10014_v11, %s8853_s29  ;;  %4512 = vrot.lane.b32.xlu0 %v10020_v13, %s8853_s29  ;;  %s8865_s29 = smov [#allocation8]  }
0x461c   : > { %4520 = vrot.lane.b32.xlu1 %v10014_v11, %s8854_s9  ;;  %4518 = vrot.lane.b32.xlu0 %v10020_v13, %s8854_s9  ;;  %s273_s9 = sand.u32 1, %s8832_s22  }
0x4620   : > { %4500 = vrot.lane.b32.xlu1 %v10020_v13, %s8851_s26  ;;  %s8864_s26 = smov 28  }
0x4624   : > { %4506 = vrot.lane.b32.xlu1 %v10020_v13, %s8852_s28  ;;  %s10410_s28 = scalar_lea.sflag [#allocation5], %s273_s9 }
0x464e   : > { %v4443_v14 = vpop.permute.xlu1 %4442  ;;  %v4473_v62 = vpop.permute.xlu0 %4472 }
0x4652   : > { %v4477_v22 = vpop.permute.xlu1 %4476  ;;  %v4471_v63 = vpop.permute.xlu0 %4470 }
0x4653   : > { %8107 = vmatpush3.xpose.msk.msra.mxu1 %vm4542_vm2, %v4471_v63 }
0x4654   : > { %8111 = vmatprep.subr.mxu1 %v8848_v25 }
0x4656   : > { %v4447_v28 = vpop.permute.xlu1 %4446  ;;  %v4475_v32 = vpop.permute.xlu0 %4474 }
0x4657   : > { %8117 = vmatpush3.xpose.msk.msra.mxu0 %vm4542_vm2, %v4475_v32 }
0x4658   : > { %8126 = vmatprep.subr.mxu0 %v8848_v25 }
0x465a   : > { %v4481_v49 = vpop.permute.xlu1 %4480  ;;  %v4445_v24 = vpop.permute.xlu0 %4444 }
0x465b   : > { %8119 = vmatmul.mubr.msk.f32.vlgmr.msra.gmra.mxu0 %vm4542_vm2, %v4445_v24 }
0x465c   : > { %8128 = vmatprep.mubr.msk.f32.mxu0 %vm8849_vm7, %v8848_v25 }
0x465e   : > { %v4451_v30 = vpop.permute.xlu1 %4450  ;;  %v4479_v44 = vpop.permute.xlu0 %4478 }
0x465f   : > { %8127 = vmatpush3.xpose.msk.msra.mxu0 %vm4542_vm2, %v4479_v44 }
0x4660   : > { %8136 = vmatprep.subr.mxu0 %v8848_v25 }
0x4662   : > { %v4485_v18 = vpop.permute.xlu1 %4484  ;;  %v4449_v57 = vpop.permute.xlu0 %4448 }
0x4663   : > { %8129 = vmatmul.mubr.msk.f32.vlgmr.msra.gmra.mxu0 %vm4542_vm2, %v4449_v57 }
0x4664   : > { %8138 = vmatprep.mubr.msk.f32.mxu0 %vm8849_vm7, %v8848_v25 }
0x4666   : > { %v4441_v40 = vpop.permute.xlu1 %4440  ;;  %v4483_v45 = vpop.permute.xlu0 %4482 }
0x4667   : > { %8109 = vmatmul.mubr.msk.f32.vlgmr.msra.gmra.mxu1 %vm4542_vm2, %v4441_v40  ;;  %8137 = vmatpush3.xpose.msk.msra.mxu0 %vm4542_vm2, %v4483_v45 }
0x4668   : > { %8112 = vmatpush3.xpose.msk.msra.mxu1 %vm4542_vm2, %v4473_v62  ;;  %8113 = vmatprep.mubr.msk.f32.mxu1 %vm8849_vm7, %v8848_v25 }
0x4669   : > { %8121 = vmatprep.subr.mxu1 %v8848_v25  ;;  %8146 = vmatprep.subr.mxu0 %v8848_v25 }
0x466a   : > { %v4455_v19 = vpop.permute.xlu1 %4454  ;;  %v4453_v20 = vpop.permute.xlu0 %4452 }
0x466b   : > { %8114 = vmatmul.mubr.msk.f32.vlgmr.msra.gmra.mxu1 %vm4542_vm2, %v4443_v14  ;;  %8139 = vmatmul.mubr.msk.f32.vlgmr.msra.gmra.mxu0 %vm4542_vm2, %v4453_v20 }
0x466c   : > { %8122 = vmatpush3.xpose.msk.msra.mxu1 %vm4542_vm2, %v4477_v22  ;;  %8123 = vmatprep.mubr.msk.f32.mxu1 %vm8849_vm7, %v8848_v25 }
0x466d   : > { %8131 = vmatprep.subr.mxu1 %v8848_v25  ;;  %8148 = vmatprep.mubr.msk.f32.mxu0 %vm8849_vm7, %v8848_v25 }
0x466e   : > { %v4489_v56 = vpop.permute.xlu1 %4488  ;;  %v4487_v4 = vpop.permute.xlu0 %4486 }
0x466f   : > { %8124 = vmatmul.mubr.msk.f32.vlgmr.msra.gmra.mxu1 %vm4542_vm2, %v4447_v28  ;;  %8147 = vmatpush3.xpose.msk.msra.mxu0 %vm4542_vm2, %v4487_v4 }
0x4670   : > { %8132 = vmatpush3.xpose.msk.msra.mxu1 %vm4542_vm2, %v4481_v49  ;;  %8133 = vmatprep.mubr.msk.f32.mxu1 %vm8849_vm7, %v8848_v25 }
0x4671   : > { %8141 = vmatprep.subr.mxu1 %v8848_v25  ;;  %8156 = vmatprep.subr.mxu0 %v8848_v25 }
0x4672   : > { %v4459_v7 = vpop.permute.xlu1 %4458  ;;  %v4457_v21 = vpop.permute.xlu0 %4456 }
0x4673   : > { %8134 = vmatmul.mubr.msk.f32.vlgmr.msra.gmra.mxu1 %vm4542_vm2, %v4451_v30  ;;  %8149 = vmatmul.mubr.msk.f32.vlgmr.msra.gmra.mxu0 %vm4542_vm2, %v4457_v21 }
0x4674   : > { %8142 = vmatpush3.xpose.msk.msra.mxu1 %vm4542_vm2, %v4485_v18  ;;  %8143 = vmatprep.mubr.msk.f32.mxu1 %vm8849_vm7, %v8848_v25 }
0x4675   : > { %8151 = vmatprep.subr.mxu1 %v8848_v25  ;;  %8158 = vmatprep.mubr.msk.f32.mxu0 %vm8849_vm7, %v8848_v25 }
0x4676   : > { %v4493_v5 = vpop.permute.xlu1 %4492  ;;  %v4491_v33 = vpop.permute.xlu0 %4490 }
0x4677   : > { %8144 = vmatmul.mubr.msk.f32.vlgmr.msra.gmra.mxu1 %vm4542_vm2, %v4455_v19  ;;  %8157 = vmatpush3.xpose.msk.msra.mxu0 %vm4542_vm2, %v4491_v33 }
0x4678   : > { %8152 = vmatpush3.xpose.msk.msra.mxu1 %vm4542_vm2, %v4489_v56  ;;  %8153 = vmatprep.mubr.msk.f32.mxu1 %vm8849_vm7, %v8848_v25 }
0x4679   : > { %8161 = vmatprep.subr.mxu1 %v8848_v25  ;;  %8166 = vmatprep.subr.mxu0 %v8848_v25 }
0x467a   : > { %v4463_v52 = vpop.permute.xlu1 %4462  ;;  %v4461_v34 = vpop.permute.xlu0 %4460 }
0x467b   : > { %8154 = vmatmul.mubr.msk.f32.vlgmr.msra.gmra.mxu1 %vm4542_vm2, %v4459_v7  ;;  %8159 = vmatmul.mubr.msk.f32.vlgmr.msra.gmra.mxu0 %vm4542_vm2, %v4461_v34 }
0x467c   : > { %8162 = vmatpush3.xpose.msk.msra.mxu1 %vm4542_vm2, %v4493_v5  ;;  %8163 = vmatprep.mubr.msk.f32.mxu1 %vm8849_vm7, %v8848_v25 }
0x467d   : > { %8171 = vmatprep.subr.mxu1 %v8848_v25  ;;  %8168 = vmatprep.mubr.msk.f32.mxu0 %vm8849_vm7, %v8848_v25 }
0x467e   : > { %v4497_v35 = vpop.permute.xlu1 %4496  ;;  %v4495_v36 = vpop.permute.xlu0 %4494 }
0x467f   : > { %8164 = vmatmul.mubr.msk.f32.vlgmr.msra.gmra.mxu1 %vm4542_vm2, %v4463_v52  ;;  %8167 = vmatpush3.xpose.msk.msra.mxu0 %vm4542_vm2, %v4495_v36 }
0x4680   : > { %8172 = vmatpush3.xpose.msk.msra.mxu1 %vm4542_vm2, %v4497_v35  ;;  %8176 = vmatprep.subr.mxu0 %v8848_v25 }
0x4681   : > { %8173 = vmatprep.mubr.msk.f32.mxu1 %vm8849_vm7, %v8848_v25  ;;  %8181 = vmatprep.subr.mxu1 %v8848_v25 }
0x4682   : > { %v4467_v38 = vpop.permute.xlu1 %4466  ;;  %v4465_v39 = vpop.permute.xlu0 %4464 }
0x4683   : > { %8169 = vmatmul.mubr.msk.f32.vlgmr.msra.gmra.mxu0 %vm4542_vm2, %v4465_v39  ;;  %8174 = vmatmul.mubr.msk.f32.vlgmr.msra.gmra.mxu1 %vm4542_vm2, %v4467_v38 }
0x4684   : > { %8177 = vmatpush3.msra.mxu0 %v10020_v13  ;;  %8182 = vmatpush3.msra.mxu1 %v10014_v11 }
0x4685   : > { %8178 = vmatprep.mubr.msk.f32.mxu0 %vm8849_vm7, %v8848_v25  ;;  %8183 = vmatprep.mubr.msk.f32.mxu1 %vm8849_vm7, %v8848_v25 }
0x4686   : > { %8186 = vmatprep.subr.mxu0 %v8848_v25  ;;  %8191 = vmatprep.subr.mxu1 %v8848_v25  ;;  %v10172_v20 = vpop.permute.xlu1 %4508  ;;  %v10176_v4 = vpop.permute.xlu0 %4502 }
0x468a   : > { %v10174_v56 = vpop.permute.xlu1 %4514  ;;  %v10182_v21 = vpop.permute.xlu0 %4512 }
0x468e   : > { %v10178_v7 = vpop.permute.xlu1 %4520  ;;  %v10190_v33 = vpop.permute.xlu0 %4518 }
0x4692   : > { %v10184_v5 = vpop.permute.xlu1 %4500 }
0x4696   : > { %v10192_v52 = vpop.permute.xlu1 %4506 }
0x46a1   : > { %v10108_v47 = vpop.f32.mrf.mxu1 }
0x46a2   : > { %v5728_v48 = vsel %vm5727_vm3, %v10108_v47, -inf }
0x46a3   : > { %5729 = vmax.xlane.f32.xlu0 %v5728_v48  ;;  %v8100_v50 = vpop.f32.mrf.mxu1 }
0x46a5   : > { %v10112_v27 = vpop.f32.mrf.mxu1 }
0x46a6   : > { %v5731_v6 = vsel %vm5727_vm3, %v10112_v27, -inf }
0x46a7   : > { %5732 = vmax.xlane.f32.xlu1 %v5731_v6  ;;  %v8105_v41 = vpop.f32.mrf.mxu1 }
0x471b   : > { %v10116_v16 = vpop.f32.mrf.mxu0 }
0x471c   : > { %v5740_v37 = vsel %vm5727_vm3, %v10116_v16, -inf }
0x471d   : > { %v8120_v17 = vpop.f32.mrf.mxu0  ;;  %5741 = vmax.xlane.f32.xlu1 %v5740_v37 }
0x4723   : > { %v10120_v0 = vpop.f32.mrf.mxu0 }
0x4724   : > { %v5746_v53 = vsel %vm5727_vm3, %v10120_v0, -inf }
0x4725   : > { %v8130_v54 = vpop.f32.mrf.mxu0  ;;  %5747 = vmax.xlane.f32.xlu1 %v5746_v53 }
0x4727   : > { %v10124_v58 = vpop.f32.mrf.mxu1 }
0x4728   : > { %v5734_v29 = vsel %vm5727_vm3, %v10124_v58, -inf }
0x4729   : > { %5735 = vmax.xlane.f32.xlu0 %v5734_v29  ;;  %v8110_v59 = vpop.f32.mrf.mxu1 }
0x472b   : > { %v10128_v60 = vpop.f32.mrf.mxu1  ;;  %v10130_v61 = vpop.f32.mrf.mxu0 }
0x472c   : > { %v5752_v51 = vsel %vm5727_vm3, %v10130_v61, -inf  ;;  %v5737_v55 = vsel %vm5727_vm3, %v10128_v60, -inf  ;;  %v5730_v34 = vpop.xlane.xlu0 %5729 }
0x472d   : > { %v8140_v23 = vpop.f32.mrf.mxu0  ;;  %5753 = vmax.xlane.f32.xlu1 %v5752_v51  ;;  %5738 = vmax.xlane.f32.xlu0 %v5737_v55  ;;  %v8115_v43 = vpop.f32.mrf.mxu1  ;;  %v5776_v36 = vsub.f32 %v10108_v47, %v5730_v34 }
0x472f   : > { %v10136_v42 = vpop.f32.mrf.mxu1  ;;  %v5792_v39 = vmul.f32 1.442695, %v5776_v36 }
0x4730   : > { %v5743_v1 = vsel %vm5727_vm3, %v10136_v42, -inf  ;;  %v5733_v35 = vpop.xlane.xlu1 %5732 }
0x4731   : > { %5744 = vmax.xlane.f32.xlu0 %v5743_v1  ;;  %v8125_v46 = vpop.f32.mrf.mxu1  ;;  %v5777_v38 = vsub.f32 %v10112_v27, %v5733_v35  ;;  %8650 = vpow2.f32 %v5792_v39 }
0x4733   : > { %v10140_v15 = vpop.f32.mrf.mxu1  ;;  %v10142_v2 = vpop.f32.mrf.mxu0  ;;  %v5794_v48 = vmul.f32 1.442695, %v5777_v38 }
0x4734   : > { %v5758_v3 = vsel %vm5727_vm3, %v10142_v2, -inf  ;;  %v5749_v31 = vsel %vm5727_vm3, %v10140_v15, -inf }
0x4735   : > { %v8150_v8 = vpop.f32.mrf.mxu0  ;;  %5759 = vmax.xlane.f32.xlu1 %v5758_v3  ;;  %5750 = vmax.xlane.f32.xlu0 %v5749_v31  ;;  %v8135_v9 = vpop.f32.mrf.mxu1  ;;  %8652 = vpow2.f32 %v5794_v48 }
0x4737   : > { %v10148_v26 = vpop.f32.mrf.mxu1 }
0x4738   : > { %v5755_v10 = vsel %vm5727_vm3, %v10148_v26, -inf }
0x4739   : > { %5756 = vmax.xlane.f32.xlu0 %v5755_v10  ;;  %v8145_v12 = vpop.f32.mrf.mxu1 }
0x473b   : > { %v10152_v14 = vpop.f32.mrf.mxu1  ;;  %v10154_v62 = vpop.f32.mrf.mxu0 }
0x473c   : > { %v5764_v22 = vsel %vm5727_vm3, %v10154_v62, -inf  ;;  %v5761_v63 = vsel %vm5727_vm3, %v10152_v14, -inf }
0x473d   : > { %v8160_v28 = vpop.f32.mrf.mxu0  ;;  %5765 = vmax.xlane.f32.xlu1 %v5764_v22  ;;  %5762 = vmax.xlane.f32.xlu0 %v5761_v63  ;;  %v8155_v32 = vpop.f32.mrf.mxu1 }
0x473e   : > { %v10198_v50 = vpop.eup %8650 }
0x473f   : > { %v10160_v49 = vpop.f32.mrf.mxu1  ;;  %v5824_v41 = vsel %vm5727_vm3, %v10198_v50, 0.0 }
0x4740   : > { %v5767_v24 = vsel %vm5727_vm3, %v10160_v49, -inf }
0x4741   : > { %5768 = vmax.xlane.f32.xlu0 %v5767_v24  ;;  %v8165_v30 = vpop.f32.mrf.mxu1 }
0x4742   : > { %v10200_v6 = vpop.eup %8652 }
0x4743   : > { %v10164_v44 = vpop.f32.mrf.mxu0  ;;  %v10166_v18 = vpop.f32.mrf.mxu1  ;;  %v5827_v37 = vsel %vm5727_vm3, %v10200_v6, 0.0 }
0x4744   : > { %v5770_v57 = vsel %vm5727_vm3, %v10164_v44, -inf  ;;  %v5773_v40 = vsel %vm5727_vm3, %v10166_v18, -inf }
0x4745   : > { %v8170_v45 = vpop.f32.mrf.mxu0  ;;  %5771 = vmax.xlane.f32.xlu1 %v5770_v57  ;;  %5774 = vmax.xlane.f32.xlu0 %v5773_v40  ;;  %v8175_v19 = vpop.f32.mrf.mxu1 }
0x4756   : > { %4526 = vrot.lane.b32.xlu1 %v10014_v11, %s8855_s10 }
0x475a   : > { %4532 = vrot.lane.b32.xlu1 %v10014_v11, %s8856_s11 }
0x475b   : > { %4524 = vrot.lane.b32.xlu0 %v10020_v13, %s8855_s10  ;;  %s8776_s10 = sshll.u32 %s8865_s29, 4  ;;  %s8777_s10 = int_to_ptr.vmem [resolvable:$false] %s8776_s10 }
0x475f   : > { %4530 = vrot.lane.b32.xlu0 %v10020_v13, %s8856_s11  ;;  %s8778_s11 = scalar_lea.vmem %s8777_s10, 512 }
0x477e   : > { %5825 = vadd.xlane.f32.xlu1 %v5824_v41  ;;  %5828 = vadd.xlane.f32.xlu0 %v5827_v37 }
0x47a6   : > { %v5742_v17 = vpop.xlane.xlu1 %5741 }
0x47a7   : > { %v5780_v47 = vsub.f32 %v10116_v16, %v5742_v17 }
0x47a9   : > { %v5800_v29 = vmul.f32 1.442695, %v5780_v47 }
0x47ae   : > { %v5748_v27 = vpop.xlane.xlu1 %5747 }
0x47af   : > { %v5782_v59 = vsub.f32 %v10120_v0, %v5748_v27 }
0x47b1   : > { %v5804_v1 = vmul.f32 1.442695, %v5782_v59 }
0x47b2   : > { %v5736_v53 = vpop.xlane.xlu0 %5735 }
0x47b3   : > { %v5778_v54 = vsub.f32 %v10124_v58, %v5736_v53 }
0x47b5   : > { %v5796_v51 = vmul.f32 1.442695, %v5778_v54 }
0x47b6   : > { %v5754_v55 = vpop.xlane.xlu1 %5753  ;;  %v5739_v23 = vpop.xlane.xlu0 %5738 }
0x47b7   : > { %8654 = vpow2.f32 %v5796_v51  ;;  %v5779_v43 = vsub.f32 %v10128_v60, %v5739_v23  ;;  %v5784_v46 = vsub.f32 %v10130_v61, %v5754_v55 }
0x47b8   : > { %8656 = vpow2.f32 %v5800_v29 }
0x47b9   : > { %v5798_v3 = vmul.f32 1.442695, %v5779_v43  ;;  %v5808_v58 = vmul.f32 1.442695, %v5784_v46 }
0x47ba   : > { %v5745_v31 = vpop.xlane.xlu0 %5744 }
0x47bb   : > { %v5781_v16 = vsub.f32 %v10136_v42, %v5745_v31  ;;  %8658 = vpow2.f32 %v5798_v3 }
0x47bc   : > { %8660 = vpow2.f32 %v5804_v1 }
0x47bd   : > { %v5802_v8 = vmul.f32 1.442695, %v5781_v16 }
0x47be   : > { %v5760_v9 = vpop.xlane.xlu1 %5759  ;;  %v5751_v0 = vpop.xlane.xlu0 %5750 }
0x47bf   : > { %8662 = vpow2.f32 %v5802_v8  ;;  %v5786_v10 = vsub.f32 %v10142_v2, %v5760_v9  ;;  %v5783_v12 = vsub.f32 %v10140_v15, %v5751_v0 }
0x47c0   : > { %8664 = vpow2.f32 %v5808_v58 }
0x47c1   : > { %v5812_v60 = vmul.f32 1.442695, %v5786_v10  ;;  %v5806_v22 = vmul.f32 1.442695, %v5783_v12 }
0x47c2   : > { %v5757_v63 = vpop.xlane.xlu0 %5756 }
0x47c3   : > { %v5785_v61 = vsub.f32 %v10148_v26, %v5757_v63  ;;  %8666 = vpow2.f32 %v5806_v22 }
0x47c4   : > { %v10215_v28 = vpop.eup %8654  ;;  %8668 = vpow2.f32 %v5812_v60 }
0x47c5   : > { %v5810_v42 = vmul.f32 1.442695, %v5785_v61  ;;  %v5830_v32 = vsel %vm5727_vm3, %v10215_v28, 0.0  ;;  %v10219_v24 = vpop.eup %8656 }
0x47c6   : > { %v5766_v30 = vpop.xlane.xlu1 %5765  ;;  %5831 = vadd.xlane.f32.xlu1 %v5830_v32  ;;  %v5763_v2 = vpop.xlane.xlu0 %5762  ;;  %v5836_v19 = vsel %vm5727_vm3, %v10219_v24, 0.0 }
0x47c7   : > { %8670 = vpow2.f32 %v5810_v42  ;;  %v5788_v15 = vsub.f32 %v10154_v62, %v5766_v30  ;;  %v5787_v57 = vsub.f32 %v10152_v14, %v5763_v2 }
0x47c8   : > { %v10223_v40 = vpop.eup %8658 }
0x47c9   : > { %v5816_v26 = vmul.f32 1.442695, %v5788_v15  ;;  %v5814_v45 = vmul.f32 1.442695, %v5787_v57  ;;  %v10227_v34 = vpop.eup %8660  ;;  %v5833_v36 = vsel %vm5727_vm3, %v10223_v40, 0.0 }
0x47ca   : > { %5837 = vadd.xlane.f32.xlu1 %v5836_v19  ;;  %v5769_v35 = vpop.xlane.xlu0 %5768  ;;  %5834 = vadd.xlane.f32.xlu0 %v5833_v36  ;;  %v5842_v39 = vsel %vm5727_vm3, %v10227_v34, 0.0 }
0x47cb   : > { %8672 = vpow2.f32 %v5816_v26  ;;  %v5789_v38 = vsub.f32 %v10160_v49, %v5769_v35 }
0x47cc   : > { %v10232_v62 = vpop.eup %8662  ;;  %8674 = vpow2.f32 %v5814_v45 }
0x47cd   : > { %v5818_v14 = vmul.f32 1.442695, %v5789_v38  ;;  %v5839_v48 = vsel %vm5727_vm3, %v10232_v62, 0.0  ;;  %v10238_v41 = vpop.eup %8664 }
0x47ce   : > { %v5772_v37 = vpop.xlane.xlu1 %5771  ;;  %5843 = vadd.xlane.f32.xlu1 %v5842_v39  ;;  %v5775_v17 = vpop.xlane.xlu0 %5774  ;;  %5840 = vadd.xlane.f32.xlu0 %v5839_v48  ;;  %v5848_v29 = vsel %vm5727_vm3, %v10238_v41, 0.0 }
0x47cf   : > { %8676 = vpow2.f32 %v5818_v14  ;;  %v5790_v47 = vsub.f32 %v10164_v44, %v5772_v37  ;;  %v5791_v49 = vsub.f32 %v10166_v18, %v5775_v17 }
0x47d0   : > { %v10242_v27 = vpop.eup %8666 }
0x47d1   : > { %v5820_v53 = vmul.f32 1.442695, %v5790_v47  ;;  %v5822_v54 = vmul.f32 1.442695, %v5791_v49  ;;  %v10246_v59 = vpop.eup %8668  ;;  %v5845_v51 = vsel %vm5727_vm3, %v10242_v27, 0.0 }
0x47d2   : > { %5849 = vadd.xlane.f32.xlu1 %v5848_v29  ;;  %5846 = vadd.xlane.f32.xlu0 %v5845_v51  ;;  %v5854_v44 = vsel %vm5727_vm3, %v10246_v59, 0.0  ;;  %v10280_v0 = vpop.permute.xlu1 %4526  ;;  %v10282_v10 = vpop.permute.xlu0 %4524 }
0x47d3   : > { %8678 = vpow2.f32 %v5820_v53 }
0x47d4   : > { %v10250_v55 = vpop.eup %8670  ;;  %8680 = vpow2.f32 %v5822_v54 }
0x47d5   : > { %v5851_v18 = vsel %vm5727_vm3, %v10250_v55, 0.0 }
0x47d6   : > { %5855 = vadd.xlane.f32.xlu1 %v5854_v44  ;;  %5852 = vadd.xlane.f32.xlu0 %v5851_v18  ;;  %v10284_v12 = vpop.permute.xlu1 %4532  ;;  %v10286_v60 = vpop.permute.xlu0 %4530 }
0x47d8   : > { %v10256_v23 = vpop.eup %8672 }
0x47d9   : > { %v10258_v43 = vpop.eup %8674  ;;  %v5860_v1 = vsel %vm5727_vm3, %v10256_v23, 0.0 }
0x47da   : > { %5861 = vadd.xlane.f32.xlu1 %v5860_v1  ;;  %v5857_v46 = vsel %vm5727_vm3, %v10258_v43, 0.0 }
0x47db   : > { %5858 = vadd.xlane.f32.xlu0 %v5857_v46 }
0x47dc   : > { %v10264_v3 = vpop.eup %8676 }
0x47dd   : > { %v5863_v31 = vsel %vm5727_vm3, %v10264_v3, 0.0 }
0x47df   : > { %5864 = vadd.xlane.f32.xlu0 %v5863_v31 }
0x47e0   : > { %v10268_v16 = vpop.eup %8678 }
0x47e1   : > { %v10270_v58 = vpop.eup %8680  ;;  %v5866_v8 = vsel %vm5727_vm3, %v10268_v16, 0.0 }
0x47e2   : > { %5867 = vadd.xlane.f32.xlu1 %v5866_v8  ;;  %v5869_v9 = vsel %vm5727_vm3, %v10270_v58, 0.0 }
0x47e3   : > { %5870 = vadd.xlane.f32.xlu0 %v5869_v9 }
0x47f3   : > { %4538 = vrot.lane.b32.xlu1 %v10014_v11, %s8857_s12 }
0x47f9   : > { %4536 = vrot.lane.b32.xlu0 %v10020_v13, %s8857_s12  ;;  %s7388_s12 = sshll.u32 %s273_s9, 4 }
0x4807   : > { %v5826_v22 = vpop.xlane.xlu1 %5825  ;;  %v5829_v63 = vpop.xlane.xlu0 %5828 }
0x4808   : > { %8682 = vrcp.f32 %v5826_v22 }
0x4809   : > { %8684 = vrcp.f32 %v5829_v63 }
0x4815   : > { %v8683_v61 = vpop.eup %8682 }
0x4816   : > { %v8685_v42 = vpop.eup %8684  ;;  %v5888_v32 = vmul.f32 %v8683_v61, %v10198_v50 }
0x4817   : > { %v5889_v11 = vmul.f32 %v8685_v42, %v10200_v6  ;;  %v7150_v42 = vld [vmem:[#allocation3 + $0xb0] sm:$0xff] }
0x4818   : > { %8179 = vmatmul.mubr.msk.f32.vlgmr.msra.gmra.mxu0 %vm5727_vm3, %v5888_v32  ;;  %v7149_v32 = vld [vmem:[#allocation3 + $0xa8] sm:$0xff] }
0x4819   : > { %8184 = vmatmul.mubr.msk.f32.vlgmr.msra.gmra.mxu1 %vm5727_vm3, %v5889_v11  ;;  %8187 = vmatpush3.msra.mxu0 %v10184_v5 }
0x481a   : > { %8192 = vmatpush3.msra.mxu1 %v10176_v4  ;;  %8188 = vmatprep.mubr.msk.f32.mxu0 %vm8849_vm7, %v8848_v25 }
0x481b   : > { %8196 = vmatprep.subr.mxu0 %v8848_v25  ;;  %8193 = vmatprep.mubr.msk.f32.mxu1 %vm8849_vm7, %v8848_v25 }
0x481c   : > { %8201 = vmatprep.subr.mxu1 %v8848_v25 }
0x484f   : > { %v5832_v13 = vpop.xlane.xlu1 %5831 }
0x4850   : > { %8686 = vrcp.f32 %v5832_v13 }
0x4853   : > { %v5838_v50 = vpop.xlane.xlu1 %5837  ;;  %v5835_v6 = vpop.xlane.xlu0 %5834 }
0x4854   : > { %8688 = vrcp.f32 %v5838_v50 }
0x4855   : > { %8690 = vrcp.f32 %v5835_v6 }
0x4857   : > { %v5844_v30 = vpop.xlane.xlu1 %5843  ;;  %v5841_v5 = vpop.xlane.xlu0 %5840 }
0x4858   : > { %8692 = vrcp.f32 %v5844_v30  ;;  %v7148_v30 = vld [vmem:[#allocation3 + $0xa0] sm:$0xff] }
0x4859   : > { %8694 = vrcp.f32 %v5841_v5 }
0x485b   : > { %v5850_v4 = vpop.xlane.xlu1 %5849  ;;  %v5847_v2 = vpop.xlane.xlu0 %5846 }
0x485c   : > { %8696 = vrcp.f32 %v5850_v4 }
0x485d   : > { %v8687_v15 = vpop.eup %8686  ;;  %8698 = vrcp.f32 %v5847_v2 }
0x485e   : > { %v5890_v57 = vmul.f32 %v8687_v15, %v10215_v28 }
0x485f   : > { %v5856_v26 = vpop.xlane.xlu1 %5855  ;;  %v5853_v45 = vpop.xlane.xlu0 %5852 }
0x4860   : > { %8700 = vrcp.f32 %v5856_v26  ;;  %8189 = vmatmul.mubr.msk.f32.vlgmr.msra.gmra.mxu0 %vm5727_vm3, %v5890_v57 }
0x4861   : > { %v8689_v19 = vpop.eup %8688  ;;  %8702 = vrcp.f32 %v5853_v45  ;;  %8197 = vmatpush3.msra.mxu0 %v10192_v52  ;;  %8198 = vmatprep.mubr.msk.f32.mxu0 %vm8849_vm7, %v8848_v25 }
0x4862   : > { %v8691_v35 = vpop.eup %8690  ;;  %8206 = vmatprep.subr.mxu0 %v8848_v25  ;;  %v5892_v36 = vmul.f32 %v8689_v19, %v10219_v24 }
0x4863   : > { %v5862_v38 = vpop.xlane.xlu1 %5861  ;;  %v5891_v28 = vmul.f32 %v8691_v35, %v10223_v40 }
0x4864   : > { %8704 = vrcp.f32 %v5862_v38  ;;  %v5859_v14 = vpop.xlane.xlu0 %5858  ;;  %8199 = vmatmul.mubr.msk.f32.vlgmr.msra.gmra.mxu0 %vm5727_vm3, %v5892_v36 }
0x4865   : > { %v8693_v39 = vpop.eup %8692  ;;  %8706 = vrcp.f32 %v5859_v14  ;;  %8194 = vmatmul.mubr.msk.f32.vlgmr.msra.gmra.mxu1 %vm5727_vm3, %v5891_v28  ;;  %8207 = vmatpush3.msra.mxu0 %v10182_v21 }
0x4866   : > { %v8695_v52 = vpop.eup %8694  ;;  %8202 = vmatpush3.msra.mxu1 %v10172_v20  ;;  %8203 = vmatprep.mubr.msk.f32.mxu1 %vm8849_vm7, %v8848_v25  ;;  %v5894_v24 = vmul.f32 %v8693_v39, %v10227_v34 }
0x4867   : > { %8208 = vmatprep.mubr.msk.f32.mxu0 %vm8849_vm7, %v8848_v25  ;;  %8211 = vmatprep.subr.mxu1 %v8848_v25  ;;  %v5893_v40 = vmul.f32 %v8695_v52, %v10232_v62 }
0x4868   : > { %8216 = vmatprep.subr.mxu0 %v8848_v25  ;;  %v5865_v48 = vpop.xlane.xlu0 %5864  ;;  %8209 = vmatmul.mubr.msk.f32.vlgmr.msra.gmra.mxu0 %vm5727_vm3, %v5894_v24 }
0x4869   : > { %v8697_v21 = vpop.eup %8696  ;;  %8708 = vrcp.f32 %v5865_v48  ;;  %8204 = vmatmul.mubr.msk.f32.vlgmr.msra.gmra.mxu1 %vm5727_vm3, %v5893_v40  ;;  %8217 = vmatpush3.msra.mxu0 %v10190_v33 }
0x486a   : > { %v8699_v20 = vpop.eup %8698  ;;  %8212 = vmatpush3.msra.mxu1 %v10174_v56  ;;  %8218 = vmatprep.mubr.msk.f32.mxu0 %vm8849_vm7, %v8848_v25  ;;  %v5896_v34 = vmul.f32 %v8697_v21, %v10238_v41 }
0x486b   : > { %8226 = vmatprep.subr.mxu0 %v8848_v25  ;;  %v5868_v62 = vpop.xlane.xlu1 %5867  ;;  %8213 = vmatprep.mubr.msk.f32.mxu1 %vm8849_vm7, %v8848_v25  ;;  %v5895_v37 = vmul.f32 %v8699_v20, %v10242_v27 }
0x486c   : > { %8710 = vrcp.f32 %v5868_v62  ;;  %8221 = vmatprep.subr.mxu1 %v8848_v25  ;;  %v5871_v33 = vpop.xlane.xlu0 %5870  ;;  %8219 = vmatmul.mubr.msk.f32.vlgmr.msra.gmra.mxu0 %vm5727_vm3, %v5896_v34 }
0x486d   : > { %v8701_v56 = vpop.eup %8700  ;;  %8712 = vrcp.f32 %v5871_v33  ;;  %8214 = vmatmul.mubr.msk.f32.vlgmr.msra.gmra.mxu1 %vm5727_vm3, %v5895_v37  ;;  %8227 = vmatpush3.msra.mxu0 %v10282_v10 }
0x486e   : > { %v8703_v41 = vpop.eup %8702  ;;  %8222 = vmatpush3.msra.mxu1 %v10178_v7  ;;  %8228 = vmatprep.mubr.msk.f32.mxu0 %vm8849_vm7, %v8848_v25  ;;  %v5898_v17 = vmul.f32 %v8701_v56, %v10246_v59 }
0x486f   : > { %8223 = vmatprep.mubr.msk.f32.mxu1 %vm8849_vm7, %v8848_v25  ;;  %8231 = vmatprep.subr.mxu1 %v8848_v25  ;;  %v5897_v47 = vmul.f32 %v8703_v41, %v10250_v55  ;;  %v4539_v55 = vpop.permute.xlu1 %4538 }
0x4870   : > { %8236 = vmatprep.subr.mxu0 %v8848_v25  ;;  %8229 = vmatmul.mubr.msk.f32.vlgmr.msra.gmra.mxu0 %vm5727_vm3, %v5898_v17  ;;  %v4537_v54 = vpop.permute.xlu0 %4536 }
0x4871   : > { %v8705_v49 = vpop.eup %8704  ;;  %8224 = vmatmul.mubr.msk.f32.vlgmr.msra.gmra.mxu1 %vm5727_vm3, %v5897_v47  ;;  %8237 = vmatpush3.msra.mxu0 %v10286_v60 }
0x4872   : > { %v8707_v7 = vpop.eup %8706  ;;  %8232 = vmatpush3.msra.mxu1 %v10280_v0  ;;  %8233 = vmatprep.mubr.msk.f32.mxu1 %vm8849_vm7, %v8848_v25  ;;  %v5900_v27 = vmul.f32 %v8705_v49, %v10256_v23 }
0x4873   : > { %8238 = vmatprep.mubr.msk.f32.mxu0 %vm8849_vm7, %v8848_v25  ;;  %8241 = vmatprep.subr.mxu1 %v8848_v25  ;;  %v5899_v53 = vmul.f32 %v8707_v7, %v10258_v43 }
0x4874   : > { %8246 = vmatprep.subr.mxu0 %v8848_v25  ;;  %8239 = vmatmul.mubr.msk.f32.vlgmr.msra.gmra.mxu0 %vm5727_vm3, %v5900_v27 }
0x4875   : > { %8234 = vmatmul.mubr.msk.f32.vlgmr.msra.gmra.mxu1 %vm5727_vm3, %v5899_v53  ;;  %8247 = vmatpush3.msra.mxu0 %v4537_v54 }
0x4876   : > { %v8709_v29 = vpop.eup %8708  ;;  %8242 = vmatpush3.msra.mxu1 %v10284_v12  ;;  %8243 = vmatprep.mubr.msk.f32.mxu1 %vm8849_vm7, %v8848_v25  ;;  %v7151_v12 = vld [vmem:[#allocation3 + $0xb8] sm:$0xff] }
0x4877   : > { %8251 = vmatprep.subr.mxu1 %v8848_v25  ;;  %v5901_v59 = vmul.f32 %v8709_v29, %v10264_v3  ;;  %8248 = vmatprep.mubr.msk.f32.mxu0 %vm8849_vm7, %v8848_v25 }
0x4878   : > { %8256 = vmatprep.subr.mxu0 %v7151_v12 }
0x4879   : > { %v8711_v51 = vpop.eup %8710  ;;  %8244 = vmatmul.mubr.msk.f32.vlgmr.msra.gmra.mxu1 %vm5727_vm3, %v5901_v59 }
0x487a   : > { %v8713_v44 = vpop.eup %8712  ;;  %8252 = vmatpush3.msra.mxu1 %v4539_v55  ;;  %8253 = vmatprep.mubr.msk.f32.mxu1 %vm8849_vm7, %v8848_v25  ;;  %v5902_v18 = vmul.f32 %v8711_v51, %v10268_v16  ;;  %vm7141_vm7 = vcmask 195584  }
0x487b   : > { %v5903_v23 = vmul.f32 %v8713_v44, %v10270_v58 }
0x487c   : > { %8249 = vmatmul.mubr.msk.f32.vlgmr.msra.gmra.mxu0 %vm5727_vm3, %v5902_v18 }
0x487d   : > { %8254 = vmatmul.mubr.msk.f32.vlgmr.msra.gmra.mxu1 %vm5727_vm3, %v5903_v23  ;;  %8257 = vmatpush3.msra.mxu0 %v7151_v12 }
0x487e   : > { %8258 = vmatprep.subr.mxu0 %v7150_v42 }
0x487f   : > { %8259 = vmatpush3.msra.mxu0 %v7150_v42 }
0x4880   : > { %8260 = vmatprep.subr.mxu0 %v7149_v32 }
0x4881   : > { %8261 = vmatpush3.msra.mxu0 %v7149_v32 }
0x4882   : > { %8262 = vmatprep.subr.mxu0 %v7148_v30 }
0x4883   : > { %8263 = vmatpush3.msra.mxu0 %v7148_v30 }
0x48d8   : > { %v10372_v43 = vpop.f32.mrf.mxu0 }
0x48d9   : > { %v10374_v1 = vpop.f32.mrf.mxu1 }
0x48da   : > { %v8180_v46 = vpop.f32.mrf.mxu0 }
0x48db   : > { %v8185_v3 = vpop.f32.mrf.mxu1 }
0x4920   : > { %v6119_v31 = vpop.f32.mrf.mxu0 }
0x4921   : > { %7074 = vrot.lane.b32.xlu0 %v6119_v31, %s8858_s15  ;;  %v8718_v31 = vld [vmem:[#allocation2 + $0x8] sm:$0xff] }
0x4922   : > { %v8190_v8 = vpop.f32.mrf.mxu0 }
0x4924   : > { %v6265_v9 = vpop.f32.mrf.mxu0 }
0x4925   : > { %v6192_v25 = vpop.f32.mrf.mxu1  ;;  %7082 = vrot.lane.b32.xlu0 %v6265_v9, %s8859_s17 }
0x4926   : > { %7076 = vrot.lane.b32.xlu1 %v6192_v25, %s8858_s15  ;;  %v8200_v16 = vpop.f32.mrf.mxu0  ;;  %v8719_v25 = vld [vmem:[#allocation2] sm:$0xff]  ;;  %s7553_s15 = sshll.u32 %s8923_s25, 8 }
0x4927   : > { %v8195_v58 = vpop.f32.mrf.mxu1 }
0x4928   : > { %v6411_v0 = vpop.f32.mrf.mxu0 }
0x4929   : > { %v6338_v10 = vpop.f32.mrf.mxu1  ;;  %7090 = vrot.lane.b32.xlu0 %v6411_v0, %s8860_s16 }
0x492a   : > { %7084 = vrot.lane.b32.xlu1 %v6338_v10, %s8859_s17  ;;  %v8210_v60 = vpop.f32.mrf.mxu0 }
0x492b   : > { %v8205_v22 = vpop.f32.mrf.mxu1 }
0x492c   : > { %v6557_v63 = vpop.f32.mrf.mxu0 }
0x492d   : > { %v6484_v61 = vpop.f32.mrf.mxu1  ;;  %7098 = vrot.lane.b32.xlu0 %v6557_v63, %s8861_s18 }
0x492e   : > { %7092 = vrot.lane.b32.xlu1 %v6484_v61, %s8860_s16  ;;  %v8220_v11 = vpop.f32.mrf.mxu0  ;;  %s275_s16 = scalar_lea.vmem [#allocation8], %s7388_s12 }
0x492f   : > { %v8215_v13 = vpop.f32.mrf.mxu1 }
0x4930   : > { %v6703_v50 = vpop.f32.mrf.mxu0 }
0x4931   : > { %v6630_v6 = vpop.f32.mrf.mxu1  ;;  %7106 = vrot.lane.b32.xlu0 %v6703_v50, %s8862_s19 }
0x4932   : > { %7100 = vrot.lane.b32.xlu1 %v6630_v6, %s8861_s18  ;;  %v8230_v5 = vpop.f32.mrf.mxu0  ;;  %s7296_s18 = sshll.u32 %s275_s16, 4  ;;  %s10407_s18 = int_to_ptr.vmem [resolvable:$true] %s7296_s18 }
0x4933   : > { %v8225_v4 = vpop.f32.mrf.mxu1  ;;  %s8772_s25 = scalar_lea.vmem %s10407_s18, 256  ;;  %p8779_p11 = scmp.lt.s32.totalorder %s10407_s18, %s8777_s10 }
0x4934   : > { %v6849_v2 = vpop.f32.mrf.mxu0  ;;  %p8773_p10 = scmp.ne.s32.totalorder %s10407_s18, %s8772_s25  ;;  %p8780_p0 = scmp.lt.s32.totalorder %s8778_s11, %s8772_s25 }
0x4935   : > { %v6776_v15 = vpop.f32.mrf.mxu1  ;;  %7114 = vrot.lane.b32.xlu0 %v6849_v2, %s8863_s20 }
0x4936   : > { %7108 = vrot.lane.b32.xlu1 %v6776_v15, %s8862_s19  ;;  %v8240_v57 = vpop.f32.mrf.mxu0  ;;  %p8774_p12 = pnand %p8773_p10, %p8940_p5  ;;  %p8781_p1 = por %p8780_p0, %p8779_p11 }
0x4937   : > { %v8235_v26 = vpop.f32.mrf.mxu1  ;;  %v7546_v57 = vld [vmem:[%s10456_s5 + $0xd] ss:$0 sm:$0xff] }
0x4938   : > { %p8775_p8 = pneg %p8774_p12 }
0x4939   : > { %v6922_v45 = vpop.f32.mrf.mxu1 }
0x493a   : > { %7116 = vrot.lane.b32.xlu1 %v6922_v45, %s8863_s20  ;;  %v7547_v45 = vld [vmem:[%s10456_s5 + $0xe] ss:$0 sm:$0xff]  ;;  %p8782_p3 = pnand %p8781_p1, %p8775_p8 }
0x493b   : > { %v8245_v19 = vpop.f32.mrf.mxu1 }
0x493c   : > { %v6995_v35 = vpop.f32.mrf.mxu0 }
0x493d   : > { %v7068_v36 = vpop.f32.mrf.mxu1  ;;  %7122 = vrot.lane.b32.xlu0 %v6995_v35, %s8864_s26 }
0x493e   : > { %7124 = vrot.lane.b32.xlu1 %v7068_v36, %s8864_s26  ;;  %v8250_v38 = vpop.f32.mrf.mxu0  ;;  %s10405_s26 = scalar_lea.hbm %s10457_s6, %s7553_s15 }
0x493f   : > { %v8255_v28 = vpop.f32.mrf.mxu1 }
0x4993   : > { %v7075_v14 = vpop.permute.xlu0 %7074 }
0x4994   : > { %v7128_v37 = vsel %vm4542_vm2, %v10372_v43, %v7075_v14  ;;  %v7543_v43 = vld [vmem:[%s10456_s5 + $0xc] ss:$0 sm:$0xff] }
0x4997   : > { %v7083_v39 = vpop.permute.xlu0 %7082 }
0x4998   : > { %v7077_v52 = vpop.permute.xlu1 %7076  ;;  %v7130_v33 = vsel %vm5727_vm3, %v7128_v37, %v7083_v39 }
0x4999   : > { %v7129_v56 = vsel %vm4542_vm2, %v10374_v1, %v7077_v52 }
0x499b   : > { %v7091_v24 = vpop.permute.xlu0 %7090 }
0x499c   : > { %v7085_v40 = vpop.permute.xlu1 %7084  ;;  %v7133_v17 = vsel %vm7132_vm4, %v7130_v33, %v7091_v24 }
0x499d   : > { %v7131_v47 = vsel %vm5727_vm3, %v7129_v56, %v7085_v40 }
0x499f   : > { %v7099_v48 = vpop.permute.xlu0 %7098 }
0x49a0   : > { %v7093_v21 = vpop.permute.xlu1 %7092  ;;  %v7136_v7 = vsel %vm7135_vm5, %v7133_v17, %v7099_v48 }
0x49a1   : > { %v7134_v27 = vsel %vm7132_vm4, %v7131_v47, %v7093_v21 }
0x49a3   : > { %v7107_v34 = vpop.permute.xlu0 %7106 }
0x49a4   : > { %v7101_v20 = vpop.permute.xlu1 %7100  ;;  %v7139_v53 = vsel %vm7138_vm6, %v7136_v7, %v7107_v34 }
0x49a5   : > { %v7137_v54 = vsel %vm7135_vm5, %v7134_v27, %v7101_v20 }
0x49a7   : > { %v7115_v41 = vpop.permute.xlu0 %7114 }
0x49a8   : > { %v7109_v62 = vpop.permute.xlu1 %7108  ;;  %v7142_v29 = vsel %vm7141_vm7, %v7139_v53, %v7115_v41 }
0x49a9   : > { %v7140_v59 = vsel %vm7138_vm6, %v7137_v54, %v7109_v62 }
0x49ac   : > { %v7117_v49 = vpop.permute.xlu1 %7116 }
0x49ad   : > { %v7143_v55 = vsel %vm7141_vm7, %v7140_v59, %v7117_v49 }
0x49af   : > { %v7123_v51 = vpop.permute.xlu0 %7122 }
0x49b0   : > { %v7145_v44 = vsel %vm7144_vm8, %v7142_v29, %v7123_v51  ;;  %v7125_v18 = vpop.permute.xlu1 %7124 }
0x49b1   : > { %v7146_v23 = vsel %vm7144_vm8, %v7143_v55, %v7125_v18  ;;  %8264 = vmatprep.mubr.msk.f32.mxu0 %vm313_vm0, %v7145_v44 }
0x49b2   : > { %8265 = vmatmul.mubr.msk.f32.vlgmr.msra.gmra.mxu0 %vm313_vm0, %v7146_v23 }
0x4a72   : > { %v8266_v1 = vpop.f32.mrf.mxu0 }
0x4a73   : > { %v7235_v46 = vadd.f32 %v8266_v1, %v7543_v43 }
0x4a74   : > { %v7229_v3 = vpop.f32.mrf.mxu0 }
0x4a75   : > { %v7239_v8 = vadd.f32 %v8718_v31, %v7235_v46  ;;  %v7230_v9 = vadd.f32 %v7543_v43, %v7229_v3 }
0x4a77   : > { %v7238_v16 = vadd.f32 %v8719_v25, %v7230_v9  ;;  %v7245_v58 = vsel %vm313_vm0, %v7239_v8, 0.0 }
0x4a78   : > { %7246 = vadd.xlane.f32.xlu1 %v7245_v58 }
0x4a79   : > { %v7242_v0 = vsel %vm313_vm0, %v7238_v16, 0.0 }
0x4a7a   : > { %7243 = vadd.xlane.f32.xlu0 %v7242_v0 }
0x4b01   : > { %v7247_v10 = vpop.xlane.xlu1 %7246 }
0x4b02   : > { %v7249_v12 = vmul.f32 0.03125, %v7247_v10 }
0x4b03   : > { %v7244_v60 = vpop.xlane.xlu0 %7243 }
0x4b04   : > { %v7248_v22 = vmul.f32 0.03125, %v7244_v60  ;;  %v7251_v63 = vsub.f32 %v7239_v8, %v7249_v12 }
0x4b06   : > { %v7250_v61 = vsub.f32 %v7238_v16, %v7248_v22  ;;  %v7253_v11 = vmul.f32 %v7251_v63, %v7251_v63 }
0x4b08   : > { %v7252_v42 = vmul.f32 %v7250_v61, %v7250_v61  ;;  %v7257_v13 = vsel %vm313_vm0, %v7253_v11, 0.0 }
0x4b0a   : > { %v7254_v32 = vsel %vm313_vm0, %v7252_v42, 0.0 }
0x4b0b   : > { %7255 = vadd.xlane.f32.xlu0 %v7254_v32 }
0x4b0f   : > { %7258 = vadd.xlane.f32.xlu0 %v7257_v13 }
0x4b94   : > { %v7256_v50 = vpop.xlane.xlu0 %7255 }
0x4b95   : > { %v7260_v6 = vmul.f32 0.03125, %v7256_v50 }
0x4b97   : > { %v7262_v30 = vadd.f32 1e-05, %v7260_v6 }
0x4b98   : > { %v7259_v5 = vpop.xlane.xlu0 %7258 }
0x4b99   : > { %8714 = vrsqrt.f32 %v7262_v30  ;;  %v7261_v4 = vmul.f32 0.03125, %v7259_v5 }
0x4b9b   : > { %v7263_v2 = vadd.f32 1e-05, %v7261_v4 }
0x4b9d   : > { %8716 = vrsqrt.f32 %v7263_v2 }
0x4ba6   : > { %v8715_v15 = vpop.eup %8714 }
0x4ba7   : > { %v7266_v26 = vmul.f32 %v8715_v15, %v7250_v61 }
0x4ba9   : > { %v7272_v19 = vmul.f32 %v7546_v57, %v7266_v26 }
0x4baa   : > { %v8717_v35 = vpop.eup %8716 }
0x4bab   : > { %v7278_v36 = vadd.f32 %v7547_v45, %v7272_v19  ;;  %v7267_v38 = vmul.f32 %v8717_v35, %v7251_v63 }
0x4bad   : > { %v7273_v28 = vmul.f32 %v7546_v57, %v7267_v38  ;;  %7280 = vst.msk [vmem:[%s275_s16] sm:$0xff] %vm313_vm0, %v7278_v36 }
0x4baf   : > { %v7279_v14 = vadd.f32 %v7547_v45, %v7273_v28 }
0x4bb1   : > { %7281 = vst.msk [vmem:[%s275_s16 + $0x8] sm:$0xff] %vm313_vm0, %v7279_v14 }
0x4bb2   : > { %8785 = shalt.err (!%p8782_p3)
}
0x4bb3   : > { %s8786_s9 = scalar_lea.hbm %s10405_s26, 256  ;;  %s8790_s14 = scalar_lea.hbm %s10457_s6, 512 }
0x4bb4   : > { %p8787_p2 = scmp.ne.s32.totalorder %s10405_s26, %s8786_s9  ;;  %p8791_p7 = scmp.lt.s32.totalorder %s10405_s26, %s10457_s6 }
0x4bb5   : > { %p8792_p6 = scmp.lt.s32.totalorder %s8790_s14, %s8786_s9 }
0x4bb6   : > { %p8788_p4 = pnand %p8787_p2, %p8940_p5 }
0x4bb7   : > { %p8793_p9 = por %p8792_p6, %p8791_p7 }
0x4bb8   : > { %p8789_p13 = pneg %p8788_p4 }
0x4bba   : > { %p8794_p10 = pnand %p8793_p9, %p8789_p13 }
0x4bbc   : > { %8797 = shalt.err (!%p8794_p10)
}
0x4bbd   : > { %s8866_s19 = smov 128  }
0x4bbe   : > { %8275 = dma.vmem_to_hbm [thread:$0]  (%p8940_p5), %s10407_s18, 256, %s10405_s26, %s10410_s28, %s8866_s19, %s8866_s19, %s8859_s17  }
0x4bbf PF: > { %p8292_p12 = scmp.ge.s32.totalorder %s8840_s24, 2  ;;  %s7311_s20 = sand.u32 1, %s8828_s21  }
0x4bc0   : > { %p10467_p8 = scmp.ne.s32.totalorder %s10460_s8, 0  ;;  %s7312_s25 = scalar_lea.sflag [#allocation5], %s7311_s20 }
0x4bc2   : > { %p8285_p11 = pnand %p8292_p12, %p10467_p8 }
0x4bc4   : > { %p8286_p0 = pneg %p8285_p11 }
0x4bc6   : > { %8823 = dma.done.wait (%p8286_p0), %s7312_s25, 256  }
0x4bc7   : > { %8825 = vsyncadd (%p8286_p0), %s7312_s25, 4294967040  ;;  %p18_p1 = scmp.ge.s32.totalorder %s8927_s27, 4   ;;  %s10468_s21 = smov %s8832_s22 }
0x4bc8   : > { %s10469_s22 = smov %s8836_s23  ;;  %s10470_s23 = smov %s8938_s30 }
0x4bc9   : > { %s10471_s24 = smov %s8927_s27  ;;  %20 = sbr.rel (!%p18_p1) target bundleno = 5 (0x5), region = 98 }
0x4bce   :  { %7317 = vsyncpa [#allocation4], 1 }
0x4bcf   :  { %7319 = vsyncpa [#allocation4 + $0x1], 1 }
0x4bd0   :  { %7320 = vsyncpa [#allocation7], 1 }
0x4bd1   :  { %7321 = vsyncpa [#allocation5], 1 }
0x4bd2   :  { %7323 = vsyncpa [#allocation5 + $0x1], 1 }

</bundles_post_ra>
